<compile_context>
chip_gen: v7x
topology: tpu7x:2x2x1
jax: 0.10.0
libtpu: 0.0.40
codegen_flags: <defaults>
</compile_context>

<pallas_src>
import math

import jax
import jax.numpy as jnp
import numpy as np
from jax.experimental import pallas as pl
from jax.experimental.pallas import tpu as pltpu


def asa_kernel(x_ref, mask_ref, w12_ref, sh12_ref, a12_ref,
               w3_ref, sh3_ref, a3_ref, o_ref):
    # x_ref block: (1, T, F*C) -- one batch element, lane-dense slab.
    T = x_ref.shape[1]
    FC = x_ref.shape[2]
    C = w12_ref.shape[0]
    C4 = w3_ref.shape[0]
    F = FC // C
    TF = T * F

    # (T, F*C) -> (T*F, C): channels on lanes for the pointwise-conv matmuls.
    x2d = x_ref[0].reshape(TF, C)

    # ---- fused pointwise conv 1 & 2 (BN scale folded into weights) ----
    y12 = jnp.dot(x2d, w12_ref[...], preferred_element_type=jnp.float32)
    y12 = y12 + sh12_ref[...]                       # BN shift
    y12 = jnp.where(y12 >= 0.0, y12, a12_ref[...] * y12)   # PReLU (per-half alpha)

    y12_3d = y12.reshape(T, F, 2 * C4)
    x1 = y12_3d[..., :C4]                           # (T, F, C4)  branch 1
    x2 = y12_3d[..., C4:]                           # (T, F, C4)  branch 2

    # ---- frequency self-attention (independent per time step t) ----
    scale_f = 1.0 / math.sqrt(C * F / 2)
    sf = jnp.einsum('tfc,tgc->tfg', x1, x1,
                    preferred_element_type=jnp.float32) * scale_f   # (T, F, F)
    sf = sf - jnp.max(sf, axis=-1, keepdims=True)
    pf = jnp.exp(sf)
    pf = pf * pl.reciprocal(jnp.sum(pf, axis=-1, keepdims=True), approx=True)
    mmf = jnp.einsum('tfg,tgc->tfc', pf, x1,
                     preferred_element_type=jnp.float32)            # (T, F, C4)

    # ---- causal time self-attention (independent per frequency bin f) ----
    scale_t = 1.0 / math.sqrt(C * T / 2)
    st = jnp.einsum('tfc,sfc->fts', x2, x2,
                    preferred_element_type=jnp.float32) * scale_t   # (F, T, T)
    st = st + mask_ref[...][None, :, :]             # precomputed causal mask
    st = st - jnp.max(st, axis=-1, keepdims=True)
    pt = jnp.exp(st)
    pt = pt * pl.reciprocal(jnp.sum(pt, axis=-1, keepdims=True), approx=True)
    m_tfc = jnp.einsum('fts,sfc->tfc', pt, mmf,
                       preferred_element_type=jnp.float32)          # (T, F, C4)

    # ---- output pointwise conv + BN shift + PReLU + residual ----
    m2d = m_tfc.reshape(TF, C4)
    y3 = jnp.dot(m2d, w3_ref[...], preferred_element_type=jnp.float32)
    y3 = y3 + sh3_ref[...]
    y3 = jnp.where(y3 >= 0.0, y3, a3_ref[...] * y3)                 # (T*F, C)

    # lane-dense store: (T*F, C) -> (T, F*C)
    o_ref[0] = (y3 + x2d).reshape(T, FC)


def asa_pallas(x_slab, mask, w12, sh12, a12, w3, sh3, a3):
    # x_slab: (B, T, F*C) float32, lane-dense
    B, T, FC = x_slab.shape
    const2 = lambda b: (0, 0)

    return pl.pallas_call(
        asa_kernel,
        out_shape=jax.ShapeDtypeStruct((B, T, FC), jnp.float32),
        grid=(B,),
        in_specs=[
            pl.BlockSpec((1, T, FC), lambda b: (b, 0, 0)),   # x slab
            pl.BlockSpec(mask.shape, const2),                # causal mask (T, T)
            pl.BlockSpec(w12.shape, const2),                 # fused w1|w2  (C, 2*C4)
            pl.BlockSpec(sh12.shape, const2),                # fused BN shift (1, 2*C4)
            pl.BlockSpec(a12.shape, const2),                 # fused PReLU alpha (1, 2*C4)
            pl.BlockSpec(w3.shape, const2),                  # w3 (C4, C)
            pl.BlockSpec(sh3.shape, const2),                 # BN3 shift (1, C)
            pl.BlockSpec(a3.shape, const2),                  # PReLU3 alpha (1, C)
        ],
        out_specs=pl.BlockSpec((1, T, FC), lambda b: (b, 0, 0)),
        input_output_aliases={0: 0},                         # out aliases x slab
        compiler_params=pltpu.CompilerParams(
            dimension_semantics=("parallel",)),              # batch -> both TCs on v7x
    )(x_slab, mask, w12, sh12, a12, w3, sh3, a3)


@jax.jit
def asa_forward_nchw(x_nchw, w12, sh12, a12, w3, sh3, a3, mask):
    """NCHW wrapper: layout plumbing outside the kernel."""
    B, C, T, F = x_nchw.shape
    x_slab = jnp.transpose(x_nchw, (0, 2, 3, 1)).reshape(B, T, F * C)
    o_slab = asa_pallas(x_slab, mask, w12, sh12, a12, w3, sh3, a3)
    return jnp.transpose(o_slab.reshape(B, T, F, C), (0, 3, 1, 2))


# ---------------- pure-JAX reference (mirrors the PyTorch NCHW code) ----------------
def asa_reference_nchw(x, W1, W2, W3,
                       g1, b1, m1, v1, g2, b2, m2, v2, g3, b3, m3, v3,
                       a1, a2, a3, eps=1e-5):
    B, C, T, F = x.shape

    def pw_bn_prelu(inp, W, g, b, m, v, a):
        y = jnp.einsum('bcTF,oc->boTF', inp, W)
        y = (y - m[None, :, None, None]) * (
            g[None, :, None, None] / jnp.sqrt(v[None, :, None, None] + eps)
        ) + b[None, :, None, None]
        return jnp.where(y >= 0, y, a * y)

    x1 = pw_bn_prelu(x, W1, g1, b1, m1, v1, a1)
    x2 = pw_bn_prelu(x, W2, g2, b2, m2, v2, a2)

    qf = jnp.transpose(x1, (0, 2, 3, 1))
    v_ = jnp.transpose(x1, (0, 2, 3, 1))
    kf = jnp.transpose(x1, (0, 2, 1, 3))
    mmf = jax.nn.softmax(jnp.matmul(qf, kf) / math.sqrt(C * F / 2), axis=-1)
    mmf = jnp.matmul(mmf, v_)

    qt = jnp.transpose(x2, (0, 3, 2, 1))
    kt = jnp.transpose(x2, (0, 3, 1, 2))
    mmt = jnp.matmul(qt, kt) / math.sqrt(C * T / 2)
    tri = jnp.tril(jnp.ones((T, T), bool))
    mask = jnp.where(tri, 0.0, -1000000000.0)[None, None, :, :]
    mmt = jax.nn.softmax(mmt + mask, axis=-1)

    mmf_p = jnp.transpose(mmf, (0, 2, 1, 3))
    m = jnp.matmul(mmt, mmf_p)
    m = jnp.transpose(m, (0, 3, 2, 1))
    m = pw_bn_prelu(m, W3, g3, b3, m3, v3, a3)
    return m + x


if __name__ == "__main__":
    # (batch, channels, time, freq). C chosen so F*C and T*F are multiples of 128
    # (lane-dense slabs, MXU-friendly matmuls) while staying small.
    B, C, T, F = 2, 128, 8, 16
    C4 = C // 4
    eps = 1e-5

    key = jax.random.PRNGKey(0)
    ks = jax.random.split(key, 16)

    x_nchw = jax.random.normal(ks[0], (B, C, T, F), jnp.float32)

    # Conv2d weights (out, in) for the 1x1 pointwise convs.
    W1 = jax.random.normal(ks[1], (C4, C), jnp.float32) * 0.1
    W2 = jax.random.normal(ks[2], (C4, C), jnp.float32) * 0.1
    W3 = jax.random.normal(ks[3], (C, C4), jnp.float32) * 0.1

    # BatchNorm (inference-mode) parameters.
    g1 = jax.random.uniform(ks[4], (C4,), jnp.float32, 0.8, 1.2)
    b1 = jax.random.normal(ks[5], (C4,), jnp.float32) * 0.1
    m1 = jax.random.normal(ks[6], (C4,), jnp.float32) * 0.1
    v1 = jax.random.uniform(ks[7], (C4,), jnp.float32, 0.5, 1.5)
    g2 = jax.random.uniform(ks[8], (C4,), jnp.float32, 0.8, 1.2)
    b2 = jax.random.normal(ks[9], (C4,), jnp.float32) * 0.1
    m2 = jax.random.normal(ks[10], (C4,), jnp.float32) * 0.1
    v2 = jax.random.uniform(ks[11], (C4,), jnp.float32, 0.5, 1.5)
    g3 = jax.random.uniform(ks[12], (C,), jnp.float32, 0.8, 1.2)
    b3 = jax.random.normal(ks[13], (C,), jnp.float32) * 0.1
    m3 = jax.random.normal(ks[14], (C,), jnp.float32) * 0.1
    v3 = jax.random.uniform(ks[15], (C,), jnp.float32, 0.5, 1.5)

    a1, a2, a3 = 0.25, 0.2, 0.3        # PReLU (single shared parameter each)

    # ---- fold BN into the conv weights / shifts, fuse conv1|conv2 ----
    def fold(g, b, m, v):
        s = g / jnp.sqrt(v + eps)
        return s, b - m * s

    s1, t1 = fold(g1, b1, m1, v1)
    s2, t2 = fold(g2, b2, m2, v2)
    s3, t3 = fold(g3, b3, m3, v3)

    w12 = jnp.concatenate([W1.T * s1[None, :], W2.T * s2[None, :]], axis=1)  # (C, 2*C4)
    sh12 = jnp.concatenate([t1, t2]).reshape(1, 2 * C4)
    a12 = jnp.concatenate([jnp.full((C4,), a1, jnp.float32),
                           jnp.full((C4,), a2, jnp.float32)]).reshape(1, 2 * C4)
    w3_k = W3.T * s3[None, :]                                                # (C4, C)
    sh3_k = t3.reshape(1, C)
    a3_k = jnp.full((1, C), a3, jnp.float32)

    # Causal mask (precomputed once; matches AttentionMask(causal=True)).
    row = jnp.arange(T)[:, None]
    col = jnp.arange(T)[None, :]
    mask = jnp.where(row >= col, 0.0, -1000000000.0).astype(jnp.float32)

    # Run the fused Pallas kernel.
    out_nchw = asa_forward_nchw(x_nchw, w12, sh12, a12, w3_k, sh3_k, a3_k, mask)
    out_nchw = jax.block_until_ready(out_nchw)

    # Check against the pure-JAX NCHW reference of the PyTorch forward.
    # (Tolerance slightly loosened for the approximate EUP reciprocal in softmax.)
    ref = asa_reference_nchw(x_nchw, W1, W2, W3,
                             g1, b1, m1, v1, g2, b2, m2, v2, g3, b3, m3, v3,
                             a1, a2, a3, eps=eps)
    np.testing.assert_allclose(np.asarray(out_nchw), np.asarray(ref),
                               rtol=3e-3, atol=3e-3)
    print("KERNEL_OK")
</pallas_src>

<mosaic_0001>
module attributes {stable_mosaic.version = 11 : i64} {
  func.func @asa_kernel(%arg0: i32, %arg1: memref<1x8x2048xf32, #tpu.memory_space<vmem>>, %arg2: memref<8x8xf32, #tpu.memory_space<vmem>>, %arg3: memref<128x64xf32, #tpu.memory_space<vmem>>, %arg4: memref<1x64xf32, #tpu.memory_space<vmem>>, %arg5: memref<1x64xf32, #tpu.memory_space<vmem>>, %arg6: memref<32x128xf32, #tpu.memory_space<vmem>>, %arg7: memref<1x128xf32, #tpu.memory_space<vmem>>, %arg8: memref<1x128xf32, #tpu.memory_space<vmem>>, %arg9: memref<1x8x2048xf32, #tpu.memory_space<vmem>>) attributes {dimension_semantics = [#tpu.dimension_semantics<parallel>], iteration_bounds = array<i64: 2>, scalar_prefetch = 0 : i64, scratch_operands = 0 : i64, tpu.core_type = #tpu.core_type<tc>, window_params = [{transform_indices = @transform_0, window_bounds = array<i64: 1, 8, 2048>}, {pipeline_mode = #tpu.pipeline_mode<synchronous>, transform_indices = @transform_1, window_bounds = array<i64: 8, 8>}, {pipeline_mode = #tpu.pipeline_mode<synchronous>, transform_indices = @transform_2, window_bounds = array<i64: 128, 64>}, {pipeline_mode = #tpu.pipeline_mode<synchronous>, transform_indices = @transform_3, window_bounds = array<i64: 1, 64>}, {pipeline_mode = #tpu.pipeline_mode<synchronous>, transform_indices = @transform_4, window_bounds = array<i64: 1, 64>}, {pipeline_mode = #tpu.pipeline_mode<synchronous>, transform_indices = @transform_5, window_bounds = array<i64: 32, 128>}, {pipeline_mode = #tpu.pipeline_mode<synchronous>, transform_indices = @transform_6, window_bounds = array<i64: 1, 128>}, {pipeline_mode = #tpu.pipeline_mode<synchronous>, transform_indices = @transform_7, window_bounds = array<i64: 1, 128>}, {transform_indices = @transform_8, window_bounds = array<i64: 1, 8, 2048>}]} {
    %c0 = arith.constant 0 : index
    %c0_0 = arith.constant 0 : index
    %c0_1 = arith.constant 0 : index
    %0 = vector.load %arg1[%c0, %c0_0, %c0_1] : memref<1x8x2048xf32, #tpu.memory_space<vmem>>, vector<1x8x2048xf32>
    %1 = vector.shape_cast %0 : vector<1x8x2048xf32> to vector<8x2048xf32>
    %2 = vector.shape_cast %1 : vector<8x2048xf32> to vector<128x128xf32>
    %c0_2 = arith.constant 0 : index
    %c0_3 = arith.constant 0 : index
    %3 = vector.load %arg3[%c0_2, %c0_3] : memref<128x64xf32, #tpu.memory_space<vmem>>, vector<128x64xf32>
    %cst = arith.constant dense<0.000000e+00> : vector<128x64xf32>
    %4 = tpu.matmul %2, %3, %cst {dimension_numbers = #tpu.dot_dimension_numbers<[1], [0], [0], [1], [0, 0, 1, 1], [], []>} : vector<128x128xf32>, vector<128x64xf32>, vector<128x64xf32> -> vector<128x64xf32>
    %c0_4 = arith.constant 0 : index
    %c0_5 = arith.constant 0 : index
    %5 = vector.load %arg4[%c0_4, %c0_5] : memref<1x64xf32, #tpu.memory_space<vmem>>, vector<1x64xf32>
    %6 = vector.broadcast %5 : vector<1x64xf32> to vector<128x64xf32>
    %7 = arith.addf %4, %6 : vector<128x64xf32>
    %cst_6 = arith.constant 0.000000e+00 : f32
    %8 = vector.broadcast %cst_6 : f32 to vector<128x64xf32>
    %9 = arith.cmpf oge, %7, %8 : vector<128x64xf32>
    %c0_7 = arith.constant 0 : index
    %c0_8 = arith.constant 0 : index
    %10 = vector.load %arg5[%c0_7, %c0_8] : memref<1x64xf32, #tpu.memory_space<vmem>>, vector<1x64xf32>
    %11 = vector.broadcast %10 : vector<1x64xf32> to vector<128x64xf32>
    %12 = arith.mulf %11, %7 : vector<128x64xf32>
    %13 = arith.select %9, %7, %12 : vector<128x64xi1>, vector<128x64xf32>
    %14 = vector.shape_cast %13 : vector<128x64xf32> to vector<8x16x64xf32>
    %15 = vector.extract_strided_slice %14 {offsets = [0, 0, 0], sizes = [8, 16, 32], strides = [1, 1, 1]} : vector<8x16x64xf32> to vector<8x16x32xf32>
    %16 = vector.extract_strided_slice %14 {offsets = [0, 0, 32], sizes = [8, 16, 32], strides = [1, 1, 1]} : vector<8x16x64xf32> to vector<8x16x32xf32>
    "tpu.trace_start"() <{level = 10 : i32, message = "tfc,tgc->tfg"}> : () -> ()
    %cst_9 = arith.constant dense<0.000000e+00> : vector<8x16x16xf32>
    %17 = tpu.matmul %15, %15, %cst_9 {dimension_numbers = #tpu.dot_dimension_numbers<[2], [2], [1], [1], [0, 0, 0, 1, 1, 1], [0], [0]>} : vector<8x16x32xf32>, vector<8x16x32xf32>, vector<8x16x16xf32> -> vector<8x16x16xf32>
    "tpu.trace_stop"() : () -> ()
    %cst_10 = arith.constant 3.125000e-02 : f32
    %18 = vector.broadcast %cst_10 : f32 to vector<8x16x16xf32>
    %19 = arith.mulf %17, %18 : vector<8x16x16xf32>
    %cst_11 = arith.constant dense<0xFF800000> : vector<8x16xf32>
    %20 = vector.multi_reduction <maximumf>, %19, %cst_11 [2] : vector<8x16x16xf32> to vector<8x16xf32>
    %21 = vector.shape_cast %20 : vector<8x16xf32> to vector<8x16x1xf32>
    %22 = vector.broadcast %21 : vector<8x16x1xf32> to vector<8x16x16xf32>
    %23 = arith.subf %19, %22 : vector<8x16x16xf32>
    %24 = math.exp %23 : vector<8x16x16xf32>
    %cst_12 = arith.constant dense<0.000000e+00> : vector<8x16xf32>
    %25 = vector.multi_reduction <add>, %24, %cst_12 [2] : vector<8x16x16xf32> to vector<8x16xf32>
    %26 = vector.shape_cast %25 : vector<8x16xf32> to vector<8x16x1xf32>
    %27 = tpu.reciprocal %26 {approx = true} : vector<8x16x1xf32> -> vector<8x16x1xf32>
    %28 = vector.broadcast %27 : vector<8x16x1xf32> to vector<8x16x16xf32>
    %29 = arith.mulf %24, %28 : vector<8x16x16xf32>
    "tpu.trace_start"() <{level = 10 : i32, message = "tfg,tgc->tfc"}> : () -> ()
    %cst_13 = arith.constant dense<0.000000e+00> : vector<8x16x32xf32>
    %30 = tpu.matmul %29, %15, %cst_13 {dimension_numbers = #tpu.dot_dimension_numbers<[2], [1], [1], [2], [0, 0, 0, 1, 1, 2], [0], [0]>} : vector<8x16x16xf32>, vector<8x16x32xf32>, vector<8x16x32xf32> -> vector<8x16x32xf32>
    "tpu.trace_stop"() : () -> ()
    "tpu.trace_start"() <{level = 10 : i32, message = "tfc,sfc->fts"}> : () -> ()
    %cst_14 = arith.constant dense<0.000000e+00> : vector<16x8x8xf32>
    %31 = tpu.matmul %16, %16, %cst_14 {dimension_numbers = #tpu.dot_dimension_numbers<[2], [2], [0], [0], [0, 1, 0, 0, 1, 0], [1], [1]>} : vector<8x16x32xf32>, vector<8x16x32xf32>, vector<16x8x8xf32> -> vector<16x8x8xf32>
    "tpu.trace_stop"() : () -> ()
    %cst_15 = arith.constant 0.0441941731 : f32
    %32 = vector.broadcast %cst_15 : f32 to vector<16x8x8xf32>
    %33 = arith.mulf %31, %32 : vector<16x8x8xf32>
    %c0_16 = arith.constant 0 : index
    %c0_17 = arith.constant 0 : index
    %34 = vector.load %arg2[%c0_16, %c0_17] : memref<8x8xf32, #tpu.memory_space<vmem>>, vector<8x8xf32>
    %35 = vector.shape_cast %34 : vector<8x8xf32> to vector<1x8x8xf32>
    %36 = vector.broadcast %35 : vector<1x8x8xf32> to vector<16x8x8xf32>
    %37 = arith.addf %33, %36 : vector<16x8x8xf32>
    %cst_18 = arith.constant dense<0xFF800000> : vector<16x8xf32>
    %38 = vector.multi_reduction <maximumf>, %37, %cst_18 [2] : vector<16x8x8xf32> to vector<16x8xf32>
    %39 = vector.shape_cast %38 : vector<16x8xf32> to vector<16x8x1xf32>
    %40 = vector.broadcast %39 : vector<16x8x1xf32> to vector<16x8x8xf32>
    %41 = arith.subf %37, %40 : vector<16x8x8xf32>
    %42 = math.exp %41 : vector<16x8x8xf32>
    %cst_19 = arith.constant dense<0.000000e+00> : vector<16x8xf32>
    %43 = vector.multi_reduction <add>, %42, %cst_19 [2] : vector<16x8x8xf32> to vector<16x8xf32>
    %44 = vector.shape_cast %43 : vector<16x8xf32> to vector<16x8x1xf32>
    %45 = tpu.reciprocal %44 {approx = true} : vector<16x8x1xf32> -> vector<16x8x1xf32>
    %46 = vector.broadcast %45 : vector<16x8x1xf32> to vector<16x8x8xf32>
    %47 = arith.mulf %42, %46 : vector<16x8x8xf32>
    "tpu.trace_start"() <{level = 10 : i32, message = "fts,sfc->tfc"}> : () -> ()
    %cst_20 = arith.constant dense<0.000000e+00> : vector<16x32x8xf32>
    %48 = tpu.matmul %30, %47, %cst_20 {dimension_numbers = #tpu.dot_dimension_numbers<[0], [2], [2], [1], [0, 1, 0, 2, 1, 1], [1], [0]>} : vector<8x16x32xf32>, vector<16x8x8xf32>, vector<16x32x8xf32> -> vector<16x32x8xf32>
    %49 = tpu.transpose %48, [2, 0, 1] : vector<16x32x8xf32> -> vector<8x16x32xf32>
    "tpu.trace_stop"() : () -> ()
    %50 = vector.shape_cast %49 : vector<8x16x32xf32> to vector<128x32xf32>
    %c0_21 = arith.constant 0 : index
    %c0_22 = arith.constant 0 : index
    %51 = vector.load %arg6[%c0_21, %c0_22] : memref<32x128xf32, #tpu.memory_space<vmem>>, vector<32x128xf32>
    %cst_23 = arith.constant dense<0.000000e+00> : vector<128x128xf32>
    %52 = tpu.matmul %50, %51, %cst_23 {dimension_numbers = #tpu.dot_dimension_numbers<[1], [0], [0], [1], [0, 0, 1, 1], [], []>} : vector<128x32xf32>, vector<32x128xf32>, vector<128x128xf32> -> vector<128x128xf32>
    %c0_24 = arith.constant 0 : index
    %c0_25 = arith.constant 0 : index
    %53 = vector.load %arg7[%c0_24, %c0_25] : memref<1x128xf32, #tpu.memory_space<vmem>>, vector<1x128xf32>
    %54 = vector.broadcast %53 : vector<1x128xf32> to vector<128x128xf32>
    %55 = arith.addf %52, %54 : vector<128x128xf32>
    %cst_26 = arith.constant 0.000000e+00 : f32
    %56 = vector.broadcast %cst_26 : f32 to vector<128x128xf32>
    %57 = arith.cmpf oge, %55, %56 : vector<128x128xf32>
    %c0_27 = arith.constant 0 : index
    %c0_28 = arith.constant 0 : index
    %58 = vector.load %arg8[%c0_27, %c0_28] : memref<1x128xf32, #tpu.memory_space<vmem>>, vector<1x128xf32>
    %59 = vector.broadcast %58 : vector<1x128xf32> to vector<128x128xf32>
    %60 = arith.mulf %59, %55 : vector<128x128xf32>
    %61 = arith.select %57, %55, %60 : vector<128x128xi1>, vector<128x128xf32>
    %62 = arith.addf %61, %2 : vector<128x128xf32>
    %63 = vector.shape_cast %62 : vector<128x128xf32> to vector<8x2048xf32>
    %c0_29 = arith.constant 0 : index
    %c0_30 = arith.constant 0 : index
    %c0_31 = arith.constant 0 : index
    %64 = vector.load %arg9[%c0_29, %c0_30, %c0_31] : memref<1x8x2048xf32, #tpu.memory_space<vmem>>, vector<1x8x2048xf32>
    %65 = vector.shape_cast %64 : vector<1x8x2048xf32> to vector<8x2048xf32>
    %66 = vector.shape_cast %63 : vector<8x2048xf32> to vector<1x8x2048xf32>
    tpu.vector_store %arg9[%c0_29, %c0_30, %c0_31], %66 {strides = array<i32>} : memref<1x8x2048xf32, #tpu.memory_space<vmem>>, vector<1x8x2048xf32>,
    return
  }
  func.func @transform_0(%arg0: i32) -> (i32, i32, i32) {
    %c0_i32 = arith.constant 0 : i32
    %c0_i32_0 = arith.constant 0 : i32
    %c0_i32_1 = arith.constant 0 : i32
    return %arg0, %c0_i32, %c0_i32_0 : i32, i32, i32
  }
  func.func @transform_1(%arg0: i32) -> (i32, i32) {
    %c0_i32 = arith.constant 0 : i32
    %c0_i32_0 = arith.constant 0 : i32
    %c0_i32_1 = arith.constant 0 : i32
    return %c0_i32, %c0_i32_0 : i32, i32
  }
  func.func @transform_2(%arg0: i32) -> (i32, i32) {
    %c0_i32 = arith.constant 0 : i32
    %c0_i32_0 = arith.constant 0 : i32
    %c0_i32_1 = arith.constant 0 : i32
    return %c0_i32, %c0_i32_0 : i32, i32
  }
  func.func @transform_3(%arg0: i32) -> (i32, i32) {
    %c0_i32 = arith.constant 0 : i32
    %c0_i32_0 = arith.constant 0 : i32
    %c0_i32_1 = arith.constant 0 : i32
    return %c0_i32, %c0_i32_0 : i32, i32
  }
  func.func @transform_4(%arg0: i32) -> (i32, i32) {
    %c0_i32 = arith.constant 0 : i32
    %c0_i32_0 = arith.constant 0 : i32
    %c0_i32_1 = arith.constant 0 : i32
    return %c0_i32, %c0_i32_0 : i32, i32
  }
  func.func @transform_5(%arg0: i32) -> (i32, i32) {
    %c0_i32 = arith.constant 0 : i32
    %c0_i32_0 = arith.constant 0 : i32
    %c0_i32_1 = arith.constant 0 : i32
    return %c0_i32, %c0_i32_0 : i32, i32
  }
  func.func @transform_6(%arg0: i32) -> (i32, i32) {
    %c0_i32 = arith.constant 0 : i32
    %c0_i32_0 = arith.constant 0 : i32
    %c0_i32_1 = arith.constant 0 : i32
    return %c0_i32, %c0_i32_0 : i32, i32
  }
  func.func @transform_7(%arg0: i32) -> (i32, i32) {
    %c0_i32 = arith.constant 0 : i32
    %c0_i32_0 = arith.constant 0 : i32
    %c0_i32_1 = arith.constant 0 : i32
    return %c0_i32, %c0_i32_0 : i32, i32
  }
  func.func @transform_8(%arg0: i32) -> (i32, i32, i32) {
    %c0_i32 = arith.constant 0 : i32
    %c0_i32_0 = arith.constant 0 : i32
    %c0_i32_1 = arith.constant 0 : i32
    return %arg0, %c0_i32, %c0_i32_0 : i32, i32, i32
  }
}

</mosaic_0001>

<bundles_post_ra>
// kernel: asa_forward_nchw.1
= control target key start
LH: loop header
LB: loop body
LE: loop exit
PB: predicated region body
PF: predicated region fallthrough
CT: control target
= control target key end

     0   :  { %s14299_s27 = smov 0   ;;  %s17290_s0 = inlined_call_operand.vmem [shape: f32[2,8,2048], index: 0, kind: input, shape index: {}, may-alias: {0,8}]   ;;  %s17291_s1 = inlined_call_operand.vmem [shape: f32[8,8], index: 1, kind: input, shape index: {}]   ;;  %s17292_s2 = inlined_call_operand.vmem [shape: f32[128,64], index: 2, kind: input, shape index: {}]   ;;  %s17293_s3 = inlined_call_operand.vmem [shape: f32[1,64], index: 3, kind: input, shape index: {}]   ;;  %s17294_s4 = inlined_call_operand.vmem [shape: f32[1,64], index: 4, kind: input, shape index: {}]   ;;  %s17295_s5 = inlined_call_operand.vmem [shape: f32[32,128], index: 5, kind: input, shape index: {}]   ;;  %s17296_s6 = inlined_call_operand.vmem [shape: f32[1,128], index: 6, kind: input, shape index: {}]   ;;  %s17297_s7 = inlined_call_operand.vmem [shape: f32[1,128], index: 7, kind: input, shape index: {}]   ;;  %s17298_s8 = inlined_call_operand.vmem [shape: f32[2,8,2048], index: 8, kind: output, shape index: {}, may-alias: {0,8}]  }
   0x1 LB: > { %s12895_s28 = sadd.s32 4294967295, %s14245_s27   ;;  %p12899_p0 = scmp.ge.s32.totalorder %s14245_s27, 1  ;;  %s14245_s27 = sphi %s14299_s27, %s18_s27  }
   0x2   : > { %p262_p1 = scmp.lt.s32.totalorder %s14245_s27, 3 }
   0x4   : > { %p263_p2 = pnand %p12899_p0, %p262_p1 }
   0x6   : > { %266 = sbr.rel (%p263_p2) target bundleno = 2517 (0x9d5), region = 52 }
   0xd   : > { %v626_v0 = vld [vmem:[%s17292_s2] sm:$0xff]  ;;  %v627_v1 = vld [vmem:[%s17292_s2 + $0x8] sm:$0xff]  ;;  %v628_v2 = vld [vmem:[%s17292_s2 + $0x10] sm:$0xff]  ;;  %p296_p3 = scmp.lt.s32.totalorder %s12895_s28, 1  ;;  %v349_v3 = vlaneseq  ;;  %v14247_v6 = vmov 1966171168  }
   0xe   : > { %v13852_v4 = vpack.c.bf16 %v627_v1, %v626_v0  ;;  %v629_v5 = vld [vmem:[%s17292_s2 + $0x18] sm:$0xff]  ;;  %v347_v7 = vunpack.c.l.s4 %v14247_v6  ;;  %v630_v9 = vld [vmem:[%s17292_s2 + $0x20] sm:$0xff]  ;;  %v631_v10 = vld [vmem:[%s17292_s2 + $0x28] sm:$0xff]  ;;  %vm849_vm1 = vcmask 261120   ;;  %s14248_s30 = smov 96  }
   0xf   : > { %v13856_v8 = vpack.c.bf16 %v629_v5, %v628_v2  ;;  %s17712_s28 = smov (!%p296_p3, %s12895_s28), 1  ;;  %v14327_v11 = vshrl.u32 %v349_v3, 7  ;;  %v13860_v13 = vpack.c.bf16 %v631_v10, %v630_v9  ;;  %v632_v14 = vld [vmem:[%s17292_s2 + $0x30] sm:$0xff]  ;;  %v633_v15 = vld [vmem:[%s17292_s2 + $0x38] sm:$0xff]  ;;  %v634_v17 = vld [vmem:[%s17292_s2 + $0x40] sm:$0xff] }
  0x10   : > { %13853 = vmatprep.subr.bf16.mxu0 %v13852_v4  ;;  %v348_v12 = vunpack.c.0.s8 %v347_v7  ;;  %s13070_s19 = sshll.u32 %s17712_s28, 7  ;;  %v635_v18 = vld [vmem:[%s17292_s2 + $0x48] sm:$0xff]  ;;  %v13864_v20 = vpack.c.bf16 %v633_v15, %v632_v14  ;;  %v636_v31 = vld [vmem:[%s17292_s2 + $0x50] sm:$0xff]  ;;  %v637_v32 = vld [vmem:[%s17292_s2 + $0x58] sm:$0xff] }
  0x11   : > { %13855 = vmatpush3.bf16.msra.mxu0 %v13852_v4  ;;  %s14341_s26 = scalar_lea.vmem %s17290_s0, %s13070_s19  ;;  %v13868_v28 = vpack.c.bf16 %v635_v18, %v634_v17  ;;  %v13872_v39 = vpack.c.bf16 %v637_v32, %v636_v31  ;;  %v638_v41 = vld [vmem:[%s17292_s2 + $0x60] sm:$0xff]  ;;  %v639_v42 = vld [vmem:[%s17292_s2 + $0x68] sm:$0xff]  ;;  %v640_v48 = vld [vmem:[%s17292_s2 + $0x70] sm:$0xff] }
  0x12   : > { %13857 = vmatprep.subr.bf16.mxu0 %v13856_v8  ;;  %v14344_v16 = vsub.s32 %v348_v12, %v14327_v11  ;;  %v14087_v19 = vld [vmem:[%s14341_s26] ss:$8 sps:$4 sm:$0xff]   ;;  %v14089_v21 = vld [vmem:[%s14341_s26 + $0x10] ss:$8 sps:$4 sm:$0xff]   ;;  %v13876_v47 = vpack.c.bf16 %v639_v42, %v638_v41  ;;  %v14103_v59 = vld [vmem:[%s14341_s26 + $0x4] ss:$8 sps:$4 sm:$0xff]  }
  0x13   : > { %v14091_v22 = vld [vmem:[%s14341_s26 + $0x20] ss:$8 sps:$4 sm:$0xff]   ;;  %v14093_v23 = vld [vmem:[%s14341_s26 + $0x30] ss:$8 sps:$4 sm:$0xff]   ;;  %v14104_v62 = vld [vmem:[%s14341_s26 + $0x14] ss:$8 sps:$4 sm:$0xff]  }
  0x14   : > { %17427 = vst [vmem:[#allocation2_spill] sm:$0xff] %v14344_v16  ;;  %v352_v24 = vrot.slane %v14087_v19, %v14344_v16  ;;  %v366_v25 = vrot.slane %v14089_v21, %v14344_v16  ;;  %v380_v26 = vrot.slane %v14091_v22, %v14344_v16  ;;  %v394_v27 = vrot.slane %v14093_v23, %v14344_v16  ;;  %v14095_v33 = vld [vmem:[%s14341_s26 + $0x40] ss:$8 sps:$4 sm:$0xff]   ;;  %v14097_v36 = vld [vmem:[%s14341_s26 + $0x50] ss:$8 sps:$4 sm:$0xff]   ;;  %vm14485_vm3 = vmpackc.low %vm849_vm1, %vm849_vm1 }
  0x15   : > { %13859 = vmatpush3.bf16.msra.mxu0 %v13856_v8  ;;  %v14099_v37 = vld [vmem:[%s14341_s26 + $0x60] ss:$8 sps:$4 sm:$0xff]   ;;  %v14101_v38 = vld [vmem:[%s14341_s26 + $0x70] ss:$8 sps:$4 sm:$0xff]   ;;  %v488_v43 = vrot.slane %v14095_v33, %v14344_v16  ;;  %v502_v44 = vrot.slane %v14097_v36, %v14344_v16  ;;  %v14105_v63 = vld [vmem:[%s14341_s26 + $0x24] ss:$8 sps:$4 sm:$0xff]   ;;  %v359_v5 = vrot.slane %v14103_v59, %v14344_v16  ;;  %v373_v10 = vrot.slane %v14104_v62, %v14344_v16 }
  0x16   : > { %13861 = vmatprep.subr.bf16.mxu0 %v13860_v13  ;;  %v402_v29 = vcombine.low %v352_v24, %v366_v25  ;;  %v406_v30 = vcombine.low %v380_v26, %v394_v27  ;;  %v516_v45 = vrot.slane %v14099_v37, %v14344_v16  ;;  %v530_v46 = vrot.slane %v14101_v38, %v14344_v16  ;;  %v641_v49 = vld [vmem:[%s17292_s2 + $0x78] sm:$0xff]  ;;  %v14107_v1 = vld [vmem:[%s14341_s26 + $0x44] ss:$8 sps:$4 sm:$0xff]  }
  0x17   : > { %v538_v50 = vcombine.low %v488_v43, %v502_v44  ;;  %v403_v52 = vcombine.high %v352_v24, %v366_v25  ;;  %v407_v53 = vcombine.high %v380_v26, %v394_v27  ;;  %v13880_v54 = vpack.c.bf16 %v641_v49, %v640_v48  ;;  %v14106_v0 = vld [vmem:[%s14341_s26 + $0x34] ss:$8 sps:$4 sm:$0xff]   ;;  %v14109_v7 = vld [vmem:[%s14341_s26 + $0x64] ss:$8 sps:$4 sm:$0xff]   ;;  %v14469_v49 = vld [vmem:[%s17293_s3] ss:$0 sm:$0xff] }
  0x18   : > { %v416_v34 = vrot.slane %v402_v29, %v14344_v16  ;;  %v444_v35 = vrot.slane %v406_v30, %v14344_v16  ;;  %v542_v51 = vcombine.low %v516_v45, %v530_v46  ;;  %v539_v57 = vcombine.high %v488_v43, %v502_v44  ;;  %v14108_v6 = vld [vmem:[%s14341_s26 + $0x54] ss:$8 sps:$4 sm:$0xff]  }
  0x19   : > { %13863 = vmatpush3.bf16.msra.mxu0 %v13860_v13  ;;  %v552_v55 = vrot.slane %v538_v50, %v14344_v16  ;;  %v543_v58 = vcombine.high %v516_v45, %v530_v46  ;;  %v430_v60 = vrot.slane %v403_v52, %v14344_v16  ;;  %v458_v61 = vrot.slane %v407_v53, %v14344_v16  ;;  %v14110_v8 = vld [vmem:[%s14341_s26 + $0x74] ss:$8 sps:$4 sm:$0xff]   ;;  %s17245_s26 = scalar_lea.vmem %s17298_s8, %s13070_s19 }
  0x1a   : > { %13865 = vmatprep.subr.bf16.mxu0 %v13864_v20  ;;  %v14372_v40 = vcombine.low %v416_v34, %v444_v35  ;;  %v580_v56 = vrot.slane %v542_v51, %v14344_v16  ;;  %v566_v3 = vrot.slane %v539_v57, %v14344_v16  ;;  %v387_v12 = vrot.slane %v14105_v63, %v14344_v16  ;;  %v14474_v51 = vld [vmem:[%s17294_s4] ss:$0 sm:$0xff] }
  0x1b   : > { %v594_v4 = vrot.slane %v543_v58, %v14344_v16  ;;  %v14408_v9 = vcombine.low %v430_v60, %v458_v61  ;;  %v401_v13 = vrot.slane %v14106_v0, %v14344_v16  ;;  %v495_v14 = vrot.slane %v14107_v1, %v14344_v16 }
  0x1c   : > { %17428 = vst [vmem:[#allocation3_spill] sm:$0xff] %v14372_v40  ;;  %13380 = vmatprep.mubr.f32.mxu0 %v14372_v40  ;;  %v14400_v2 = vcombine.low %v552_v55, %v580_v56  ;;  %v509_v17 = vrot.slane %v14108_v6, %v14344_v16  ;;  %v523_v18 = vrot.slane %v14109_v7, %v14344_v16 }
  0x1d   : > { %13867 = vmatpush3.bf16.msra.mxu0 %v13864_v20  ;;  %17430 = vst [vmem:[#allocation5_spill] sm:$0xff] %v14408_v9  ;;  %v14415_v15 = vcombine.low %v566_v3, %v594_v4  ;;  %v537_v19 = vrot.slane %v14110_v8, %v14344_v16  ;;  %v14421_v20 = vcombine.high %v416_v34, %v444_v35 }
  0x1e   : > { %13869 = vmatprep.subr.bf16.mxu0 %v13868_v28  ;;  %17429 = vst [vmem:[#allocation4_spill] sm:$0xff] %v14400_v2  ;;  %v404_v21 = vcombine.low %v359_v5, %v373_v10  ;;  %v408_v22 = vcombine.low %v387_v12, %v401_v13  ;;  %v14424_v23 = vcombine.high %v552_v55, %v580_v56 }
  0x1f   : > { %17431 = vst [vmem:[#allocation6_spill] sm:$0xff] %v14415_v15  ;;  %17432 = vst [vmem:[#allocation7_spill] sm:$0xff] %v14421_v20  ;;  %v14426_v24 = vcombine.high %v430_v60, %v458_v61  ;;  %v540_v25 = vcombine.low %v495_v14, %v509_v17  ;;  %v544_v26 = vcombine.low %v523_v18, %v537_v19 }
  0x20   : > { %17433 = vst [vmem:[#allocation8_spill] sm:$0xff] %v14424_v23  ;;  %v423_v27 = vrot.slane %v404_v21, %v14344_v16  ;;  %v405_v29 = vcombine.high %v359_v5, %v373_v10  ;;  %v409_v30 = vcombine.high %v387_v12, %v401_v13  ;;  %v14431_v31 = vcombine.high %v566_v3, %v594_v4 }
  0x21   : > { %13871 = vmatpush3.bf16.msra.mxu0 %v13868_v28  ;;  %17434 = vst [vmem:[#allocation9_spill] sm:$0xff] %v14426_v24  ;;  %v451_v28 = vrot.slane %v408_v22, %v14344_v16  ;;  %v559_v32 = vrot.slane %v540_v25, %v14344_v16  ;;  %v587_v33 = vrot.slane %v544_v26, %v14344_v16 }
  0x22   : > { %13873 = vmatprep.subr.bf16.mxu0 %v13872_v39  ;;  %17435 = vst [vmem:[#allocation10_spill] sm:$0xff] %v14431_v31  ;;  %v541_v34 = vcombine.high %v495_v14, %v509_v17  ;;  %v545_v35 = vcombine.high %v523_v18, %v537_v19  ;;  %v437_v37 = vrot.slane %v405_v29, %v14344_v16 }
  0x23   : > { %v14437_v36 = vcombine.low %v423_v27, %v451_v28  ;;  %v465_v38 = vrot.slane %v409_v30, %v14344_v16  ;;  %v14453_v45 = vcombine.high %v423_v27, %v451_v28  ;;  %v14456_v46 = vcombine.high %v559_v32, %v587_v33 }
  0x24   : > { %v573_v41 = vrot.slane %v541_v34, %v14344_v16  ;;  %v601_v42 = vrot.slane %v545_v35, %v14344_v16 }
  0x25   : > { %13875 = vmatpush3.bf16.msra.mxu0 %v13872_v39  ;;  %17436 = vst [vmem:[#allocation11_spill] sm:$0xff] %v14437_v36  ;;  %v14442_v39 = vcombine.low %v559_v32, %v587_v33  ;;  %v14447_v43 = vcombine.low %v437_v37, %v465_v38  ;;  %17440 = vst [vmem:[#allocation15_spill] sm:$0xff] %v14453_v45 }
  0x26   : > { %13877 = vmatprep.subr.bf16.mxu0 %v13876_v47  ;;  %v14450_v44 = vcombine.low %v573_v41, %v601_v42  ;;  %17441 = vst [vmem:[#allocation16_spill] sm:$0xff] %v14456_v46  ;;  %v14462_v48 = vcombine.high %v573_v41, %v601_v42 }
  0x27   : > { %17437 = vst [vmem:[#allocation12_spill] sm:$0xff] %v14442_v39  ;;  %17438 = vst [vmem:[#allocation13_spill] sm:$0xff] %v14447_v43 }
  0x28   : > { %17439 = vst [vmem:[#allocation14_spill] sm:$0xff] %v14450_v44  ;;  %17443 = vst [vmem:[#allocation18_spill] sm:$0xff] %v14462_v48 }
  0x29   : > { %13879 = vmatpush3.bf16.msra.mxu0 %v13876_v47  ;;  %v14459_v47 = vcombine.high %v437_v37, %v465_v38 }
  0x2a   : > { %13881 = vmatprep.subr.bf16.mxu0 %v13880_v54 }
  0x2b   : > { %17442 = vst [vmem:[#allocation17_spill] sm:$0xff] %v14459_v47 }
  0x2d   : > { %13883 = vmatpush3.bf16.msra.mxu0 %v13880_v54 }
  0x30   : > { %13381 = vmatmul.mubr.f32.vlgmr.msra.gmra.mrb[0].mxu0 %v14400_v2 }
  0x31   : > { %13383 = vmatprep.mubr.f32.mxu0 %v14408_v9 }
  0x34   : > { %13384 = vmatmul.mubr.f32.gmra.mrb[2].mxu0 %v14415_v15 }
  0x35   : > { %13386 = vmatprep.mubr.f32.mxu0 %v14421_v20 }
  0x38   : > { %13387 = vmatmul.mubr.f32.gmra.mrb[4].mxu0 %v14424_v23 }
  0x39   : > { %13389 = vmatprep.mubr.f32.mxu0 %v14426_v24 }
  0x3c   : > { %13390 = vmatmul.mubr.f32.gmra.mrb[6].mxu0 %v14431_v31 }
  0x3d   : > { %13392 = vmatprep.mubr.f32.mxu0 %v14437_v36 }
  0x40   : > { %13393 = vmatmul.mubr.f32.gmra.mrb[8].mxu0 %v14442_v39 }
  0x41   : > { %13395 = vmatprep.mubr.f32.mxu0 %v14447_v43 }
  0x44   : > { %13396 = vmatmul.mubr.f32.gmra.mrb[10].mxu0 %v14450_v44 }
  0x45   : > { %13398 = vmatprep.mubr.f32.mxu0 %v14453_v45 }
  0x48   : > { %13399 = vmatmul.mubr.f32.gmra.mrb[12].mxu0 %v14456_v46 }
  0x49   : > { %13401 = vmatprep.mubr.f32.mxu0 %v14459_v47 }
  0x4c   : > { %13402 = vmatmul.mubr.f32.gmra.mrb[14].mxu0 %v14462_v48 }
 0x103   : > { %v13382_v50 = vpop.f32.mrb[0].mxu0 }
 0x104   : > { %v721_v52 = vadd.f32 %v13382_v50, %v14469_v49  ;;  %v715_v53 = vpop.f32.mrb[1].mxu0 }
 0x105   : > { %v716_v54 = vadd.f32 %v14469_v49, %v715_v53 }
 0x106   : > { %v818_v55 = vmul.f32 %v14474_v51, %v721_v52  ;;  %vm795_vm0 = vcmp.ge.f32.partialorder %v721_v52, 0.0 }
 0x107   : > { %v817_v56 = vmul.f32 %v14474_v51, %v716_v54  ;;  %v13385_v57 = vpop.f32.mrb[2].mxu0  ;;  %vm794_vm2 = vcmp.ge.f32.partialorder %v716_v54, 0.0 }
 0x108   : > { %v731_v58 = vadd.f32 %v13385_v57, %v14469_v49  ;;  %v725_v59 = vpop.f32.mrb[3].mxu0  ;;  %v834_v60 = vsel %vm795_vm0, %v721_v52, %v818_v55 }
 0x109   : > { %v726_v61 = vadd.f32 %v14469_v49, %v725_v59  ;;  %2341 = vrot.lane.b32.xlu0 %v834_v60, %s14248_s30  ;;  %v833_v62 = vsel %vm794_vm2, %v716_v54, %v817_v56 }
 0x10a   : > { %v820_v0 = vmul.f32 %v14474_v51, %v731_v58  ;;  %v14490_v1 = vpack.c.bf16 %v834_v60, %v833_v62  ;;  %13408 = vmatprep.mubr.msk.f32.mxu1 %vm849_vm1, %v833_v62  ;;  %vm797_vm4 = vcmp.ge.f32.partialorder %v731_v58, 0.0 }
 0x10b   : > { %vm796_vm5 = vcmp.ge.f32.partialorder %v726_v61, 0.0  ;;  %v819_v3 = vmul.f32 %v14474_v51, %v726_v61  ;;  %v13388_v4 = vpop.f32.mrb[4].mxu0 }
 0x10c   : > { %v741_v5 = vadd.f32 %v13388_v4, %v14469_v49  ;;  %13886 = vmatprep.subr.msk.bf16.mxu1 %vm14485_vm3, %v14490_v1  ;;  %v836_v6 = vsel %vm797_vm4, %v731_v58, %v820_v0  ;;  %v735_v7 = vpop.f32.mrb[5].mxu0  ;;  %vm14252_vm4 = vmmov 0  }
 0x10d   : > { %v835_v8 = vsel %vm796_vm5, %v726_v61, %v819_v3  ;;  %2345 = vrot.lane.b32.xlu1 %v836_v6, %s14248_s30  ;;  %2339 = vrot.lane.b32.xlu0 %v833_v62, %s14248_s30  ;;  %v736_v10 = vadd.f32 %v14469_v49, %v735_v7  ;;  %vm6772_vm5 = vcmask 64512  }
 0x10e   : > { %v822_v12 = vmul.f32 %v14474_v51, %v741_v5  ;;  %v14502_v13 = vpack.c.bf16 %v836_v6, %v835_v8  ;;  %13889 = vmatpush3.bf16.xpose.msk.msra.mxu1 %vm14485_vm3, %v14490_v1  ;;  %vm799_vm6 = vcmp.ge.f32.partialorder %v741_v5, 0.0 }
 0x10f   : > { %v821_v14 = vmul.f32 %v14474_v51, %v736_v10  ;;  %v13391_v17 = vpop.f32.mrb[6].mxu0  ;;  %vm798_vm7 = vcmp.ge.f32.partialorder %v736_v10, 0.0 }
 0x110   : > { %17446 = vst [vmem:[#allocation19_spill] sm:$0xff] %v14502_v13  ;;  %13892 = vmatprep.subr.msk.bf16.mxu1 %vm14485_vm3, %v14502_v13  ;;  %v14511_v18 = vsel %vm799_vm6, %v741_v5, %v822_v12  ;;  %v751_v19 = vadd.f32 %v13391_v17, %v14469_v49  ;;  %v745_v21 = vpop.f32.mrb[7].mxu0 }
 0x111   : > { %2343 = vrot.lane.b32.xlu1 %v835_v8, %s14248_s30  ;;  %2349 = vrot.lane.b32.xlu0 %v14511_v18, %s14248_s30  ;;  %v746_v22 = vadd.f32 %v14469_v49, %v745_v21  ;;  %v837_v25 = vsel %vm798_vm7, %v736_v10, %v821_v14 }
 0x112   : > { %v824_v26 = vmul.f32 %v14474_v51, %v751_v19  ;;  %v14520_v27 = vpack.c.bf16 %v14511_v18, %v837_v25  ;;  %vm801_vm8 = vcmp.ge.f32.partialorder %v751_v19, 0.0 }
 0x113   : > { %v823_v28 = vmul.f32 %v14474_v51, %v746_v22  ;;  %v13394_v29 = vpop.f32.mrb[8].mxu0  ;;  %vm800_vm9 = vcmp.ge.f32.partialorder %v746_v22, 0.0 }
 0x114   : > { %v761_v30 = vadd.f32 %v13394_v29, %v14469_v49  ;;  %v755_v32 = vpop.f32.mrb[9].mxu0  ;;  %v14527_v34 = vsel %vm801_vm8, %v751_v19, %v824_v26 }
 0x115   : > { %13409 = vmatmul.mubr.msk.f32.vlgmr.msra.gmra.mrb[0].mxu1 %vm849_vm1, %v834_v60  ;;  %2347 = vrot.lane.b32.xlu1 %v837_v25, %s14248_s30  ;;  %v756_v33 = vadd.f32 %v14469_v49, %v755_v32  ;;  %v839_v35 = vsel %vm800_vm9, %v746_v22, %v823_v28  ;;  %v14249_v28 = vmov 1983009808  }
 0x116   : > { %v826_v37 = vmul.f32 %v14474_v51, %v761_v30  ;;  %13895 = vmatpush3.bf16.xpose.msk.msra.mxu1 %vm14485_vm3, %v14502_v13  ;;  %13415 = vmatprep.mubr.msk.f32.mxu1 %vm849_vm1, %v835_v8  ;;  %vm803_vm10 = vcmp.ge.f32.partialorder %v761_v30, 0.0  ;;  %v14535_v38 = vpack.c.bf16 %v14527_v34, %v839_v35  ;;  %v2390_v29 = vunpack.c.l.s4 %v14249_v28 }
 0x117   : > { %13898 = vmatprep.subr.msk.bf16.mxu1 %vm14485_vm3, %v14520_v27  ;;  %v825_v41 = vmul.f32 %v14474_v51, %v756_v33  ;;  %v13397_v42 = vpop.f32.mrb[10].mxu0  ;;  %vm802_vm11 = vcmp.ge.f32.partialorder %v756_v33, 0.0 }
 0x118   : > { %17447 = vst [vmem:[#allocation20_spill] sm:$0xff] %v14535_v38  ;;  %v771_v50 = vadd.f32 %v13397_v42, %v14469_v49  ;;  %v14542_v52 = vsel %vm803_vm10, %v761_v30, %v826_v37  ;;  %v765_v53 = vpop.f32.mrb[11].mxu0 }
 0x119   : > { %2353 = vrot.lane.b32.xlu1 %v14527_v34, %s14248_s30  ;;  %2357 = vrot.lane.b32.xlu0 %v14542_v52, %s14248_s30  ;;  %v766_v54 = vadd.f32 %v14469_v49, %v765_v53  ;;  %v841_v55 = vsel %vm802_vm11, %v756_v33, %v825_v41 }
 0x11a   : > { %v828_v56 = vmul.f32 %v14474_v51, %v771_v50  ;;  %v14551_v57 = vpack.c.bf16 %v14542_v52, %v841_v55  ;;  %vm805_vm12 = vcmp.ge.f32.partialorder %v771_v50, 0.0 }
 0x11b   : > { %v827_v58 = vmul.f32 %v14474_v51, %v766_v54  ;;  %v13400_v59 = vpop.f32.mrb[12].mxu0  ;;  %vm804_vm13 = vcmp.ge.f32.partialorder %v766_v54, 0.0 }
 0x11c   : > { %17448 = vst [vmem:[#allocation21_spill] sm:$0xff] %v14551_v57  ;;  %v781_v60 = vadd.f32 %v13400_v59, %v14469_v49  ;;  %v775_v61 = vpop.f32.mrb[13].mxu0  ;;  %v844_v0 = vsel %vm805_vm12, %v771_v50, %v828_v56 }
 0x11d   : > { %13416 = vmatmul.mubr.msk.f32.vlgmr.msra.gmra.mrb[2].mxu1 %vm849_vm1, %v836_v6  ;;  %2351 = vrot.lane.b32.xlu1 %v839_v35, %s14248_s30  ;;  %v776_v62 = vadd.f32 %v14469_v49, %v775_v61  ;;  %v843_v3 = vsel %vm804_vm13, %v766_v54, %v827_v58 }
 0x11e   : > { %v830_v4 = vmul.f32 %v14474_v51, %v781_v60  ;;  %13901 = vmatpush3.bf16.xpose.msk.msra.mxu1 %vm14485_vm3, %v14520_v27  ;;  %13422 = vmatprep.mubr.msk.f32.mxu1 %vm849_vm1, %v837_v25  ;;  %vm807_vm14 = vcmp.ge.f32.partialorder %v781_v60, 0.0  ;;  %v14563_v5 = vpack.c.bf16 %v844_v0, %v843_v3 }
 0x11f   : > { %v829_v7 = vmul.f32 %v14474_v51, %v776_v62  ;;  %13904 = vmatprep.subr.msk.bf16.mxu1 %vm14485_vm3, %v14535_v38  ;;  %v13403_v6 = vpop.f32.mrb[14].mxu0  ;;  %2355 = vrot.lane.b32.xlu0 %v841_v55, %s14248_s30  ;;  %vm806_vm15 = vcmp.ge.f32.partialorder %v776_v62, 0.0 }
 0x120   : > { %17449 = vst [vmem:[#allocation22_spill] sm:$0xff] %v14563_v5  ;;  %v791_v8 = vadd.f32 %v13403_v6, %v14469_v49  ;;  %v785_v10 = vpop.f32.mrb[15].mxu0  ;;  %v846_v12 = vsel %vm807_vm14, %v781_v60, %v830_v4 }
 0x121   : > { %v786_v14 = vadd.f32 %v14469_v49, %v785_v10  ;;  %2361 = vrot.lane.b32.xlu1 %v844_v0, %s14248_s30  ;;  %v845_v17 = vsel %vm806_vm15, %v776_v62, %v829_v7 }
 0x122   : > { %vm809_vm0 = vcmp.ge.f32.partialorder %v791_v8, 0.0  ;;  %v832_v19 = vmul.f32 %v14474_v51, %v791_v8  ;;  %v14574_v21 = vpack.c.bf16 %v846_v12, %v845_v17 }
 0x123   : > { %vm808_vm2 = vcmp.ge.f32.partialorder %v786_v14, 0.0  ;;  %v831_v22 = vmul.f32 %v14474_v51, %v786_v14  ;;  %2365 = vrot.lane.b32.xlu0 %v846_v12, %s14248_s30 }
 0x124   : > { %17450 = vst [vmem:[#allocation23_spill] sm:$0xff] %v14574_v21  ;;  %v848_v25 = vsel %vm809_vm0, %v791_v8, %v832_v19  ;;  %v14250_v8 = vmov 1934713408  }
 0x125   : > { %v847_v26 = vsel %vm808_vm2, %v786_v14, %v831_v22  ;;  %13423 = vmatmul.mubr.msk.f32.vlgmr.msra.gmra.mrb[4].mxu1 %vm849_vm1, %v14511_v18  ;;  %2359 = vrot.lane.b32.xlu1 %v843_v3, %s14248_s30  ;;  %v2454_v10 = vunpack.c.l.s4 %v14250_v8 }
 0x126   : > { %v14581_v49 = vpack.c.bf16 %v848_v25, %v847_v26  ;;  %13907 = vmatpush3.bf16.xpose.msk.msra.mxu1 %vm14485_vm3, %v14535_v38  ;;  %13429 = vmatprep.mubr.msk.f32.mxu1 %vm849_vm1, %v839_v35 }
 0x127   : > { %2363 = vrot.lane.b32.xlu0 %v845_v17, %s14248_s30  ;;  %13910 = vmatprep.subr.msk.bf16.mxu1 %vm14485_vm3, %v14551_v57 }
 0x128   : > { %17451 = vst [vmem:[#allocation24_spill] sm:$0xff] %v14581_v49  ;;  %13928 = vmatprep.subr.msk.bf16.mxu0 %vm14485_vm3, %v14581_v49  ;;  %13457 = vmatprep.mubr.msk.f32.mxu0 %vm849_vm1, %v847_v26 }
 0x129   : > { %13931 = vmatpush3.bf16.xpose.msk.msra.mxu0 %vm14485_vm3, %v14581_v49  ;;  %2369 = vrot.lane.b32.xlu1 %v848_v25, %s14248_s30 }
 0x12a   : > { %13941 = vmatprep.subr.bf16.mxu0 %v14520_v27 }
 0x12d   : > { %13430 = vmatmul.mubr.msk.f32.vlgmr.msra.gmra.mrb[6].mxu1 %vm849_vm1, %v14527_v34  ;;  %2367 = vrot.lane.b32.xlu1 %v847_v26, %s14248_s30  ;;  %v2391_v34 = vunpack.c.0.s8 %v2390_v29 }
 0x12e   : > { %13913 = vmatpush3.bf16.xpose.msk.msra.mxu1 %vm14485_vm3, %v14551_v57  ;;  %13436 = vmatprep.mubr.msk.f32.mxu1 %vm849_vm1, %v841_v55 }
 0x12f   : > { %13916 = vmatprep.subr.msk.bf16.mxu1 %vm14485_vm3, %v14563_v5  ;;  %v14632_v37 = vsub.s32 %v2391_v34, %v14327_v11 }
 0x130   : > { %13458 = vmatmul.mubr.msk.f32.vlgmr.msra.gmra.mrb[16].mxu0 %vm849_vm1, %v848_v25 }
 0x131   : > { %13943 = vmatpush3.bf16.msra.mxu0 %v14520_v27 }
 0x132   : > { %13949 = vmatprep.subr.bf16.mxu0 %v14551_v57 }
 0x135   : > { %13437 = vmatmul.mubr.msk.f32.vlgmr.msra.gmra.mrb[8].mxu1 %vm849_vm1, %v14542_v52 }
 0x136   : > { %13919 = vmatpush3.bf16.xpose.msk.msra.mxu1 %vm14485_vm3, %v14563_v5  ;;  %13443 = vmatprep.mubr.msk.f32.mxu1 %vm849_vm1, %v843_v3 }
 0x137   : > { %13922 = vmatprep.subr.msk.bf16.mxu1 %vm14485_vm3, %v14574_v21 }
 0x13d   : > { %13444 = vmatmul.mubr.msk.f32.vlgmr.msra.gmra.mrb[10].mxu1 %vm849_vm1, %v844_v0 }
 0x13e   : > { %13925 = vmatpush3.bf16.xpose.msk.msra.mxu1 %vm14485_vm3, %v14574_v21  ;;  %13450 = vmatprep.mubr.msk.f32.mxu1 %vm849_vm1, %v845_v17  ;;  %vm1514_vm3 = vcmask 130048  }
 0x13f   : > { %13933 = vmatprep.subr.bf16.mxu1 %v14490_v1 }
 0x145   : > { %13451 = vmatmul.mubr.msk.f32.vlgmr.msra.gmra.mrb[12].mxu1 %vm849_vm1, %v846_v12 }
 0x146   : > { %13935 = vmatpush3.bf16.msra.mxu1 %v14490_v1 }
 0x147   : > { %13937 = vmatprep.subr.bf16.mxu1 %v14502_v13 }
 0x17b   : > { %v2342_v51 = vpop.permute.xlu0 %2341 }
 0x17f   : > { %v2346_v18 = vpop.permute.xlu1 %2345  ;;  %v2340_v27 = vpop.permute.xlu0 %2339 }
 0x180   : > { %2659 = vxpose.xlu0.b32.start [1/2] (short) (narrow) %v2340_v27, 32 }
 0x183   : > { %v2344_v30 = vpop.permute.xlu1 %2343  ;;  %v2350_v32 = vpop.permute.xlu0 %2349 }
 0x184   : > { %v2523_v63 = vcombine.low %v2342_v51, %v2350_v32  ;;  %v2524_v33 = vcombine.high %v2342_v51, %v2350_v32  ;;  %2691 = vxpose.xlu1.b32.start [1/2] (short) (narrow) %v2344_v30, 32  ;;  %2660 = vxpose.xlu0.b32.end [2/2] (short) (narrow) %v2342_v51, 32 }
 0x186   : > { %v14637_v52 = vrot.slane %v2523_v63, %v14632_v37  ;;  %v14640_v53 = vrot.slane %v2524_v33, %v14632_v37 }
 0x187   : > { %v2348_v35 = vpop.permute.xlu1 %2347 }
 0x188   : > { %2692 = vxpose.xlu1.b32.end [2/2] (short) (narrow) %v2346_v18, 32  ;;  %17453 = vst [vmem:[#allocation26_spill] sm:$0xff] %v14637_v52  ;;  %17454 = vst [vmem:[#allocation27_spill] sm:$0xff] %v14640_v53  ;;  %v2387_v12 = vcombine.low %v2340_v27, %v2348_v35  ;;  %v2388_v19 = vcombine.high %v2340_v27, %v2348_v35 }
 0x18a   : > { %v2395_v28 = vrot.slane %v2387_v12, %v14632_v37  ;;  %v2402_v33 = vrot.slane %v2388_v19, %v14632_v37 }
 0x18b   : > { %v2354_v1 = vpop.permute.xlu1 %2353  ;;  %v14634_v41 = vpop.permute.xlu0 %2357 }
 0x18c   : > { %17452 = vst [vmem:[#allocation25_spill] sm:$0xff] %v14634_v41  ;;  %v2539_v42 = vcombine.low %v2346_v18, %v2354_v1  ;;  %v2540_v50 = vcombine.high %v2346_v18, %v2354_v1  ;;  %v2455_v18 = vunpack.c.0.s8 %v2454_v10 }
 0x18d   : > { %2723 = vxpose.xlu0.b32.start [1/2] (short) (narrow) %v2348_v35, 32 }
 0x18e   : > { %v14643_v54 = vrot.slane %v2539_v42, %v14632_v37  ;;  %v14646_v55 = vrot.slane %v2540_v50, %v14632_v37  ;;  %v14673_v50 = vsub.s32 %v2455_v18, %v14327_v11 }
 0x18f   : > { %v2352_v56 = vpop.permute.xlu1 %2351 }
 0x190   : > { %17455 = vst [vmem:[#allocation28_spill] sm:$0xff] %v14643_v54  ;;  %17456 = vst [vmem:[#allocation29_spill] sm:$0xff] %v14646_v55  ;;  %v2403_v7 = vcombine.low %v2344_v30, %v2352_v56  ;;  %v2404_v14 = vcombine.high %v2344_v30, %v2352_v56 }
 0x191   : > { %2755 = vxpose.xlu1.b32.start [1/2] (short) (narrow) %v2352_v56, 32  ;;  %2724 = vxpose.xlu0.b32.end [2/2] (short) (narrow) %v2350_v32, 32  ;;  %v2356_v62 = vpop.permute.xlu0 %2355 }
 0x192   : > { %v2411_v22 = vrot.slane %v2403_v7, %v14632_v37  ;;  %v2418_v29 = vrot.slane %v2404_v14, %v14632_v37 }
 0x193   : > { %v14656_v0 = vpop.permute.xlu1 %2361 }
 0x194   : > { %17457 = vst [vmem:[#allocation30_spill] sm:$0xff] %v14656_v0  ;;  %v2451_v30 = vcombine.low %v2395_v28, %v2411_v22  ;;  %v2452_v34 = vcombine.high %v2395_v28, %v2411_v22  ;;  %v2467_v56 = vcombine.low %v2402_v33, %v2418_v29 }
 0x195   : > { %2756 = vxpose.xlu1.b32.end [2/2] (short) (narrow) %v2354_v1, 32  ;;  %v14658_v3 = vpop.permute.xlu0 %2365 }
 0x196   : > { %17458 = vst [vmem:[#allocation31_spill] sm:$0xff] %v14658_v3  ;;  %v14676_v12 = vrot.slane %v2451_v30, %v14673_v50  ;;  %v14679_v14 = vrot.slane %v2452_v34, %v14673_v50 }
 0x197   : > { %v2360_v4 = vpop.permute.xlu1 %2359 }
 0x198   : > { %17460 = vst [vmem:[#allocation33_spill] sm:$0xff] %v14676_v12  ;;  %17461 = vst [vmem:[#allocation34_spill] sm:$0xff] %v14679_v14 }
 0x199   : > { %v2364_v17 = vpop.permute.xlu0 %2363 }
 0x19a   : > { %2787 = vxpose.xlu0.b32.start [1/2] (short) (narrow) %v2356_v62, 32  ;;  %v2419_v25 = vcombine.low %v2356_v62, %v2364_v17  ;;  %v2420_v26 = vcombine.high %v2356_v62, %v2364_v17  ;;  %v2468_v62 = vcombine.high %v2402_v33, %v2418_v29 }
 0x19b   : > { %v14660_v6 = vpop.permute.xlu1 %2369 }
 0x19c   : > { %17459 = vst [vmem:[#allocation32_spill] sm:$0xff] %v14660_v6  ;;  %v2427_v27 = vrot.slane %v2419_v25, %v14632_v37  ;;  %v2434_v35 = vrot.slane %v2420_v26, %v14632_v37  ;;  %v14694_v26 = vrot.slane %v2467_v56, %v14673_v50  ;;  %v14697_v18 = vrot.slane %v2468_v62, %v14673_v50 }
 0x19e   : > { %2819 = vxpose.xlu1.b32.start [1/2] (short) (narrow) %v2360_v4, 32  ;;  %2788 = vxpose.xlu0.b32.end [2/2] (short) (narrow) %v14634_v41, 32  ;;  %17466 = vst [vmem:[#allocation39_spill] sm:$0xff] %v14694_v26  ;;  %17467 = vst [vmem:[#allocation40_spill] sm:$0xff] %v14697_v18 }
 0x19f   : > { %v2368_v51 = vpop.permute.xlu1 %2367 }
 0x1a0   : > { %v2435_v32 = vcombine.low %v2360_v4, %v2368_v51  ;;  %v2436_v63 = vcombine.high %v2360_v4, %v2368_v51 }
 0x1a2   : > { %2820 = vxpose.xlu1.b32.end [2/2] (short) (narrow) %v14656_v0, 32  ;;  %v2443_v1 = vrot.slane %v2435_v32, %v14632_v37  ;;  %v2450_v42 = vrot.slane %v2436_v63, %v14632_v37 }
 0x1a4   : > { %v2483_v4 = vcombine.low %v2427_v27, %v2443_v1  ;;  %v2484_v7 = vcombine.high %v2427_v27, %v2443_v1  ;;  %v2499_v8 = vcombine.low %v2434_v35, %v2450_v42  ;;  %v2500_v10 = vcombine.high %v2434_v35, %v2450_v42 }
 0x1a6   : > { %v14682_v19 = vrot.slane %v2483_v4, %v14673_v50  ;;  %v14685_v22 = vrot.slane %v2484_v7, %v14673_v50  ;;  %v14688_v11 = vrot.slane %v2499_v8, %v14673_v50  ;;  %v14691_v25 = vrot.slane %v2500_v10, %v14673_v50 }
 0x1a7   : > { %2851 = vxpose.xlu0.b32.start [1/2] (short) (narrow) %v2364_v17, 32 }
 0x1a8   : > { %17462 = vst [vmem:[#allocation35_spill] sm:$0xff] %v14682_v19  ;;  %17463 = vst [vmem:[#allocation36_spill] sm:$0xff] %v14685_v22 }
 0x1a9   : > { %17464 = vst [vmem:[#allocation37_spill] sm:$0xff] %v14688_v11  ;;  %17465 = vst [vmem:[#allocation38_spill] sm:$0xff] %v14691_v25 }
 0x1ab   : > { %2883 = vxpose.xlu1.b32.start [1/2] (short) (narrow) %v2368_v51, 32  ;;  %2852 = vxpose.xlu0.b32.end [2/2] (short) (narrow) %v14658_v3, 32 }
 0x1af   : > { %2884 = vxpose.xlu1.b32.end [2/2] (short) (narrow) %v14660_v6, 32 }
 0x1e8   : > { %v13410_v27 = vpop.f32.mrb[0].mxu1 }
 0x1e9   : > { %v14717_v35 = vmul.f32 0.03125, %v13410_v27  ;;  %v922_v1 = vpop.f32.mrb[1].mxu1 }
 0x1ea   : > { %v14719_v42 = vmul.f32 0.03125, %v922_v1 }
 0x1eb   : > { %17468 = vst [vmem:[#allocation41_spill] sm:$0xff] %v14717_v35  ;;  %v1518_v56 = vsel %vm1514_vm3, %v14717_v35, -inf }
 0x1ec   : > { %17469 = vst [vmem:[#allocation42_spill] sm:$0xff] %v14719_v42  ;;  %1519 = vmax.xlane.f32.xlu0 %v1518_v56  ;;  %v1515_v62 = vsel %vm1514_vm3, %v14719_v42, -inf }
 0x1f0   : > { %1516 = vmax.xlane.f32.xlu0 %v1515_v62  ;;  %v14725_v51 = vpop.f32.mrb[2].mxu1 }
 0x1f1   : > { %v14727_v4 = vpop.f32.mrb[3].mxu1 }
 0x1f8   : > { %v14729_v7 = vpop.f32.mrb[4].mxu1 }
 0x1f9   : > { %v14731_v8 = vpop.f32.mrb[5].mxu1 }
 0x200   : > { %v14733_v10 = vpop.f32.mrb[6].mxu1  ;;  %v2675_v27 = vpop.trf.xlu0 }
 0x201   : > { %v14735_v1 = vpop.f32.mrb[7].mxu1 }
 0x203   : > { %v14737_v61 = vpop.f32.mrb[16].mxu0 }
 0x204   : > { %v2707_v56 = vpop.trf.xlu1  ;;  %v14739_v60 = vpop.trf.xlu0 }
 0x205   : > { %v14741_v59 = vpop.f32.mrb[17].mxu0 }
 0x206   : > { %17470 = vst [vmem:[#allocation43_spill] sm:$0xff] %v14741_v59 }
 0x208   : > { %v14743_v62 = vpop.f32.mrb[8].mxu1  ;;  %v2708_v58 = vpop.trf.xlu1 }
 0x209   : > { %v2677_v34 = vpop.trf.xlu0  ;;  %v14745_v30 = vpop.f32.mrb[9].mxu1 }
 0x20c   : > { %v2709_v33 = vpop.trf.xlu1 }
 0x20d   : > { %v14747_v17 = vpop.trf.xlu0 }
 0x210   : > { %v14749_v63 = vpop.f32.mrb[10].mxu1  ;;  %v14751_v32 = vpop.trf.xlu1 }
 0x211   : > { %17471 = vst [vmem:[#allocation44_spill] sm:$0xff] %v14749_v63  ;;  %v2739_v29 = vpop.trf.xlu0  ;;  %v14753_v28 = vpop.f32.mrb[11].mxu1 }
 0x212   : > { %17472 = vst [vmem:[#allocation45_spill] sm:$0xff] %v14753_v28  ;;  %v2915_v25 = vcombine.low %v2675_v27, %v2739_v29  ;;  %v2916_v18 = vcombine.high %v2675_v27, %v2739_v29 }
 0x214   : > { %v2771_v47 = vpop.trf.xlu1  ;;  %v2923_v22 = vrot.slane %v2915_v25, %v14632_v37 }
 0x215   : > { %v14755_v24 = vpop.trf.xlu0  ;;  %v2931_v54 = vcombine.low %v2707_v56, %v2771_v47  ;;  %v2932_v52 = vcombine.high %v2707_v56, %v2771_v47  ;;  %v2930_v47 = vrot.slane %v2916_v18, %v14632_v37 }
 0x217   : > { %v2939_v39 = vrot.slane %v2931_v54, %v14632_v37  ;;  %v2946_v41 = vrot.slane %v2932_v52, %v14632_v37 }
 0x218   : > { %v14757_v45 = vpop.f32.mrb[12].mxu1  ;;  %v2772_v20 = vpop.trf.xlu1 }
 0x219   : > { %v2741_v48 = vpop.trf.xlu0  ;;  %v14759_v31 = vpop.f32.mrb[13].mxu1  ;;  %v3068_v6 = vcombine.high %v2708_v58, %v2772_v20  ;;  %v2995_v25 = vcombine.low %v2930_v47, %v2946_v41 }
 0x21a   : > { %v3187_v29 = vcombine.low %v2677_v34, %v2741_v48  ;;  %v3188_v27 = vcombine.high %v2677_v34, %v2741_v48  ;;  %v2980_v34 = vcombine.high %v2923_v22, %v2939_v39 }
 0x21b   : > { %v14805_v48 = vrot.slane %v3068_v6, %v14632_v37 }
 0x21c   : > { %v2773_v46 = vpop.trf.xlu1 }
 0x21d   : > { %v14761_v23 = vpop.trf.xlu0  ;;  %v3203_v3 = vcombine.low %v2709_v33, %v2773_v46  ;;  %v3204_v0 = vcombine.high %v2709_v33, %v2773_v46 }
 0x21e   : > { %v3324_v16 = vcombine.high %v14747_v17, %v14761_v23 }
 0x21f   : > { %v14802_v46 = vrot.slane %v3204_v0, %v14632_v37  ;;  %v3323_v0 = vcombine.low %v14747_v17, %v14761_v23 }
 0x220   : > { %v2774_v43 = vpop.trf.xlu1  ;;  %v14767_v44 = vrot.slane %v3324_v16, %v14632_v37  ;;  %v3051_v16 = vcombine.low %v14739_v60, %v14755_v24 }
 0x221   : > { %v3340_v36 = vcombine.high %v14751_v32, %v2774_v43  ;;  %v2803_v9 = vpop.trf.xlu0  ;;  %v3339_v18 = vcombine.low %v14751_v32, %v2774_v43 }
 0x222   : > { %v14795_v19 = vrot.slane %v3051_v16, %v14632_v37  ;;  %v3195_v16 = vrot.slane %v3187_v29, %v14632_v37  ;;  %v14834_v29 = vrot.slane %v2980_v34, %v14673_v50 }
 0x223   : > { %v14770_v15 = vrot.slane %v3340_v36, %v14632_v37  ;;  %v3067_v36 = vcombine.low %v2708_v58, %v2772_v20  ;;  %v3211_v20 = vrot.slane %v3203_v3, %v14632_v37  ;;  %v2979_v58 = vcombine.low %v2923_v22, %v2939_v39 }
 0x224   : > { %v2835_v40 = vpop.trf.xlu1  ;;  %v2996_v3 = vcombine.high %v2930_v47, %v2946_v41  ;;  %v14831_v47 = vrot.slane %v2995_v25, %v14673_v50 }
 0x225   : > { %v14774_v2 = vpop.trf.xlu0  ;;  %v14798_v54 = vrot.slane %v3067_v36, %v14632_v37  ;;  %v14810_v36 = vrot.slane %v3188_v27, %v14632_v37  ;;  %v2987_v6 = vrot.slane %v2979_v58, %v14673_v50  ;;  %v3251_v22 = vcombine.low %v3195_v16, %v3211_v20 }
 0x226   : > { %v3252_v32 = vcombine.high %v3195_v16, %v3211_v20  ;;  %v14837_v27 = vrot.slane %v2996_v3, %v14673_v50 }
 0x227   : > { %v3115_v43 = vcombine.low %v14795_v19, %v14798_v54  ;;  %v3268_v39 = vcombine.high %v14810_v36, %v14802_v46  ;;  %v3267_v25 = vcombine.low %v14810_v36, %v14802_v46  ;;  %v14853_v3 = vrot.slane %v3251_v22, %v14673_v50 }
 0x228   : > { %v14776_v55 = vpop.trf.xlu1 }
 0x229   : > { %v14778_v53 = vpop.trf.xlu0 }
 0x22c   : > { %v14780_v11 = vpop.trf.xlu1 }
 0x22d   : > { %v14784_v26 = vpop.trf.xlu0 }
 0x230   : > { %v14790_v56 = vpop.trf.xlu1 }
 0x231   : > { %v2867_v52 = vpop.trf.xlu0 }
 0x232   : > { %v2947_v33 = vcombine.low %v2803_v9, %v2867_v52  ;;  %v2948_v14 = vcombine.high %v2803_v9, %v2867_v52  ;;  %v14822_v9 = vrot.slane %v3339_v18, %v14632_v37  ;;  %v3331_v52 = vrot.slane %v3323_v0, %v14632_v37 }
 0x233   : > { %v14856_v0 = vrot.slane %v3252_v32, %v14673_v50 }
 0x234   : > { %v2899_v12 = vpop.trf.xlu1  ;;  %v2955_v41 = vrot.slane %v2947_v33, %v14632_v37  ;;  %v14848_v33 = vrot.slane %v3268_v39, %v14673_v50  ;;  %v3387_v34 = vcombine.low %v3331_v52, %v14822_v9  ;;  %v3388_v42 = vcombine.high %v3331_v52, %v14822_v9 }
 0x235   : > { %v2963_v49 = vcombine.low %v2835_v40, %v2899_v12  ;;  %v2964_v5 = vcombine.high %v2835_v40, %v2899_v12  ;;  %v14814_v38 = vpop.trf.xlu0  ;;  %v2962_v12 = vrot.slane %v2948_v14, %v14632_v37 }
 0x237   : > { %v2971_v23 = vrot.slane %v2963_v49, %v14632_v37  ;;  %v2978_v40 = vrot.slane %v2964_v5, %v14632_v37  ;;  %v14841_v49 = vrot.slane %v3115_v43, %v14673_v50  ;;  %v3083_v43 = vcombine.low %v14774_v2, %v14814_v38 }
 0x238   : > { %v14828_v17 = vpop.trf.xlu1 }
 0x239   : > { %v2869_v20 = vpop.trf.xlu0  ;;  %v3011_v58 = vcombine.low %v2955_v41, %v2971_v23  ;;  %v3027_v14 = vcombine.low %v2962_v12, %v2978_v40  ;;  %v3012_v18 = vcombine.high %v2955_v41, %v2971_v23  ;;  %v3099_v41 = vcombine.low %v14776_v55, %v14828_v17 }
 0x23a   : > { %v3219_v46 = vcombine.low %v14778_v53, %v2869_v20  ;;  %v3220_v36 = vcombine.high %v14778_v53, %v2869_v20  ;;  %v3028_v35 = vcombine.high %v2962_v12, %v2978_v40 }
 0x23b   : > { %v3019_v16 = vrot.slane %v3011_v58, %v14673_v50  ;;  %v14868_v21 = vrot.slane %v3027_v14, %v14673_v50  ;;  %v3026_v57 = vrot.slane %v3012_v18, %v14673_v50 }
 0x23c   : > { %v2901_v39 = vpop.trf.xlu1  ;;  %v3227_v40 = vrot.slane %v3219_v46, %v14632_v37  ;;  %v3234_v9 = vrot.slane %v3220_v36, %v14632_v37  ;;  %v3042_v18 = vrot.slane %v3028_v35, %v14673_v50  ;;  %v14898_v35 = vrot.slane %v3388_v42, %v14673_v50 }
 0x23d   : > { %v3235_v23 = vcombine.low %v14780_v11, %v2901_v39  ;;  %v3236_v58 = vcombine.high %v14780_v11, %v2901_v39  ;;  %v2870_v22 = vpop.trf.xlu0  ;;  %v3044_v5 = vcombine.high %v2987_v6, %v3019_v16  ;;  %v3043_v13 = vcombine.low %v2987_v6, %v3019_v16 }
 0x23e   : > { %v3355_v32 = vcombine.low %v14784_v26, %v2870_v22  ;;  %v3356_v20 = vcombine.high %v14784_v26, %v2870_v22  ;;  %v3403_v11 = vcombine.low %v14767_v44, %v14770_v15  ;;  %v3091_v6 = vrot.slane %v3083_v43, %v14632_v37 }
 0x23f   : > { %v3243_v53 = vrot.slane %v3235_v23, %v14632_v37  ;;  %3491 = vxpose.xlu1.b32.start.end [1/1] (short) (narrow) %v3044_v5, 16  ;;  %3459 = vxpose.xlu0.b32.start.end [1/1] (short) (narrow) %v3043_v13, 16  ;;  %v3107_v16 = vrot.slane %v3099_v41, %v14632_v37  ;;  %v3250_v14 = vrot.slane %v3236_v58, %v14632_v37 }
 0x240   : > { %v2902_v39 = vpop.trf.xlu1  ;;  %v3363_v13 = vrot.slane %v3355_v32, %v14632_v37  ;;  %v3047_v52 = vcombine.low %v14831_v47, %v14868_v21  ;;  %v3045_v5 = vcombine.low %v14834_v29, %v3026_v57  ;;  %v3370_v43 = vrot.slane %v3356_v20, %v14632_v37 }
 0x241   : > { %v3371_v12 = vcombine.low %v14790_v56, %v2902_v39  ;;  %v3372_v26 = vcombine.high %v14790_v56, %v2902_v39  ;;  %v3283_v36 = vcombine.low %v3227_v40, %v3243_v53  ;;  %v3300_v23 = vcombine.high %v3234_v9, %v3250_v14 }
 0x242   : > { %v3147_v56 = vcombine.low %v3091_v6, %v3107_v16  ;;  %v14892_v58 = vrot.slane %v3267_v25, %v14673_v50  ;;  %v14895_v39 = vrot.slane %v3387_v34, %v14673_v50  ;;  %v3084_v20 = vcombine.high %v14774_v2, %v14814_v38 }
 0x243   : > { %v3379_v41 = vrot.slane %v3371_v12, %v14632_v37  ;;  %v3386_v46 = vrot.slane %v3372_v26, %v14632_v37  ;;  %v3100_v12 = vcombine.high %v14776_v55, %v14828_v17  ;;  %v3049_v25 = vcombine.low %v14837_v27, %v3042_v18 }
 0x244   : > { %3587 = vxpose.xlu1.b32.start.end [1/1] (short) (narrow) %v3047_v52, 16  ;;  %3523 = vxpose.xlu0.b32.start.end [1/1] (short) (narrow) %v3045_v5, 16  ;;  %v14905_v52 = vrot.slane %v3403_v11, %v14673_v50  ;;  %v3046_v5 = vcombine.high %v14834_v29, %v3026_v57  ;;  %v14910_v34 = vrot.slane %v3283_v36, %v14673_v50 }
 0x245   : > { %v3419_v22 = vcombine.low %v3363_v13, %v3379_v41  ;;  %v3436_v32 = vcombine.high %v3370_v43, %v3386_v46  ;;  %v3420_v26 = vcombine.high %v3363_v13, %v3379_v41  ;;  %v3284_v28 = vcombine.high %v3227_v40, %v3243_v53 }
 0x246   : > { %v3155_v42 = vrot.slane %v3147_v56, %v14673_v50  ;;  %v3148_v63 = vcombine.high %v3091_v6, %v3107_v16  ;;  %v3299_v59 = vcombine.low %v3234_v9, %v3250_v14  ;;  %v14914_v2 = vrot.slane %v3300_v23, %v14673_v50 }
 0x247   : > { %v3435_v38 = vcombine.low %v3370_v43, %v3386_v46  ;;  %v14917_v55 = vrot.slane %v3284_v28, %v14673_v50  ;;  %v14920_v17 = vrot.slane %v3419_v22, %v14673_v50  ;;  %v3114_v57 = vrot.slane %v3100_v12, %v14632_v37 }
 0x248   : > { %v14924_v29 = vrot.slane %v3299_v59, %v14673_v50  ;;  %v14927_v53 = vrot.slane %v3420_v26, %v14673_v50  ;;  %v3315_v11 = vcombine.low %v14853_v3, %v14910_v34  ;;  %v3098_v6 = vrot.slane %v3084_v20, %v14632_v37 }
 0x249   : > { %3651 = vxpose.xlu1.b32.start.end [1/1] (short) (narrow) %v3049_v25, 16  ;;  %3555 = vxpose.xlu0.b32.start.end [1/1] (short) (narrow) %v3046_v5, 16  ;;  %v3317_v28 = vcombine.low %v14856_v0, %v14917_v55  ;;  %v3321_v16 = vcombine.low %v14848_v33, %v14914_v2  ;;  %v17473_v14 = vcombine.high %v14767_v44, %v14770_v15 }
 0x24a   : > { %v3179_v40 = vcombine.low %v14841_v49, %v3155_v42  ;;  %v3048_v9 = vcombine.high %v14831_v47, %v14868_v21  ;;  %v3319_v13 = vcombine.low %v14892_v58, %v14924_v29  ;;  %v3451_v43 = vcombine.low %v14895_v39, %v14920_v17 }
 0x24b   : > { %v14940_v59 = vrot.slane %v17473_v14, %v14673_v50  ;;  %v3162_v41 = vrot.slane %v3148_v63, %v14673_v50  ;;  %v3453_v46 = vcombine.low %v14898_v35, %v14927_v53  ;;  %v14953_v15 = vrot.slane %v3435_v38, %v14673_v50 }
 0x24c   : > { %v14956_v44 = vrot.slane %v3436_v32, %v14673_v50  ;;  %v17476_v21 = vcombine.high %v14739_v60, %v14755_v24  ;;  %v3163_v36 = vcombine.low %v3098_v6, %v3114_v57  ;;  %v17477_v63 = vcombine.high %v14795_v19, %v14798_v54 }
 0x24d   : > { %17474 = vst [vmem:[#allocation46_spill] sm:$0xff] %v14940_v59  ;;  %v3050_v20 = vcombine.high %v14837_v27, %v3042_v18  ;;  %v3164_v19 = vcombine.high %v3098_v6, %v3114_v57  ;;  %v3180_v5 = vcombine.high %v14841_v49, %v3155_v42  ;;  %v3318_v49 = vcombine.high %v14856_v0, %v14917_v55 }
 0x24e   : > { %17475 = vst [vmem:[#allocation47_spill] sm:$0xff] %v14956_v44  ;;  %v3066_v47 = vrot.slane %v17476_v21, %v14632_v37  ;;  %3715 = vxpose.xlu1.b32.start.end [1/1] (short) (narrow) %v3179_v40, 16  ;;  %3619 = vxpose.xlu0.b32.start.end [1/1] (short) (narrow) %v3048_v9, 16  ;;  %v3130_v23 = vrot.slane %v17477_v63, %v14673_v50 }
 0x24f   : > { %v3171_v12 = vrot.slane %v3163_v36, %v14673_v50  ;;  %v3178_v38 = vrot.slane %v3164_v19, %v14673_v50  ;;  %v3320_v42 = vcombine.high %v14892_v58, %v14924_v29  ;;  %v3322_v6 = vcombine.high %v14848_v33, %v14914_v2 }
 0x250   : > { %v3131_v24 = vcombine.low %v3066_v47, %v14805_v48  ;;  %v3181_v60 = vcombine.low %v3130_v23, %v3162_v41  ;;  %v3132_v26 = vcombine.high %v3066_v47, %v14805_v48  ;;  %v3182_v27 = vcombine.high %v3130_v23, %v3162_v41 }
 0x251   : > { %v3316_v48 = vcombine.high %v14853_v3, %v14910_v34  ;;  %v3452_v9 = vcombine.high %v14895_v39, %v14920_v17  ;;  %v14991_v41 = vmul.f32 0.03125, %v14725_v51  ;;  %v3454_v21 = vcombine.high %v14898_v35, %v14927_v53 }
 0x252   : > { %v3139_v54 = vrot.slane %v3131_v24, %v14673_v50  ;;  %v3146_v14 = vrot.slane %v3132_v26, %v14673_v50  ;;  %v14996_v47 = vmul.f32 0.03125, %v14727_v4  ;;  %v15003_v23 = vmul.f32 0.03125, %v14729_v7 }
 0x253   : > { %3779 = vxpose.xlu1.b32.start.end [1/1] (short) (narrow) %v3181_v60, 16  ;;  %3683 = vxpose.xlu0.b32.start.end [1/1] (short) (narrow) %v3050_v20, 16  ;;  %v1524_v36 = vsel %vm1514_vm3, %v14991_v41, -inf  ;;  %v15006_v51 = vmul.f32 0.03125, %v14731_v8  ;;  %v15013_v60 = vmul.f32 0.03125, %v14743_v62  ;;  %v15020_v7 = vmul.f32 0.03125, %v14745_v30 }
 0x254   : > { %v3183_v25 = vcombine.low %v3139_v54, %v3171_v12  ;;  %v3185_v40 = vcombine.low %v3146_v14, %v3178_v38  ;;  %v3184_v18 = vcombine.high %v3139_v54, %v3171_v12  ;;  %v3186_v57 = vcombine.high %v3146_v14, %v3178_v38 }
 0x255   : > { %v1521_v63 = vsel %vm1514_vm3, %v14996_v47, -inf  ;;  %v1530_v4 = vsel %vm1514_vm3, %v15003_v23, -inf  ;;  %v1527_v20 = vsel %vm1514_vm3, %v15006_v51, -inf  ;;  %v1542_v8 = vsel %vm1514_vm3, %v15013_v60, -inf }
 0x256   : > { %v15028_v54 = vmul.f32 0.03125, %v14757_v45  ;;  %v1539_v26 = vsel %vm1514_vm3, %v15020_v7, -inf }
 0x258   : > { %3843 = vxpose.xlu1.b32.start.end [1/1] (short) (narrow) %v3183_v25, 16  ;;  %3747 = vxpose.xlu0.b32.start.end [1/1] (short) (narrow) %v3180_v5, 16  ;;  %v15036_v5 = vmul.f32 0.03125, %v14759_v31  ;;  %v1554_v3 = vsel %vm1514_vm3, %v15028_v54, -inf }
 0x25a   : > { %v1551_v14 = vsel %vm1514_vm3, %v15036_v5, -inf }
 0x25d   : > { %3907 = vxpose.xlu1.b32.start.end [1/1] (short) (narrow) %v3185_v40, 16  ;;  %3811 = vxpose.xlu0.b32.start.end [1/1] (short) (narrow) %v3182_v27, 16 }
 0x262   : > { %3875 = vxpose.xlu0.b32.start.end [1/1] (short) (narrow) %v3184_v18, 16 }
 0x267   : > { %3939 = vxpose.xlu0.b32.start.end [1/1] (short) (narrow) %v3186_v57, 16 }
 0x26c   : > { %4003 = vxpose.xlu0.b32.start.end [1/1] (short) (narrow) %v3316_v48, 16 }
 0x271   : > { %4067 = vxpose.xlu0.b32.start.end [1/1] (short) (narrow) %v3318_v49, 16 }
 0x276   : > { %4131 = vxpose.xlu0.b32.start.end [1/1] (short) (narrow) %v3320_v42, 16 }
 0x279   : > { %v15008_v24 = vpop.xlane.xlu0 %1519 }
 0x27b   : > { %4195 = vxpose.xlu0.b32.start.end [1/1] (short) (narrow) %v3322_v6, 16 }
 0x27d   : > { %v15017_v12 = vpop.xlane.xlu0 %1516 }
 0x280   : > { %4259 = vxpose.xlu0.b32.start.end [1/1] (short) (narrow) %v3452_v9, 16 }
 0x285   : > { %4323 = vxpose.xlu0.b32.start.end [1/1] (short) (narrow) %v3454_v21, 16 }
 0x288   : > { %1525 = vmax.xlane.f32.xlu1 %v1524_v36 }
 0x28c   : > { %1522 = vmax.xlane.f32.xlu1 %v1521_v63 }
 0x2b6   : > { %1531 = vmax.xlane.f32.xlu0 %v1530_v4 }
 0x2ba   : > { %1528 = vmax.xlane.f32.xlu0 %v1527_v20 }
 0x2be   : > { %1543 = vmax.xlane.f32.xlu0 %v1542_v8 }
 0x2bf   : > { %3971 = vxpose.xlu1.b32.start.end [1/1] (short) (narrow) %v3315_v11, 16  ;;  %v3475_v19 = vpop.trf.xlu0  ;;  %v3507_v62 = vpop.trf.xlu1 }
 0x2c2   : > { %1540 = vmax.xlane.f32.xlu0 %v1539_v26 }
 0x2c3   : > { %v3476_v25 = vpop.trf.xlu0  ;;  %v3508_v30 = vpop.trf.xlu1 }
 0x2c4   : > { %4035 = vxpose.xlu1.b32.start.end [1/1] (short) (narrow) %v3317_v28, 16 }
 0x2c6   : > { %1555 = vmax.xlane.f32.xlu0 %v1554_v3 }
 0x2c7   : > { %v3539_v34 = vpop.trf.xlu0  ;;  %v3603_v45 = vpop.trf.xlu1 }
 0x2c8   : > { %v4483_v11 = vcombine.low %v3475_v19, %v3539_v34  ;;  %v4484_v38 = vcombine.high %v3475_v19, %v3539_v34 }
 0x2c9   : > { %4099 = vxpose.xlu1.b32.start.end [1/1] (short) (narrow) %v3319_v13, 16 }
 0x2ca   : > { %1552 = vmax.xlane.f32.xlu0 %v1551_v14  ;;  %v4491_v31 = vrot.slane %v4483_v11, %v14632_v37  ;;  %v4498_v28 = vrot.slane %v4484_v38, %v14632_v37 }
 0x2cb   : > { %v3540_v0 = vpop.trf.xlu0  ;;  %v3604_v55 = vpop.trf.xlu1 }
 0x2cc   : > { %v5027_v13 = vcombine.low %v3476_v25, %v3540_v0  ;;  %v5028_v48 = vcombine.high %v3476_v25, %v3540_v0 }
 0x2ce   : > { %4163 = vxpose.xlu1.b32.start.end [1/1] (short) (narrow) %v3321_v16, 16  ;;  %v5035_v36 = vrot.slane %v5027_v13, %v14632_v37  ;;  %v5042_v63 = vrot.slane %v5028_v48, %v14632_v37 }
 0x2cf   : > { %v3571_v40 = vpop.trf.xlu0  ;;  %v3667_v27 = vpop.trf.xlu1 }
 0x2d0   : > { %v4499_v18 = vcombine.low %v3507_v62, %v3571_v40  ;;  %v4500_v57 = vcombine.high %v3507_v62, %v3571_v40  ;;  %v4515_v58 = vcombine.low %v3603_v45, %v3667_v27  ;;  %v4516_v29 = vcombine.high %v3603_v45, %v3667_v27 }
 0x2d2   : > { %v4507_v49 = vrot.slane %v4499_v18, %v14632_v37  ;;  %v4514_v42 = vrot.slane %v4500_v57, %v14632_v37  ;;  %v4530_v11 = vrot.slane %v4516_v29, %v14632_v37 }
 0x2d3   : > { %4227 = vxpose.xlu1.b32.start.end [1/1] (short) (narrow) %v3451_v43, 16  ;;  %v3572_v33 = vpop.trf.xlu0  ;;  %v3668_v2 = vpop.trf.xlu1 }
 0x2d4   : > { %v4547_v16 = vcombine.low %v4491_v31, %v4507_v49  ;;  %v4548_v6 = vcombine.high %v4491_v31, %v4507_v49  ;;  %v4563_v9 = vcombine.low %v4498_v28, %v4514_v42  ;;  %v4564_v21 = vcombine.high %v4498_v28, %v4514_v42 }
 0x2d5   : > { %v5043_v4 = vcombine.low %v3508_v30, %v3572_v33  ;;  %v5044_v20 = vcombine.high %v3508_v30, %v3572_v33  ;;  %v4523_v30 = vrot.slane %v4515_v58, %v14632_v37  ;;  %v5059_v38 = vcombine.low %v3604_v55, %v3668_v2 }
 0x2d6   : > { %v5060_v14 = vcombine.high %v3604_v55, %v3668_v2  ;;  %v15078_v40 = vrot.slane %v4548_v6, %v14673_v50  ;;  %v15083_v18 = vrot.slane %v4563_v9, %v14673_v50  ;;  %v15086_v57 = vrot.slane %v4564_v21, %v14673_v50 }
 0x2d7   : > { %v5051_v8 = vrot.slane %v5043_v4, %v14632_v37  ;;  %v5058_v19 = vrot.slane %v5044_v20, %v14632_v37  ;;  %v3635_v62 = vpop.trf.xlu0  ;;  %v15059_v26 = vpop.trf.xlu1  ;;  %v5067_v29 = vrot.slane %v5059_v38, %v14632_v37 }
 0x2d8   : > { %4291 = vxpose.xlu1.b32.start.end [1/1] (short) (narrow) %v3453_v46, 16  ;;  %v15075_v46 = vrot.slane %v4547_v16, %v14673_v50  ;;  %v5074_v13 = vrot.slane %v5060_v14, %v14632_v37 }
 0x2d9   : > { %v5091_v39 = vcombine.low %v5035_v36, %v5051_v8  ;;  %v5092_v17 = vcombine.high %v5035_v36, %v5051_v8  ;;  %v5107_v43 = vcombine.low %v5042_v63, %v5058_v19  ;;  %v5108_v25 = vcombine.high %v5042_v63, %v5058_v19 }
 0x2db   : > { %v3636_v3 = vpop.trf.xlu0  ;;  %v15064_v34 = vpop.trf.xlu1  ;;  %v15091_v2 = vrot.slane %v5091_v39, %v14673_v50  ;;  %v15094_v16 = vrot.slane %v5092_v17, %v14673_v50  ;;  %v15109_v8 = vrot.slane %v5107_v43, %v14673_v50  ;;  %v15112_v19 = vrot.slane %v5108_v25, %v14673_v50 }
 0x2df   : > { %v3699_v45 = vpop.trf.xlu0  ;;  %v15068_v0 = vpop.trf.xlu1 }
 0x2e0   : > { %v4531_v31 = vcombine.low %v3635_v62, %v3699_v45  ;;  %v4532_v28 = vcombine.high %v3635_v62, %v3699_v45  ;;  %v4619_v35 = vcombine.low %v15059_v26, %v15068_v0  ;;  %v4620_v53 = vcombine.high %v15059_v26, %v15068_v0 }
 0x2e2   : > { %v4539_v27 = vrot.slane %v4531_v31, %v14632_v37  ;;  %v4546_v55 = vrot.slane %v4532_v28, %v14632_v37  ;;  %v4627_v32 = vrot.slane %v4619_v35, %v14632_v37  ;;  %v4634_v22 = vrot.slane %v4620_v53, %v14632_v37 }
 0x2e3   : > { %v3700_v58 = vpop.trf.xlu0  ;;  %v3796_v20 = vpop.trf.xlu1 }
 0x2e4   : > { %v4579_v48 = vcombine.low %v4523_v30, %v4539_v27  ;;  %v4580_v49 = vcombine.high %v4523_v30, %v4539_v27  ;;  %v4595_v42 = vcombine.low %v4530_v11, %v4546_v55  ;;  %v4596_v33 = vcombine.high %v4530_v11, %v4546_v55 }
 0x2e5   : > { %v5075_v6 = vcombine.low %v3636_v3, %v3700_v58  ;;  %v5076_v9 = vcombine.high %v3636_v3, %v3700_v58  ;;  %v5163_v56 = vcombine.low %v15064_v34, %v3796_v20 }
 0x2e6   : > { %v15097_v21 = vrot.slane %v4579_v48, %v14673_v50  ;;  %v15100_v36 = vrot.slane %v4580_v49, %v14673_v50  ;;  %v15103_v63 = vrot.slane %v4595_v42, %v14673_v50  ;;  %v15106_v4 = vrot.slane %v4596_v33, %v14673_v50 }
 0x2e7   : > { %v5083_v62 = vrot.slane %v5075_v6, %v14632_v37  ;;  %v5090_v26 = vrot.slane %v5076_v9, %v14632_v37  ;;  %v3763_v39 = vpop.trf.xlu0  ;;  %v3859_v48 = vpop.trf.xlu1  ;;  %v5164_v9 = vcombine.high %v15064_v34, %v3796_v20  ;;  %v5171_v53 = vrot.slane %v5163_v56, %v14632_v37 }
 0x2e8   : > { %v15176_v56 = vmul.f32 0.03125, %v14735_v1 }
 0x2e9   : > { %v5123_v30 = vcombine.low %v5067_v29, %v5083_v62  ;;  %v5124_v25 = vcombine.high %v5067_v29, %v5083_v62  ;;  %v5139_v11 = vcombine.low %v5074_v13, %v5090_v26  ;;  %v5140_v38 = vcombine.high %v5074_v13, %v5090_v26 }
 0x2ea   : > { %v3456_v26 = vcombine.high %v14905_v52, %v14953_v15  ;;  %v5178_v31 = vrot.slane %v5164_v9, %v14632_v37  ;;  %17479 = vst [vmem:[#allocation49_spill] sm:$0xff] %v15176_v56  ;;  %v15179_v9 = vmul.f32 0.03125, %v14737_v61  ;;  %v1533_v61 = vsel %vm1514_vm3, %v15176_v56, -inf }
 0x2eb   : > { %v15133_v27 = vrot.slane %v5123_v30, %v14673_v50  ;;  %v15136_v55 = vrot.slane %v5124_v25, %v14673_v50  ;;  %v15139_v58 = vrot.slane %v5139_v11, %v14673_v50  ;;  %v15142_v29 = vrot.slane %v5140_v38, %v14673_v50  ;;  %v3764_v13 = vpop.trf.xlu0  ;;  %v3860_v33 = vpop.trf.xlu1 }
 0x2ec   : > { %17480 = vst [vmem:[#allocation50_spill] sm:$0xff] %v15179_v9 }
 0x2ef   : > { %v3827_v25 = vpop.trf.xlu0 }
 0x2f0   : > { %v4635_v11 = vcombine.low %v3763_v39, %v3827_v25  ;;  %v4636_v38 = vcombine.high %v3763_v39, %v3827_v25 }
 0x2f2   : > { %v4643_v6 = vrot.slane %v4635_v11, %v14632_v37  ;;  %v4650_v62 = vrot.slane %v4636_v38, %v14632_v37  ;;  %v3923_v38 = vpop.trf.xlu1 }
 0x2f3   : > { %v3828_v30 = vpop.trf.xlu0 }
 0x2f4   : > { %v4683_v42 = vcombine.low %v4627_v32, %v4643_v6  ;;  %v4684_v49 = vcombine.high %v4627_v32, %v4643_v6  ;;  %v4699_v39 = vcombine.low %v4634_v22, %v4650_v62  ;;  %v4700_v25 = vcombine.high %v4634_v22, %v4650_v62  ;;  %v17481_v62 = vld [vmem:[#allocation43_spill] sm:$0xff] }
 0x2f5   : > { %v5179_v35 = vcombine.low %v3764_v13, %v3828_v30  ;;  %v5180_v28 = vcombine.high %v3764_v13, %v3828_v30  ;;  %v15173_v32 = vmul.f32 0.03125, %v14733_v10  ;;  %v4651_v13 = vcombine.low %v3859_v48, %v3923_v38 }
 0x2f6   : > { %v4652_v6 = vcombine.high %v3859_v48, %v3923_v38 }
 0x2f7   : > { %4387 = vxpose.xlu0.b32.start.end [1/1] (short) (narrow) %v3456_v26, 16  ;;  %v5187_v34 = vrot.slane %v5179_v35, %v14632_v37  ;;  %v5194_v20 = vrot.slane %v5180_v28, %v14632_v37  ;;  %v3891_v11 = vpop.trf.xlu0  ;;  %17478 = vst [vmem:[#allocation48_spill] sm:$0xff] %v15173_v32  ;;  %v15182_v28 = vmul.f32 0.03125, %v17481_v62  ;;  %v3924_v26 = vpop.trf.xlu1  ;;  %v1536_v30 = vsel %vm1514_vm3, %v15173_v32, -inf }
 0x2f8   : > { %v5195_v35 = vcombine.low %v3860_v33, %v3924_v26  ;;  %v5196_v10 = vcombine.high %v3860_v33, %v3924_v26  ;;  %v4659_v48 = vrot.slane %v4651_v13, %v14632_v37  ;;  %v4666_v1 = vrot.slane %v4652_v6, %v14632_v37 }
 0x2f9   : > { %v5227_v0 = vcombine.low %v5171_v53, %v5187_v34  ;;  %v5228_v14 = vcombine.high %v5171_v53, %v5187_v34  ;;  %v5243_v43 = vcombine.low %v5178_v31, %v5194_v20  ;;  %v5244_v45 = vcombine.high %v5178_v31, %v5194_v20  ;;  %17482 = vst [vmem:[#allocation43_spill] sm:$0xff] %v15182_v28  ;;  %v17483_v20 = vld [vmem:[#allocation44_spill] sm:$0xff] }
 0x2fa   : > { %v15189_v38 = vmul.f32 0.03125, %v17483_v20  ;;  %v1560_v62 = vsel %vm1514_vm3, %v15179_v9, -inf  ;;  %v1557_v3 = vsel %vm1514_vm3, %v15182_v28, -inf  ;;  %v4691_v33 = vrot.slane %v4683_v42, %v14673_v50 }
 0x2fb   : > { %v3892_v22 = vpop.trf.xlu0  ;;  %v4707_v26 = vrot.slane %v4699_v39, %v14673_v50  ;;  %v5203_v17 = vrot.slane %v5195_v35, %v14632_v37  ;;  %v5210_v9 = vrot.slane %v5196_v10, %v14632_v37  ;;  %v5251_v39 = vrot.slane %v5243_v43, %v14673_v50 }
 0x2ff   : > { %v3955_v31 = vpop.trf.xlu0 }
 0x300   : > { %v4667_v53 = vcombine.low %v3891_v11, %v3955_v31  ;;  %v4668_v34 = vcombine.high %v3891_v11, %v3955_v31  ;;  %v4698_v11 = vrot.slane %v4684_v49, %v14673_v50  ;;  %v4714_v31 = vrot.slane %v4700_v25, %v14673_v50 }
 0x301   : > { %v5235_v49 = vrot.slane %v5227_v0, %v14673_v50  ;;  %v5258_v25 = vrot.slane %v5244_v45, %v14673_v50 }
 0x302   : > { %v4675_v13 = vrot.slane %v4667_v53, %v14632_v37  ;;  %v4682_v6 = vrot.slane %v4668_v34, %v14632_v37  ;;  %v5242_v53 = vrot.slane %v5228_v14, %v14673_v50 }
 0x303   : > { %1537 = vmax.xlane.f32.xlu1 %v1536_v30  ;;  %v3956_v20 = vpop.trf.xlu0 }
 0x304   : > { %v4715_v44 = vcombine.low %v4659_v48, %v4675_v13  ;;  %v4716_v28 = vcombine.high %v4659_v48, %v4675_v13  ;;  %v4731_v59 = vcombine.low %v4666_v1, %v4682_v6  ;;  %v4732_v42 = vcombine.high %v4666_v1, %v4682_v6 }
 0x305   : > { %v5211_v56 = vcombine.low %v3892_v22, %v3956_v20  ;;  %v5212_v34 = vcombine.high %v3892_v22, %v3956_v20 }
 0x306   : > { %v4723_v30 = vrot.slane %v4715_v44, %v14673_v50  ;;  %v4730_v35 = vrot.slane %v4716_v28, %v14673_v50  ;;  %v4739_v10 = vrot.slane %v4731_v59, %v14673_v50  ;;  %v4746_v48 = vrot.slane %v4732_v42, %v14673_v50 }
 0x307   : > { %1534 = vmax.xlane.f32.xlu1 %v1533_v61  ;;  %v5219_v1 = vrot.slane %v5211_v56, %v14632_v37  ;;  %v5226_v0 = vrot.slane %v5212_v34, %v14632_v37  ;;  %v15215_v14 = vpop.trf.xlu0  ;;  %v17484_v28 = vcombine.low %v15075_v46, %v15097_v21  ;;  %v17485_v56 = vcombine.high %v15075_v46, %v15097_v21 }
 0x308   : > { %v4747_v22 = vcombine.low %v4691_v33, %v4723_v30  ;;  %v4748_v13 = vcombine.high %v4691_v33, %v4723_v30  ;;  %v4749_v43 = vcombine.low %v4698_v11, %v4730_v35  ;;  %v4750_v6 = vcombine.high %v4698_v11, %v4730_v35 }
 0x309   : > { %v5259_v45 = vcombine.low %v5203_v17, %v5219_v1  ;;  %v5260_v20 = vcombine.high %v5203_v17, %v5219_v1  ;;  %v5275_v44 = vcombine.low %v5210_v9, %v5226_v0  ;;  %v5276_v32 = vcombine.high %v5210_v9, %v5226_v0 }
 0x30a   : > { %v15220_v59 = vpack.c.bf16 %v4747_v22, %v17484_v28  ;;  %v15225_v61 = vpack.c.bf16 %v4748_v13, %v17485_v56  ;;  %v17486_v42 = vcombine.low %v15078_v40, %v15100_v36  ;;  %v17487_v17 = vcombine.high %v15078_v40, %v15100_v36 }
 0x30b   : > { %1561 = vmax.xlane.f32.xlu1 %v1560_v62  ;;  %v5267_v9 = vrot.slane %v5259_v45, %v14673_v50  ;;  %v5274_v34 = vrot.slane %v5260_v20, %v14673_v50  ;;  %v5283_v30 = vrot.slane %v5275_v44, %v14673_v50  ;;  %v5290_v46 = vrot.slane %v5276_v32, %v14673_v50  ;;  %v15241_v21 = vpop.trf.xlu0 }
 0x30c   : > { %v15230_v33 = vpack.c.bf16 %v4749_v43, %v17486_v42  ;;  %v15235_v11 = vpack.c.bf16 %v4750_v6, %v17487_v17  ;;  %v4751_v35 = vcombine.low %v4707_v26, %v4739_v10  ;;  %v4752_v1 = vcombine.high %v4707_v26, %v4739_v10  ;;  %v17502_v42 = vld [vmem:[#allocation45_spill] sm:$0xff] }
 0x30d   : > { %v4753_v0 = vcombine.low %v4714_v31, %v4746_v48  ;;  %v4754_v22 = vcombine.high %v4714_v31, %v4746_v48  ;;  %v5291_v13 = vcombine.low %v5235_v49, %v5267_v9  ;;  %v5292_v43 = vcombine.high %v5235_v49, %v5267_v9 }
 0x30e   : > { %v5293_v40 = vcombine.low %v5242_v53, %v5274_v34  ;;  %v5294_v36 = vcombine.high %v5242_v53, %v5274_v34  ;;  %v17488_v62 = vcombine.low %v15083_v18, %v15103_v63  ;;  %v17489_v45 = vcombine.high %v15083_v18, %v15103_v63 }
 0x30f   : > { %v17490_v32 = vcombine.low %v15086_v57, %v15106_v4  ;;  %v17492_v31 = vcombine.high %v15086_v57, %v15106_v4  ;;  %1558 = vmax.xlane.f32.xlu1 %v1557_v3  ;;  %v15263_v53 = vpop.trf.xlu0  ;;  %v17494_v10 = vcombine.low %v15091_v2, %v15133_v27  ;;  %v17496_v18 = vcombine.high %v15091_v2, %v15133_v27  ;;  %v17503_v2 = vld [vmem:[#allocation42_spill] sm:$0xff] }
 0x310   : > { %v15246_v6 = vpack.c.bf16 %v4751_v35, %v17488_v62  ;;  %v15251_v20 = vpack.c.bf16 %v4752_v1, %v17489_v45  ;;  %v17498_v44 = vcombine.low %v15094_v16, %v15136_v55  ;;  %v17500_v57 = vcombine.high %v15094_v16, %v15136_v55 }
 0x311   : > { %v15256_v26 = vpack.c.bf16 %v4753_v0, %v17490_v32  ;;  %v15261_v49 = vpack.c.bf16 %v4754_v22, %v17492_v31  ;;  %v15268_v48 = vpack.c.bf16 %v5291_v13, %v17494_v10  ;;  %v15273_v63 = vpack.c.bf16 %v5292_v43, %v17496_v18 }
 0x312   : > { %v15278_v28 = vpack.c.bf16 %v5293_v40, %v17498_v44  ;;  %v15283_v4 = vpack.c.bf16 %v5294_v36, %v17500_v57  ;;  %v5295_v3 = vcombine.low %v5251_v39, %v5283_v30  ;;  %v5296_v56 = vcombine.high %v5251_v39, %v5283_v30 }
 0x313   : > { %17491 = vst [vmem:[#allocation44_spill] sm:$0xff] %v15256_v26  ;;  %17493 = vst [vmem:[#allocation51_spill] sm:$0xff] %v15261_v49  ;;  %v15286_v17 = vmul.f32 0.03125, %v17502_v42  ;;  %v5297_v9 = vcombine.low %v5258_v25, %v5290_v46  ;;  %v5298_v34 = vcombine.high %v5258_v25, %v5290_v46  ;;  %v1563_v27 = vsub.f32 %v17503_v2, %v15017_v12  ;;  %v15302_v39 = vpop.trf.xlu0 }
 0x314   : > { %17495 = vst [vmem:[#allocation52_spill] sm:$0xff] %v15268_v48  ;;  %17497 = vst [vmem:[#allocation53_spill] sm:$0xff] %v15273_v63  ;;  %v1548_v35 = vsel %vm1514_vm3, %v15189_v38, -inf  ;;  %v17504_v1 = vcombine.low %v15109_v8, %v15139_v58  ;;  %v17506_v16 = vcombine.high %v15109_v8, %v15139_v58  ;;  %v17508_v25 = vcombine.low %v15112_v19, %v15142_v29 }
 0x315   : > { %17499 = vst [vmem:[#allocation54_spill] sm:$0xff] %v15278_v28  ;;  %17501 = vst [vmem:[#allocation55_spill] sm:$0xff] %v15283_v4  ;;  %1549 = vmax.xlane.f32.xlu1 %v1548_v35  ;;  %v17510_v30 = vcombine.high %v15112_v19, %v15142_v29  ;;  %v1526_v22 = vpop.xlane.xlu1 %1525  ;;  %v1579_v13 = vmul.f32 1.442695, %v1563_v27  ;;  %v1545_v8 = vsel %vm1514_vm3, %v15286_v17, -inf }
 0x316   : > { %v15295_v0 = vpack.c.bf16 %v5295_v3, %v17504_v1  ;;  %v15300_v55 = vpack.c.bf16 %v5296_v56, %v17506_v16  ;;  %v15307_v12 = vpack.c.bf16 %v5297_v9, %v17508_v25  ;;  %v1566_v43 = vsub.f32 %v14991_v41, %v1526_v22 }
 0x317   : > { %v15312_v46 = vpack.c.bf16 %v5298_v34, %v17510_v30  ;;  %v15317_v58 = vpop.trf.xlu0  ;;  %14111 = vpow2.f32 %v1579_v13 }
 0x318   : > { %17505 = vst [vmem:[#allocation45_spill] sm:$0xff] %v15295_v0  ;;  %17507 = vst [vmem:[#allocation42_spill] sm:$0xff] %v15300_v55  ;;  %v1585_v36 = vmul.f32 1.442695, %v1566_v43 }
 0x319   : > { %17509 = vst [vmem:[#allocation56_spill] sm:$0xff] %v15307_v12  ;;  %17511 = vst [vmem:[#allocation57_spill] sm:$0xff] %v15312_v46  ;;  %1546 = vmax.xlane.f32.xlu1 %v1545_v8  ;;  %v1523_v40 = vpop.xlane.xlu1 %1522  ;;  %v17516_v12 = vld [vmem:[#allocation46_spill] sm:$0xff] }
 0x31a   : > { %v1565_v62 = vsub.f32 %v14996_v47, %v1523_v40  ;;  %14113 = vpow2.f32 %v1585_v36  ;;  %v17512_v40 = vcombine.low %v14905_v52, %v14953_v15 }
 0x31b   : > { %v15320_v45 = vpop.trf.xlu0 }
 0x31c   : > { %v1583_v19 = vmul.f32 1.442695, %v1565_v62 }
 0x31e   : > { %14115 = vpow2.f32 %v1583_v19 }
 0x31f   : > { %v15322_v29 = vpop.trf.xlu0 }
 0x321   : > { %v15324_v41 = vpop.eup %14111 }
 0x322   : > { %v1611_v18 = vsel %vm1514_vm3, %v15324_v41, 0.0 }
 0x323   : > { %v4212_v32 = vpop.trf.xlu0 }
 0x324   : > { %v5347_v31 = vcombine.low %v15320_v45, %v4212_v32  ;;  %v5348_v10 = vcombine.high %v15320_v45, %v4212_v32  ;;  %v15332_v47 = vpop.eup %14113 }
 0x325   : > { %v1620_v57 = vsel %vm1514_vm3, %v15332_v47, 0.0 }
 0x327   : > { %v15330_v44 = vpop.trf.xlu0 }
 0x328   : > { %1612 = vadd.xlane.f32.xlu0 %v1611_v18  ;;  %v15338_v56 = vpop.eup %14115 }
 0x329   : > { %v1617_v42 = vsel %vm1514_vm3, %v15338_v56, 0.0 }
 0x32b   : > { %v15336_v3 = vpop.trf.xlu0 }
 0x32c   : > { %1621 = vadd.xlane.f32.xlu0 %v1620_v57 }
 0x32f   : > { %v15342_v9 = vpop.trf.xlu0 }
 0x330   : > { %1618 = vadd.xlane.f32.xlu0 %v1617_v42 }
 0x333   : > { %v15344_v34 = vpop.trf.xlu0 }
 0x334   : > { %v5451_v2 = vcombine.low %v15336_v3, %v15344_v34  ;;  %v5452_v27 = vcombine.high %v15336_v3, %v15344_v34  ;;  %v17519_v34 = vld [vmem:[#allocation50_spill] sm:$0xff] }
 0x33f   : > { %v15350_v35 = vpop.trf.xlu1 }
 0x343   : > { %v1532_v1 = vpop.xlane.xlu0 %1531  ;;  %v15352_v16 = vpop.trf.xlu1 }
 0x344   : > { %v1568_v25 = vsub.f32 %v15003_v23, %v1532_v1 }
 0x346   : > { %v1589_v30 = vmul.f32 1.442695, %v1568_v25 }
 0x347   : > { %v1529_v22 = vpop.xlane.xlu0 %1528  ;;  %v15355_v13 = vpop.trf.xlu1 }
 0x348   : > { %14117 = vpow2.f32 %v1589_v30  ;;  %v1567_v43 = vsub.f32 %v15006_v51, %v1529_v22 }
 0x34a   : > { %v1587_v8 = vmul.f32 1.442695, %v1567_v43 }
 0x34b   : > { %v1544_v36 = vpop.xlane.xlu0 %1543  ;;  %v15361_v62 = vpop.trf.xlu1 }
 0x34c   : > { %4355 = vxpose.xlu1.b32.start.end [1/1] (short) (narrow) %v17512_v40, 16  ;;  %14119 = vpow2.f32 %v1587_v8  ;;  %v1572_v45 = vsub.f32 %v15013_v60, %v1544_v36 }
 0x34e   : > { %v1597_v19 = vmul.f32 1.442695, %v1572_v45  ;;  %v15384_v45 = vrot.slane %v5347_v31, %v14632_v37 }
 0x34f   : > { %v1541_v23 = vpop.xlane.xlu0 %1540  ;;  %v15364_v32 = vpop.trf.xlu1 }
 0x350   : > { %14121 = vpow2.f32 %v1597_v19  ;;  %v1571_v18 = vsub.f32 %v15020_v7, %v1541_v23  ;;  %v15387_v19 = vrot.slane %v5348_v10, %v14632_v37 }
 0x352   : > { %v15367_v57 = vpop.eup %14117  ;;  %v1595_v51 = vmul.f32 1.442695, %v1571_v18 }
 0x353   : > { %v1556_v42 = vpop.xlane.xlu0 %1555  ;;  %v4116_v1 = vpop.trf.xlu1  ;;  %v1626_v15 = vsel %vm1514_vm3, %v15367_v57, 0.0 }
 0x354   : > { %14123 = vpow2.f32 %v1595_v51  ;;  %v1576_v52 = vsub.f32 %v15028_v54, %v1556_v42  ;;  %1627 = vadd.xlane.f32.xlu0 %v1626_v15 }
 0x356   : > { %v15372_v60 = vpop.eup %14119  ;;  %v1605_v25 = vmul.f32 1.442695, %v1576_v52 }
 0x357   : > { %v1553_v30 = vpop.xlane.xlu0 %1552  ;;  %v1623_v22 = vsel %vm1514_vm3, %v15372_v60, 0.0  ;;  %v15376_v7 = vpop.trf.xlu1 }
 0x358   : > { %14125 = vpow2.f32 %v1605_v25  ;;  %v1575_v43 = vsub.f32 %v15036_v5, %v1553_v30  ;;  %1624 = vadd.xlane.f32.xlu0 %v1623_v22  ;;  %v17513_v5 = vld [vmem:[#allocation41_spill] sm:$0xff] }
 0x359   : > { %v1564_v42 = vsub.f32 %v17513_v5, %v15008_v24 }
 0x35a   : > { %v15379_v8 = vpop.eup %14121  ;;  %v1603_v54 = vmul.f32 1.442695, %v1575_v43 }
 0x35b   : > { %v1638_v40 = vsel %vm1514_vm3, %v15379_v8, 0.0  ;;  %v4180_v36 = vpop.trf.xlu1  ;;  %v1581_v43 = vmul.f32 1.442695, %v1564_v42  ;;  %v15425_v42 = vrot.slane %v5451_v2, %v14632_v37  ;;  %v17515_v2 = vld [vmem:[#allocation49_spill] sm:$0xff] }
 0x35c   : > { %14127 = vpow2.f32 %v1603_v54  ;;  %1639 = vadd.xlane.f32.xlu0 %v1638_v40  ;;  %v5331_v23 = vcombine.low %v4116_v1, %v4180_v36  ;;  %v5332_v18 = vcombine.high %v4116_v1, %v4180_v36  ;;  %v17517_v1 = vld [vmem:[#allocation47_spill] sm:$0xff] }
 0x35d   : > { %14129 = vpow2.f32 %v1581_v43  ;;  %v17518_v55 = vcombine.high %v17516_v12, %v17517_v1 }
 0x35e   : > { %v15389_v51 = vpop.eup %14123  ;;  %v15396_v15 = vrot.slane %v5331_v23, %v14632_v37  ;;  %v15399_v31 = vrot.slane %v5332_v18, %v14632_v37 }
 0x35f   : > { %v1635_v52 = vsel %vm1514_vm3, %v15389_v51, 0.0  ;;  %v15401_v25 = vpop.trf.xlu1 }
 0x360   : > { %1636 = vadd.xlane.f32.xlu0 %v1635_v52  ;;  %v15431_v52 = vrot.slane %v5452_v27, %v14632_v37 }
 0x362   : > { %v15411_v22 = vpop.eup %14125 }
 0x363   : > { %v4244_v54 = vpop.trf.xlu1  ;;  %v1650_v40 = vsel %vm1514_vm3, %v15411_v22, 0.0 }
 0x364   : > { %1651 = vadd.xlane.f32.xlu0 %v1650_v40 }
 0x366   : > { %v15415_v36 = vpop.eup %14127 }
 0x367   : > { %v1647_v23 = vsel %vm1514_vm3, %v15415_v36, 0.0  ;;  %v15419_v18 = vpop.trf.xlu1  ;;  %v15439_v24 = vpop.eup %14129 }
 0x368   : > { %1648 = vadd.xlane.f32.xlu0 %v1647_v23  ;;  %v1614_v27 = vsel %vm1514_vm3, %v15439_v24, 0.0 }
 0x36b   : > { %v4308_v5 = vpop.trf.xlu1 }
 0x36c   : > { %v5435_v43 = vcombine.low %v4244_v54, %v4308_v5  ;;  %v5436_v40 = vcombine.high %v4244_v54, %v4308_v5  ;;  %v17514_v5 = vld [vmem:[#allocation48_spill] sm:$0xff] }
 0x36e   : > { %v15434_v30 = vrot.slane %v5435_v43, %v14632_v37  ;;  %v15437_v23 = vrot.slane %v5436_v40, %v14632_v37 }
 0x377   : > { %1615 = vadd.xlane.f32.xlu1 %v1614_v27  ;;  %v17520_v27 = vld [vmem:[#allocation43_spill] sm:$0xff] }
 0x390   : > { %v1538_v54 = vpop.xlane.xlu1 %1537 }
 0x391   : > { %v1570_v43 = vsub.f32 %v17514_v5, %v1538_v54 }
 0x393   : > { %v1593_v40 = vmul.f32 1.442695, %v1570_v43 }
 0x394   : > { %v1535_v10 = vpop.xlane.xlu1 %1534 }
 0x395   : > { %14131 = vpow2.f32 %v1593_v40  ;;  %v1569_v46 = vsub.f32 %v17515_v2, %v1535_v10  ;;  %4451 = vxpose.xlu0.b32.start.end [1/1] (short) (narrow) %v17518_v55, 16 }
 0x397   : > { %v1591_v3 = vmul.f32 1.442695, %v1569_v46 }
 0x398   : > { %v1562_v0 = vpop.xlane.xlu1 %1561 }
 0x399   : > { %14133 = vpow2.f32 %v1591_v3  ;;  %v1578_v4 = vsub.f32 %v17519_v34, %v1562_v0 }
 0x39b   : > { %v1609_v28 = vmul.f32 1.442695, %v1578_v4 }
 0x39c   : > { %v1559_v63 = vpop.xlane.xlu1 %1558 }
 0x39d   : > { %14135 = vpow2.f32 %v1609_v28  ;;  %v1577_v48 = vsub.f32 %v17520_v27, %v1559_v63 }
 0x39f   : > { %v15458_v54 = vpop.eup %14131  ;;  %v1607_v5 = vmul.f32 1.442695, %v1577_v48 }
 0x3a0   : > { %v1632_v10 = vsel %vm1514_vm3, %v15458_v54, 0.0 }
 0x3a1   : > { %14137 = vpow2.f32 %v1607_v5  ;;  %1633 = vadd.xlane.f32.xlu1 %v1632_v10 }
 0x3a2   : > { %v1550_v43 = vpop.xlane.xlu1 %1549 }
 0x3a3   : > { %v1574_v55 = vsub.f32 %v15189_v38, %v1550_v43  ;;  %v15463_v46 = vpop.eup %14133  ;;  %v15472_v38 = vpop.trf.xlu0 }
 0x3a4   : > { %v1629_v28 = vsel %vm1514_vm3, %v15463_v46, 0.0 }
 0x3a5   : > { %v1601_v2 = vmul.f32 1.442695, %v1574_v55  ;;  %1630 = vadd.xlane.f32.xlu1 %v1629_v28 }
 0x3a6   : > { %v1547_v0 = vpop.xlane.xlu1 %1546 }
 0x3a7   : > { %14139 = vpow2.f32 %v1601_v2  ;;  %v1573_v63 = vsub.f32 %v15286_v17, %v1547_v0  ;;  %v15468_v48 = vpop.eup %14135  ;;  %v15480_v17 = vpop.trf.xlu0 }
 0x3a8   : > { %v1656_v3 = vsel %vm1514_vm3, %v15468_v48, 0.0 }
 0x3a9   : > { %v1599_v4 = vmul.f32 1.442695, %v1573_v63  ;;  %1657 = vadd.xlane.f32.xlu1 %v1656_v3 }
 0x3ab   : > { %14141 = vpow2.f32 %v1599_v4  ;;  %v15474_v34 = vpop.eup %14137 }
 0x3ac   : > { %v1653_v40 = vsel %vm1514_vm3, %v15474_v34, 0.0 }
 0x3ad   : > { %1654 = vadd.xlane.f32.xlu1 %v1653_v40  ;;  %v17521_v40 = vcombine.low %v17516_v12, %v17517_v1 }
 0x3b1   : > { %v15478_v27 = vpop.eup %14139 }
 0x3b2   : > { %v1644_v5 = vsel %vm1514_vm3, %v15478_v27, 0.0 }
 0x3b3   : > { %1645 = vadd.xlane.f32.xlu1 %v1644_v5 }
 0x3b5   : > { %v15484_v43 = vpop.eup %14141  ;;  %v1613_v55 = vpop.xlane.xlu0 %1612 }
 0x3b6   : > { %v1641_v10 = vsel %vm1514_vm3, %v15484_v43, 0.0  ;;  %14143 = vrcp.f32 %v1613_v55 }
 0x3b7   : > { %1642 = vadd.xlane.f32.xlu1 %v1641_v10 }
 0x3b9   : > { %v1622_v28 = vpop.xlane.xlu0 %1621 }
 0x3bd   : > { %v1619_v63 = vpop.xlane.xlu0 %1618 }
 0x3c0   : > { %v14144_v2 = vpop.eup %14143 }
 0x3c1   : > { %v1675_v0 = vmul.f32 %v14144_v2, %v15324_v41 }
 0x3c3   : > { %13464 = vmatprep.mubr.msk.f32.mxu1 %vm1514_vm3, %v1675_v0  ;;  %v17522_v0 = vld [vmem:[#allocation21_spill] sm:$0xff] }
 0x3cc   : > { %v15498_v1 = vpop.trf.xlu1 }
 0x3e1   : > { %v1628_v4 = vpop.xlane.xlu0 %1627 }
 0x3e2   : > { %14145 = vrcp.f32 %v1628_v4  ;;  %v17523_v4 = vld [vmem:[#allocation23_spill] sm:$0xff] }
 0x3e5   : > { %v1625_v3 = vpop.xlane.xlu0 %1624 }
 0x3e6   : > { %14147 = vrcp.f32 %v1625_v3 }
 0x3e9   : > { %v1640_v5 = vpop.xlane.xlu0 %1639 }
 0x3ea   : > { %4419 = vxpose.xlu1.b32.start.end [1/1] (short) (narrow) %v17521_v40, 16  ;;  %14149 = vrcp.f32 %v1640_v5 }
 0x3ec   : > { %v14146_v55 = vpop.eup %14145 }
 0x3ed   : > { %v1637_v10 = vpop.xlane.xlu0 %1636  ;;  %v1680_v2 = vmul.f32 %v14146_v55, %v15367_v57  ;;  %v15504_v57 = vpop.trf.xlu1 }
 0x3ee   : > { %14151 = vrcp.f32 %v1637_v10 }
 0x3f0   : > { %v14148_v49 = vpop.eup %14147 }
 0x3f1   : > { %v1652_v26 = vpop.xlane.xlu0 %1651  ;;  %v1679_v41 = vmul.f32 %v14148_v49, %v15372_v60 }
 0x3f2   : > { %14153 = vrcp.f32 %v1652_v26  ;;  %v14251_v26 = vmov 0.0|0.0  }
 0x3f3   : > { %13478 = vmatprep.mubr.msk.f32.mxu0 %vm1514_vm3, %v1679_v41 }
 0x3f4   : > { %13479 = vmatmul.mubr.msk.f32.vlgmr.msra.gmra.mrb[18].mxu0 %vm1514_vm3, %v1680_v2  ;;  %v14150_v3 = vpop.eup %14149 }
 0x3f5   : > { %13951 = vmatpush3.bf16.msra.mxu0 %v17522_v0  ;;  %v1649_v12 = vpop.xlane.xlu0 %1648  ;;  %v1684_v49 = vmul.f32 %v14150_v3, %v15379_v8  ;;  %v14253_v8 = vmov 0.0  }
 0x3f6   : > { %13957 = vmatprep.subr.bf16.mxu0 %v17523_v4  ;;  %14155 = vrcp.f32 %v1649_v12  ;;  %v17525_v12 = vld [vmem:[#allocation20_spill] sm:$0xff] }
 0x3f7   : > { %14157 = vrcp.f32 %v1619_v63 }
 0x3f8   : > { %v14152_v40 = vpop.eup %14151 }
 0x3f9   : > { %v1683_v5 = vmul.f32 %v14152_v40, %v15389_v51 }
 0x3fb   : > { %13492 = vmatprep.mubr.msk.f32.mxu0 %vm1514_vm3, %v1683_v5 }
 0x3fc   : > { %13493 = vmatmul.mubr.msk.f32.vlgmr.msra.gmra.mrb[20].mxu0 %vm1514_vm3, %v1684_v49  ;;  %v14154_v60 = vpop.eup %14153 }
 0x3fd   : > { %13959 = vmatpush3.bf16.msra.mxu0 %v17523_v4  ;;  %v1688_v51 = vmul.f32 %v14154_v60, %v15411_v22  ;;  %v17526_v4 = vld [vmem:[#allocation22_spill] sm:$0xff] }
 0x3fe   : > { %13964 = vmatprep.subr.bf16.mxu0 %v14251_v26 }
 0x400   : > { %v14156_v10 = vpop.eup %14155 }
 0x401   : > { %v1687_v41 = vmul.f32 %v14156_v10, %v15415_v36  ;;  %v14158_v63 = vpop.eup %14157 }
 0x402   : > { %v1677_v0 = vmul.f32 %v14158_v63, %v15338_v56 }
 0x403   : > { %13506 = vmatprep.mubr.msk.f32.mxu0 %vm1514_vm3, %v1687_v41  ;;  %v17527_v41 = vld [vmem:[#allocation24_spill] sm:$0xff] }
 0x404   : > { %v1616_v55 = vpop.xlane.xlu1 %1615  ;;  %13507 = vmatmul.mubr.msk.f32.vlgmr.msra.gmra.mrb[22].mxu0 %vm1514_vm3, %v1688_v51 }
 0x405   : > { %14159 = vrcp.f32 %v1616_v55  ;;  %13966 = vmatpush3.bf16.msra.mxu0 %v15220_v59  ;;  %13524 = vmatprep.mubr.msk.f32.mxu0 %vm14252_vm4, %v14253_v8 }
 0x406   : > { %14161 = vrcp.f32 %v1622_v28  ;;  %13967 = vmatprep.subr.bf16.mxu0 %v14251_v26  ;;  %v17524_v28 = vld [vmem:[#allocation19_spill] sm:$0xff] }
 0x40f   : > { %v14160_v2 = vpop.eup %14159 }
 0x410   : > { %v1676_v36 = vmul.f32 %v14160_v2, %v15439_v24  ;;  %v14162_v22 = vpop.eup %14161 }
 0x411   : > { %v1678_v59 = vmul.f32 %v14162_v22, %v15332_v47 }
 0x412   : > { %13465 = vmatmul.mubr.msk.f32.vlgmr.msra.gmra.mrb[14].mxu1 %vm1514_vm3, %v1676_v36 }
 0x413   : > { %13939 = vmatpush3.bf16.msra.mxu1 %v17524_v28  ;;  %13471 = vmatprep.mubr.msk.f32.mxu1 %vm1514_vm3, %v1677_v0  ;;  %v5299_v28 = vcombine.low %v15352_v16, %v15361_v62 }
 0x414   : > { %13945 = vmatprep.subr.bf16.mxu1 %v17525_v12 }
 0x416   : > { %13472 = vmatmul.mubr.msk.f32.vlgmr.msra.gmra.mrb[16].mxu1 %vm1514_vm3, %v1678_v59  ;;  %v5316_v59 = vcombine.high %v15241_v21, %v15302_v39 }
 0x417   : > { %13947 = vmatpush3.bf16.msra.mxu1 %v17525_v12  ;;  %v5300_v12 = vcombine.high %v15352_v16, %v15361_v62  ;;  %v4804_v16 = vcombine.high %v15317_v58, %v15322_v29 }
 0x418   : > { %13953 = vmatprep.subr.bf16.mxu1 %v17526_v4 }
 0x419   : > { %v5314_v62 = vrot.slane %v5300_v12, %v14632_v37 }
 0x42e   : > { %v1634_v24 = vpop.xlane.xlu1 %1633 }
 0x42f   : > { %14163 = vrcp.f32 %v1634_v24 }
 0x432   : > { %v1631_v3 = vpop.xlane.xlu1 %1630 }
 0x433   : > { %14165 = vrcp.f32 %v1631_v3 }
 0x436   : > { %v1658_v56 = vpop.xlane.xlu1 %1657 }
 0x439   : > { %v14164_v5 = vpop.eup %14163 }
 0x43a   : > { %v1655_v40 = vpop.xlane.xlu1 %1654  ;;  %v1682_v47 = vmul.f32 %v14164_v5, %v15458_v54 }
 0x43b   : > { %14167 = vrcp.f32 %v1655_v40  ;;  %v4772_v40 = vcombine.high %v15215_v14, %v15263_v53 }
 0x43d   : > { %v14166_v49 = vpop.eup %14165 }
 0x43e   : > { %v1681_v10 = vmul.f32 %v14166_v49, %v15463_v46  ;;  %v4756_v49 = vcombine.high %v15350_v35, %v15355_v13 }
 0x440   : > { %v1646_v60 = vpop.xlane.xlu1 %1645  ;;  %13485 = vmatprep.mubr.msk.f32.mxu1 %vm1514_vm3, %v1681_v10  ;;  %v4788_v10 = vcombine.high %v15364_v32, %v15376_v7 }
 0x441   : > { %13486 = vmatmul.mubr.msk.f32.vlgmr.msra.gmra.mrb[18].mxu1 %vm1514_vm3, %v1682_v47  ;;  %14169 = vrcp.f32 %v1646_v60 }
 0x442   : > { %13955 = vmatpush3.bf16.msra.mxu1 %v17526_v4 }
 0x443   : > { %13961 = vmatprep.subr.bf16.mxu1 %v17527_v41 }
 0x444   : > { %v1643_v55 = vpop.xlane.xlu1 %1642 }
 0x445   : > { %14171 = vrcp.f32 %v1643_v55  ;;  %v14168_v51 = vpop.eup %14167 }
 0x446   : > { %14173 = vrcp.f32 %v1658_v56  ;;  %v1689_v22 = vmul.f32 %v14168_v51, %v15474_v34  ;;  %v4771_v34 = vcombine.low %v15215_v14, %v15263_v53  ;;  %v4907_v14 = vcombine.low %v15330_v44, %v15342_v9 }
 0x447   : > { %v4891_v51 = vcombine.low %v15401_v25, %v15419_v18 }
 0x448   : > { %v4779_v4 = vrot.slane %v4771_v34, %v14632_v37 }
 0x44b   : > { %v14170_v63 = vpop.eup %14169 }
 0x44c   : > { %v1686_v54 = vmul.f32 %v14170_v63, %v15478_v27  ;;  %v4803_v27 = vcombine.low %v15317_v58, %v15322_v29  ;;  %v15587_v58 = vrot.slane %v4756_v49, %v14632_v37  ;;  %v4467_v63 = vpop.trf.xlu0 }
 0x44e   : > { %v4811_v24 = vrot.slane %v4803_v27, %v14632_v37 }
 0x44f   : > { %v14172_v2 = vpop.eup %14171 }
 0x450   : > { %v1685_v46 = vmul.f32 %v14172_v2, %v15484_v43  ;;  %v14174_v36 = vpop.eup %14173  ;;  %v4755_v43 = vcombine.low %v15350_v35, %v15355_v13  ;;  %v15582_v35 = vrot.slane %v4772_v40, %v14632_v37  ;;  %v4908_v13 = vcombine.high %v15330_v44, %v15342_v9 }
 0x451   : > { %v1690_v0 = vmul.f32 %v14174_v36, %v15468_v48  ;;  %v4787_v48 = vcombine.low %v15364_v32, %v15376_v7  ;;  %v4915_v9 = vrot.slane %v4907_v14, %v14632_v37 }
 0x452   : > { %13499 = vmatprep.mubr.msk.f32.mxu1 %vm1514_vm3, %v1685_v46  ;;  %v4763_v3 = vrot.slane %v4755_v43, %v14632_v37  ;;  %v4835_v34 = vcombine.low %v15587_v58, %v15582_v35  ;;  %v17528_v43 = vcombine.low %v15396_v15, %v15384_v45 }
 0x453   : > { %13500 = vmatmul.mubr.msk.f32.vlgmr.msra.gmra.mrb[20].mxu1 %vm1514_vm3, %v1686_v54  ;;  %v4795_v56 = vrot.slane %v4787_v48, %v14632_v37  ;;  %v15598_v54 = vrot.slane %v4788_v10, %v14632_v37 }
 0x454   : > { %13963 = vmatpush3.bf16.msra.mxu1 %v17527_v41  ;;  %13513 = vmatprep.mubr.msk.f32.mxu1 %vm1514_vm3, %v1689_v22  ;;  %v4819_v60 = vcombine.low %v4763_v3, %v4779_v4  ;;  %v4820_v53 = vcombine.high %v4763_v3, %v4779_v4  ;;  %v15590_v41 = vrot.slane %v4804_v16, %v14632_v37 }
 0x455   : > { %13970 = vmatprep.subr.bf16.mxu1 %v14251_v26  ;;  %v4851_v47 = vcombine.low %v4795_v56, %v4811_v24  ;;  %v4852_v55 = vcombine.high %v4795_v56, %v4811_v24  ;;  %v15622_v48 = vrot.slane %v17528_v43, %v14673_v50  ;;  %v4899_v4 = vrot.slane %v4891_v51, %v14632_v37 }
 0x456   : > { %v15595_v2 = vrot.slane %v4819_v60, %v14673_v50  ;;  %v15605_v36 = vrot.slane %v4820_v53, %v14673_v50  ;;  %v4939_v56 = vcombine.low %v15472_v38, %v4467_v63  ;;  %v4940_v43 = vcombine.high %v15472_v38, %v4467_v63 }
 0x457   : > { %13514 = vmatmul.mubr.msk.f32.vlgmr.msra.gmra.mrb[22].mxu1 %vm1514_vm3, %v1690_v0  ;;  %v15601_v44 = vrot.slane %v4851_v47, %v14673_v50  ;;  %v15608_v22 = vrot.slane %v4852_v55, %v14673_v50  ;;  %v15611_v0 = vrot.slane %v4908_v13, %v14632_v37  ;;  %v4955_v14 = vcombine.low %v4899_v4, %v4915_v9 }
 0x458   : > { %13972 = vmatpush3.bf16.msra.mxu1 %v15225_v61  ;;  %13535 = vmatprep.mubr.msk.f32.mxu1 %vm14252_vm4, %v14253_v8  ;;  %v5315_v61 = vcombine.low %v15241_v21, %v15302_v39  ;;  %v5307_v21 = vrot.slane %v5299_v28, %v14632_v37  ;;  %v5330_v39 = vrot.slane %v5316_v59, %v14632_v37 }
 0x459   : > { %13973 = vmatprep.subr.bf16.mxu1 %v14251_v26  ;;  %v17529_v59 = vcombine.high %v15396_v15, %v15384_v45  ;;  %v4883_v40 = vcombine.low %v15595_v2, %v15601_v44  ;;  %v17531_v15 = vcombine.high %v15399_v31, %v15387_v19  ;;  %v4884_v16 = vcombine.high %v15595_v2, %v15601_v44 }
 0x45a   : > { %v5323_v5 = vrot.slane %v5315_v61, %v14632_v37  ;;  %v5379_v7 = vcombine.low %v5314_v62, %v5330_v39  ;;  %v5380_v46 = vcombine.high %v5314_v62, %v5330_v39  ;;  %v4885_v62 = vcombine.low %v15605_v36, %v15608_v22 }
 0x45b   : > { %v15634_v12 = vrot.slane %v17529_v59, %v14673_v50  ;;  %v15655_v49 = vrot.slane %v17531_v15, %v14673_v50  ;;  %v4886_v10 = vcombine.high %v15605_v36, %v15608_v22  ;;  %v4947_v13 = vrot.slane %v4939_v56, %v14632_v37 }
 0x45c   : > { %v5363_v29 = vcombine.low %v5307_v21, %v5323_v5  ;;  %v5364_v32 = vcombine.high %v5307_v21, %v5323_v5  ;;  %v15628_v28 = vrot.slane %v5379_v7, %v14673_v50  ;;  %v15638_v24 = vrot.slane %v5380_v46, %v14673_v50  ;;  %v4468_v21 = vpop.trf.xlu0 }
 0x45d   : > { %v17530_v5 = vcombine.low %v15399_v31, %v15387_v19  ;;  %v4892_v31 = vcombine.high %v15401_v25, %v15419_v18  ;;  %v5484_v51 = vcombine.high %v15480_v17, %v4468_v21  ;;  %v4956_v44 = vcombine.high %v4899_v4, %v4915_v9 }
 0x45e   : > { %v15616_v27 = vrot.slane %v5363_v29, %v14673_v50  ;;  %v15625_v61 = vrot.slane %v5364_v32, %v14673_v50  ;;  %v5483_v29 = vcombine.low %v15480_v17, %v4468_v21  ;;  %v5433_v46 = vcombine.low %v15638_v24, %v15655_v49 }
 0x45f   : > { %v15649_v45 = vrot.slane %v17530_v5, %v14673_v50  ;;  %v5434_v15 = vcombine.high %v15638_v24, %v15655_v49  ;;  %v4963_v21 = vrot.slane %v4955_v14, %v14673_v50  ;;  %v5498_v63 = vrot.slane %v5484_v51, %v14632_v37 }
 0x460   : > { %v5427_v47 = vcombine.low %v15616_v27, %v15622_v48  ;;  %v5428_v19 = vcombine.high %v15616_v27, %v15622_v48  ;;  %v5429_v53 = vcombine.low %v15625_v61, %v15634_v12  ;;  %v5430_v55 = vcombine.high %v15625_v61, %v15634_v12 }
 0x461   : > { %v5431_v25 = vcombine.low %v15628_v28, %v15649_v45  ;;  %v5432_v18 = vcombine.high %v15628_v28, %v15649_v45  ;;  %v4843_v61 = vrot.slane %v4835_v34, %v14673_v50  ;;  %v17540_v12 = vcombine.low %v15598_v54, %v15590_v41 }
 0x462   : > { %v4836_v34 = vcombine.high %v15587_v58, %v15582_v35 }
 0x46a   : > { %v4435_v39 = vpop.trf.xlu1 }
 0x46b   : > { %v4923_v60 = vcombine.low %v15498_v1, %v4435_v39  ;;  %v4924_v32 = vcombine.high %v15498_v1, %v4435_v39  ;;  %v15687_v1 = vrot.slane %v4892_v31, %v14632_v37  ;;  %v5491_v39 = vrot.slane %v5483_v29, %v14632_v37 }
 0x46c   : > { %v4970_v31 = vrot.slane %v4956_v44, %v14673_v50  ;;  %v17532_v44 = vcombine.low %v15434_v30, %v15425_v42 }
 0x46d   : > { %v4931_v7 = vrot.slane %v4923_v60, %v14632_v37  ;;  %v15696_v9 = vrot.slane %v4924_v32, %v14632_v37  ;;  %v4971_v51 = vcombine.low %v15687_v1, %v15611_v0 }
 0x46e   : > { %v4436_v2 = vpop.trf.xlu1 }
 0x46f   : > { %v4987_v59 = vcombine.low %v4931_v7, %v4947_v13  ;;  %v4988_v56 = vcombine.high %v4931_v7, %v4947_v13  ;;  %v5467_v17 = vcombine.low %v15504_v57, %v4436_v2  ;;  %v5468_v5 = vcombine.high %v15504_v57, %v4436_v2 }
 0x470   : > { %v15705_v13 = vrot.slane %v4940_v43, %v14632_v37  ;;  %v5507_v43 = vrot.slane %v17532_v44, %v14673_v50  ;;  %v4979_v28 = vrot.slane %v4971_v51, %v14673_v50 }
 0x471   : > { %v4995_v38 = vrot.slane %v4987_v59, %v14673_v50  ;;  %v5002_v4 = vrot.slane %v4988_v56, %v14673_v50  ;;  %v5475_v60 = vrot.slane %v5467_v17, %v14632_v37  ;;  %v5482_v57 = vrot.slane %v5468_v5, %v14632_v37 }
 0x472   : > { %v5003_v59 = vcombine.low %v15696_v9, %v15705_v13  ;;  %v5004_v24 = vcombine.high %v15696_v9, %v15705_v13  ;;  %v17546_v13 = vld [vmem:[#allocation30_spill] sm:$0xff] }
 0x473   : > { %v5019_v14 = vcombine.low %v4963_v21, %v4995_v38  ;;  %v5020_v29 = vcombine.high %v4963_v21, %v4995_v38  ;;  %v5531_v7 = vcombine.low %v5475_v60, %v5491_v39  ;;  %v5532_v32 = vcombine.high %v5475_v60, %v5491_v39 }
 0x474   : > { %v5547_v2 = vcombine.low %v5482_v57, %v5498_v63  ;;  %v5548_v3 = vcombine.high %v5482_v57, %v5498_v63  ;;  %v5021_v39 = vcombine.low %v4970_v31, %v5002_v4  ;;  %v17533_v38 = vcombine.high %v15434_v30, %v15425_v42 }
 0x475   : > { %v13968_v56 = vpack.c.bf16 %v5019_v14, %v4883_v40  ;;  %v13974_v17 = vpack.c.bf16 %v5020_v29, %v4884_v16  ;;  %v5539_v5 = vrot.slane %v5531_v7, %v14673_v50  ;;  %v5546_v21 = vrot.slane %v5532_v32, %v14673_v50 }
 0x476   : > { %v5514_v63 = vrot.slane %v17533_v38, %v14673_v50  ;;  %v17534_v40 = vcombine.low %v15437_v23, %v15431_v52  ;;  %v5555_v60 = vrot.slane %v5547_v2, %v14673_v50  ;;  %v5562_v57 = vrot.slane %v5548_v3, %v14673_v50  ;;  %v17536_v2 = vld [vmem:[#allocation33_spill] sm:$0xff] }
 0x477   : > { %13969 = vmatpush3.bf16.msra.mxu0 %v13968_v56  ;;  %13975 = vmatpush3.bf16.msra.mxu1 %v13974_v17  ;;  %v5563_v14 = vcombine.low %v5507_v43, %v5539_v5  ;;  %v5564_v29 = vcombine.high %v5507_v43, %v5539_v5  ;;  %v17535_v30 = vcombine.high %v15437_v23, %v15431_v52  ;;  %v17537_v56 = vld [vmem:[#allocation35_spill] sm:$0xff]  ;;  %v17548_v38 = vld [vmem:[#allocation25_spill] sm:$0xff] }
 0x478   : > { %v5523_v16 = vrot.slane %v17534_v40, %v14673_v50  ;;  %13976 = vmatprep.subr.bf16.mxu0 %v14251_v26  ;;  %13982 = vmatprep.subr.bf16.mxu1 %v14251_v26  ;;  %v5011_v7 = vrot.slane %v5003_v59, %v14673_v50  ;;  %v5022_v32 = vcombine.high %v4970_v31, %v5002_v4  ;;  %v17549_v40 = vld [vmem:[#allocation39_spill] sm:$0xff] }
 0x479   : > { %v5530_v42 = vrot.slane %v17535_v30, %v14673_v50  ;;  %v5565_v44 = vcombine.low %v5514_v63, %v5546_v21  ;;  %v17538_v17 = vcombine.low %v17536_v2, %v17537_v56  ;;  %v17539_v3 = vcombine.high %v17536_v2, %v17537_v56 }
 0x47a   : > { %v13980_v43 = vpack.c.bf16 %v5021_v39, %v4885_v62  ;;  %v15748_v52 = vpack.c.bf16 %v5563_v14, %v5427_v47  ;;  %v15753_v23 = vpack.c.bf16 %v5564_v29, %v5428_v19  ;;  %v5566_v62 = vcombine.high %v5514_v63, %v5546_v21  ;;  %v17547_v39 = vld [vmem:[#allocation31_spill] sm:$0xff]  ;;  %v17553_v14 = vld [vmem:[#allocation44_spill] sm:$0xff] }
 0x47b   : > { %13525 = vmatmul.mubr.msk.f32.vlgmr.msra.gmra.mrb[24].mxu0 %vm849_vm1, %v17538_v17  ;;  %13536 = vmatmul.mubr.msk.f32.vlgmr.msra.gmra.mrb[24].mxu1 %vm849_vm1, %v17539_v3  ;;  %v15760_v4 = vpack.c.bf16 %v5565_v44, %v5429_v53  ;;  %v5567_v31 = vcombine.low %v5523_v16, %v5555_v60  ;;  %v5568_v47 = vcombine.high %v5523_v16, %v5555_v60  ;;  %v17550_v16 = vld [vmem:[#allocation37_spill] sm:$0xff]  ;;  %v17554_v29 = vld [vmem:[#allocation51_spill] sm:$0xff]  ;;  %v17555_v17 = vld [vmem:[#allocation40_spill] sm:$0xff] }
 0x47c   : > { %13978 = vmatpush3.bf16.msra.mxu0 %v15230_v33  ;;  %13984 = vmatpush3.bf16.msra.mxu1 %v15235_v11  ;;  %v5569_v59 = vcombine.low %v5530_v42, %v5562_v57  ;;  %v5570_v27 = vcombine.high %v5530_v42, %v5562_v57  ;;  %v13986_v33 = vpack.c.bf16 %v5022_v32, %v4886_v10  ;;  %v17556_v3 = vld [vmem:[#allocation38_spill] sm:$0xff] }
 0x47d   : > { %13979 = vmatprep.subr.bf16.mxu0 %v14251_v26  ;;  %13985 = vmatprep.subr.bf16.mxu1 %v14251_v26  ;;  %v15774_v11 = vpack.c.bf16 %v5566_v62, %v5430_v55  ;;  %v15779_v48 = vpack.c.bf16 %v5567_v31, %v5431_v25  ;;  %v15784_v36 = vpack.c.bf16 %v5568_v47, %v5432_v18  ;;  %v17541_v55 = vld [vmem:[#allocation34_spill] sm:$0xff]  ;;  %v17542_v25 = vld [vmem:[#allocation36_spill] sm:$0xff]  ;;  %v17560_v47 = vld [vmem:[#allocation53_spill] sm:$0xff] }
 0x47e   : > { %13546 = vmatprep.mubr.msk.f32.mxu0 %vm14252_vm4, %v14253_v8  ;;  %13557 = vmatprep.mubr.msk.f32.mxu1 %vm14252_vm4, %v14253_v8  ;;  %v15789_v22 = vpack.c.bf16 %v5569_v59, %v5433_v46  ;;  %v15791_v10 = vpack.c.bf16 %v5570_v27, %v5434_v15  ;;  %v4875_v19 = vrot.slane %v17540_v12, %v14673_v50  ;;  %v17559_v31 = vld [vmem:[#allocation52_spill] sm:$0xff]  ;;  %v17561_v27 = vld [vmem:[#allocation26_spill] sm:$0xff] }
 0x47f   : > { %v5023_v45 = vcombine.low %v4979_v28, %v5011_v7  ;;  %v5024_v49 = vcombine.high %v4979_v28, %v5011_v7  ;;  %v4868_v53 = vcombine.high %v15598_v54, %v15590_v41  ;;  %v17543_v18 = vcombine.low %v17541_v55, %v17542_v25 }
 0x480   : > { %13981 = vmatpush3.bf16.msra.mxu0 %v13980_v43  ;;  %13987 = vmatpush3.bf16.msra.mxu1 %v13986_v33  ;;  %v17544_v46 = vcombine.high %v17541_v55, %v17542_v25  ;;  %v4972_v15 = vcombine.high %v15687_v1, %v15611_v0  ;;  %v4887_v35 = vcombine.low %v4843_v61, %v4875_v19  ;;  %v17545_v1 = vld [vmem:[#allocation32_spill] sm:$0xff] }
 0x481   : > { %13988 = vmatprep.subr.bf16.mxu0 %v14251_v26  ;;  %13994 = vmatprep.subr.bf16.mxu1 %v14251_v26  ;;  %v4888_v58 = vcombine.high %v4843_v61, %v4875_v19  ;;  %v5018_v41 = vrot.slane %v5004_v24, %v14673_v50  ;;  %v2571_v51 = vcombine.low %v17546_v13, %v17545_v1  ;;  %v17562_v33 = vld [vmem:[#allocation28_spill] sm:$0xff] }
 0x482   : > { %v13992_v54 = vpack.c.bf16 %v5023_v45, %v4887_v35  ;;  %v4986_v0 = vrot.slane %v4972_v15, %v14673_v50  ;;  %v2555_v63 = vcombine.low %v17548_v38, %v17547_v39  ;;  %v17551_v60 = vcombine.low %v17549_v40, %v17550_v16 }
 0x483   : > { %13547 = vmatmul.mubr.msk.f32.vlgmr.msra.gmra.mrb[26].mxu0 %vm849_vm1, %v17543_v18  ;;  %13558 = vmatmul.mubr.msk.f32.vlgmr.msra.gmra.mrb[26].mxu1 %vm849_vm1, %v17544_v46  ;;  %v13998_v9 = vpack.c.bf16 %v5024_v49, %v4888_v58  ;;  %v17552_v57 = vcombine.high %v17549_v40, %v17550_v16  ;;  %v2579_v7 = vrot.slane %v2571_v51, %v14632_v37  ;;  %v17567_v58 = vld [vmem:[#allocation45_spill] sm:$0xff] }
 0x484   : > { %13990 = vmatpush3.bf16.msra.mxu0 %v15246_v6  ;;  %13996 = vmatpush3.bf16.msra.mxu1 %v15251_v20  ;;  %v4850_v6 = vrot.slane %v4836_v34, %v14673_v50  ;;  %v4882_v20 = vrot.slane %v4868_v53, %v14673_v50  ;;  %v5025_v5 = vcombine.low %v4986_v0, %v5018_v41  ;;  %v17564_v34 = vld [vmem:[#allocation54_spill] sm:$0xff]  ;;  %v17565_v53 = vld [vmem:[#allocation55_spill] sm:$0xff]  ;;  %v17573_v51 = vld [vmem:[#allocation57_spill] sm:$0xff] }
 0x485   : > { %13991 = vmatprep.subr.bf16.mxu0 %v14251_v26  ;;  %13997 = vmatprep.subr.bf16.mxu1 %v14251_v26  ;;  %v5026_v21 = vcombine.high %v4986_v0, %v5018_v41  ;;  %v2563_v2 = vrot.slane %v2555_v63, %v14632_v37  ;;  %v17557_v43 = vcombine.low %v17555_v17, %v17556_v3  ;;  %v17568_v41 = vld [vmem:[#allocation42_spill] sm:$0xff] }
 0x486   : > { %13568 = vmatprep.mubr.msk.f32.mxu0 %vm14252_vm4, %v14253_v8  ;;  %13579 = vmatprep.mubr.msk.f32.mxu1 %vm14252_vm4, %v14253_v8  ;;  %v4889_v30 = vcombine.low %v4850_v6, %v4882_v20  ;;  %v4890_v42 = vcombine.high %v4850_v6, %v4882_v20  ;;  %v17558_v62 = vcombine.high %v17555_v17, %v17556_v3 }
 0x487   : > { %v2619_v56 = vcombine.low %v2563_v2, %v2579_v7  ;;  %v17563_v61 = vcombine.low %v17561_v27, %v17562_v33  ;;  %v2572_v19 = vcombine.high %v17546_v13, %v17545_v1  ;;  %v2620_v28 = vcombine.high %v2563_v2, %v2579_v7  ;;  %v17572_v13 = vld [vmem:[#allocation56_spill] sm:$0xff]  ;;  %v15949_v2 = vld [vmem:[%s17291_s1] sm:$0xff] }
 0x488   : > { %13993 = vmatpush3.bf16.msra.mxu0 %v13992_v54  ;;  %13999 = vmatpush3.bf16.msra.mxu1 %v13998_v9  ;;  %v14004_v32 = vpack.c.bf16 %v5025_v5, %v4889_v30  ;;  %v14010_v44 = vpack.c.bf16 %v5026_v21, %v4890_v42  ;;  %v2556_v49 = vcombine.high %v17548_v38, %v17547_v39 }
 0x489   : > { %14000 = vmatprep.subr.bf16.mxu0 %v14251_v26  ;;  %14006 = vmatprep.subr.bf16.mxu1 %v14251_v26  ;;  %v2627_v59 = vrot.slane %v2619_v56, %v14673_v50  ;;  %v2595_v12 = vrot.slane %v17563_v61, %v14673_v50  ;;  %v17566_v55 = vcombine.high %v17561_v27, %v17562_v33 }
 0x48a   : > { %v2570_v18 = vrot.slane %v2556_v49, %v14632_v37 }
 0x48b   : > { %13569 = vmatmul.mubr.msk.f32.vlgmr.msra.gmra.mrb[28].mxu0 %vm849_vm1, %v17551_v60  ;;  %13580 = vmatmul.mubr.msk.f32.vlgmr.msra.gmra.mrb[28].mxu1 %vm849_vm1, %v17552_v57  ;;  %v2651_v24 = vcombine.low %v2595_v12, %v2627_v59  ;;  %v2652_v45 = vcombine.high %v2595_v12, %v2627_v59  ;;  %v2602_v25 = vrot.slane %v17566_v55, %v14673_v50 }
 0x48c   : > { %14002 = vmatpush3.bf16.msra.mxu0 %v17553_v14  ;;  %14008 = vmatpush3.bf16.msra.mxu1 %v17554_v29 }
 0x48d   : > { %14003 = vmatprep.subr.bf16.mxu0 %v14251_v26  ;;  %14009 = vmatprep.subr.bf16.mxu1 %v14251_v26 }
 0x48e   : > { %13590 = vmatprep.mubr.msk.f32.mxu0 %vm14252_vm4, %v14253_v8  ;;  %13601 = vmatprep.mubr.msk.f32.mxu1 %vm14252_vm4, %v14253_v8 }
 0x490   : > { %14005 = vmatpush3.bf16.msra.mxu0 %v14004_v32  ;;  %14011 = vmatpush3.bf16.msra.mxu1 %v14010_v44 }
 0x491   : > { %14012 = vmatprep.subr.bf16.mxu0 %v14251_v26  ;;  %14018 = vmatprep.subr.bf16.mxu1 %v14251_v26 }
 0x493   : > { %13591 = vmatmul.mubr.msk.f32.vlgmr.msra.gmra.mrb[30].mxu0 %vm849_vm1, %v17557_v43  ;;  %13602 = vmatmul.mubr.msk.f32.vlgmr.msra.gmra.mrb[30].mxu1 %vm849_vm1, %v17558_v62 }
 0x494   : > { %14014 = vmatpush3.bf16.msra.mxu0 %v17559_v31  ;;  %14020 = vmatpush3.bf16.msra.mxu1 %v17560_v47 }
 0x495   : > { %14015 = vmatprep.subr.bf16.mxu0 %v14251_v26  ;;  %14021 = vmatprep.subr.bf16.mxu1 %v14251_v26 }
 0x496   : > { %13612 = vmatprep.mubr.msk.f32.mxu0 %vm14252_vm4, %v14253_v8  ;;  %13623 = vmatprep.mubr.msk.f32.mxu1 %vm14252_vm4, %v14253_v8 }
 0x498   : > { %14017 = vmatpush3.bf16.msra.mxu0 %v15748_v52  ;;  %14023 = vmatpush3.bf16.msra.mxu1 %v15753_v23  ;;  %v2586_v52 = vrot.slane %v2572_v19, %v14632_v37  ;;  %v2634_v23 = vrot.slane %v2620_v28, %v14673_v50 }
 0x499   : > { %14024 = vmatprep.subr.bf16.mxu0 %v14251_v26  ;;  %14030 = vmatprep.subr.bf16.mxu1 %v14251_v26 }
 0x49a   : > { %v2635_v46 = vcombine.low %v2570_v18, %v2586_v52  ;;  %v2653_v15 = vcombine.low %v2602_v25, %v2634_v23  ;;  %v2654_v35 = vcombine.high %v2602_v25, %v2634_v23  ;;  %v2636_v20 = vcombine.high %v2570_v18, %v2586_v52 }
 0x49b   : > { %13613 = vmatmul.mubr.msk.f32.vlgmr.msra.gmra.mrb[32].mxu0 %vm849_vm1, %v2651_v24  ;;  %13624 = vmatmul.mubr.msk.f32.vlgmr.msra.gmra.mrb[32].mxu1 %vm849_vm1, %v2652_v45 }
 0x49c   : > { %14026 = vmatpush3.bf16.msra.mxu0 %v17564_v34  ;;  %14032 = vmatpush3.bf16.msra.mxu1 %v17565_v53  ;;  %v2643_v54 = vrot.slane %v2635_v46, %v14673_v50  ;;  %v2650_v5 = vrot.slane %v2636_v20, %v14673_v50 }
 0x49d   : > { %14027 = vmatprep.subr.bf16.mxu0 %v14251_v26  ;;  %14033 = vmatprep.subr.bf16.mxu1 %v14251_v26 }
 0x49e   : > { %13634 = vmatprep.mubr.msk.f32.mxu0 %vm14252_vm4, %v14253_v8  ;;  %13645 = vmatprep.mubr.msk.f32.mxu1 %vm14252_vm4, %v14253_v8 }
 0x4a0   : > { %14029 = vmatpush3.bf16.msra.mxu0 %v15760_v4  ;;  %14035 = vmatpush3.bf16.msra.mxu1 %v15774_v11  ;;  %v17569_v4 = vld [vmem:[#allocation27_spill] sm:$0xff]  ;;  %v17570_v11 = vld [vmem:[#allocation29_spill] sm:$0xff] }
 0x4a1   : > { %14036 = vmatprep.subr.bf16.mxu0 %v14251_v26  ;;  %14042 = vmatprep.subr.bf16.mxu1 %v14251_v26  ;;  %v17571_v9 = vcombine.low %v17569_v4, %v17570_v11 }
 0x4a3   : > { %13635 = vmatmul.mubr.msk.f32.vlgmr.msra.gmra.mrb[34].mxu0 %vm849_vm1, %v2653_v15  ;;  %13646 = vmatmul.mubr.msk.f32.vlgmr.msra.gmra.mrb[34].mxu1 %vm849_vm1, %v2654_v35  ;;  %v2611_v6 = vrot.slane %v17571_v9, %v14673_v50 }
 0x4a4   : > { %14038 = vmatpush3.bf16.msra.mxu0 %v17567_v58  ;;  %14044 = vmatpush3.bf16.msra.mxu1 %v17568_v41 }
 0x4a5   : > { %14039 = vmatprep.subr.bf16.mxu0 %v14251_v26  ;;  %14045 = vmatprep.subr.bf16.mxu1 %v14251_v26  ;;  %v2655_v0 = vcombine.low %v2611_v6, %v2643_v54  ;;  %v2656_v1 = vcombine.high %v2611_v6, %v2643_v54 }
 0x4a6   : > { %13656 = vmatprep.mubr.msk.f32.mxu0 %vm14252_vm4, %v14253_v8  ;;  %13667 = vmatprep.mubr.msk.f32.mxu1 %vm14252_vm4, %v14253_v8 }
 0x4a8   : > { %14041 = vmatpush3.bf16.msra.mxu0 %v15779_v48  ;;  %14047 = vmatpush3.bf16.msra.mxu1 %v15784_v36  ;;  %v17574_v48 = vcombine.high %v17569_v4, %v17570_v11 }
 0x4a9   : > { %14048 = vmatprep.subr.bf16.mxu0 %v14251_v26  ;;  %14054 = vmatprep.subr.bf16.mxu1 %v14251_v26 }
 0x4aa   : > { %v2618_v36 = vrot.slane %v17574_v48, %v14673_v50 }
 0x4ab   : > { %13657 = vmatmul.mubr.msk.f32.vlgmr.msra.gmra.mrb[36].mxu0 %vm849_vm1, %v2655_v0  ;;  %13668 = vmatmul.mubr.msk.f32.vlgmr.msra.gmra.mrb[36].mxu1 %vm849_vm1, %v2656_v1 }
 0x4ac   : > { %14050 = vmatpush3.bf16.msra.mxu0 %v17572_v13  ;;  %14056 = vmatpush3.bf16.msra.mxu1 %v17573_v51  ;;  %v2657_v21 = vcombine.low %v2618_v36, %v2650_v5  ;;  %v2658_v39 = vcombine.high %v2618_v36, %v2650_v5 }
 0x4ad   : > { %14051 = vmatprep.subr.bf16.mxu0 %v14251_v26  ;;  %14057 = vmatprep.subr.bf16.mxu1 %v14251_v26 }
 0x4ae   : > { %13678 = vmatprep.mubr.msk.f32.mxu0 %vm14252_vm4, %v14253_v8  ;;  %13689 = vmatprep.mubr.msk.f32.mxu1 %vm14252_vm4, %v14253_v8 }
 0x4b0   : > { %14053 = vmatpush3.bf16.msra.mxu0 %v15789_v22  ;;  %14059 = vmatpush3.bf16.msra.mxu1 %v15791_v10 }
 0x4b3   : > { %13679 = vmatmul.mubr.msk.f32.vlgmr.msra.gmra.mrb[38].mxu0 %vm849_vm1, %v2657_v21  ;;  %13690 = vmatmul.mubr.msk.f32.vlgmr.msra.gmra.mrb[38].mxu1 %vm849_vm1, %v2658_v39 }
 0x4c7   : > { %v13480_v26 = vpop.f32.mrb[18].mxu0 }
 0x4c8   : > { %v1925_v38 = vpop.f32.mrb[19].mxu0 }
 0x4cf   : > { %v13494_v63 = vpop.f32.mrb[20].mxu0 }
 0x4d0   : > { %v2087_v40 = vpop.f32.mrb[21].mxu0 }
 0x4d7   : > { %v13508_v8 = vpop.f32.mrb[22].mxu0 }
 0x4d8   : > { %v2249_v16 = vpop.f32.mrb[23].mxu0 }
 0x4e5   : > { %v13466_v60 = vpop.f32.mrb[14].mxu1 }
 0x4e6   : > { %v1763_v57 = vpop.f32.mrb[15].mxu1 }
 0x4e7   : > { %6949 = vxpose.xlu1.b32.start [1/2] (short) (narrow) %v1763_v57, 32 }
 0x4e9   : > { %v13473_v14 = vpop.f32.mrb[16].mxu1 }
 0x4ea   : > { %v1844_v29 = vpop.f32.mrb[17].mxu1 }
 0x4eb   : > { %6950 = vxpose.xlu1.b32.end [2/2] (short) (narrow) %v13466_v60, 32  ;;  %6981 = vxpose.xlu0.b32.start [1/2] (short) (narrow) %v1844_v29, 32 }
 0x4ef   : > { %6982 = vxpose.xlu0.b32.end [2/2] (short) (narrow) %v13473_v14, 32 }
 0x4f8   : > { %7013 = vxpose.xlu0.b32.start [1/2] (short) (narrow) %v1925_v38, 32 }
 0x4fc   : > { %7014 = vxpose.xlu0.b32.end [2/2] (short) (narrow) %v13480_v26, 32 }
 0x505   : > { %7077 = vxpose.xlu0.b32.start [1/2] (short) (narrow) %v2087_v40, 32 }
 0x509   : > { %7078 = vxpose.xlu0.b32.end [2/2] (short) (narrow) %v13494_v63, 32 }
 0x512   : > { %7141 = vxpose.xlu0.b32.start [1/2] (short) (narrow) %v2249_v16, 32 }
 0x514   : > { %v13487_v22 = vpop.f32.mrb[18].mxu1 }
 0x515   : > { %v2006_v10 = vpop.f32.mrb[19].mxu1 }
 0x516   : > { %7142 = vxpose.xlu0.b32.end [2/2] (short) (narrow) %v13508_v8, 32  ;;  %7045 = vxpose.xlu1.b32.start [1/2] (short) (narrow) %v2006_v10, 32 }
 0x51a   : > { %7046 = vxpose.xlu1.b32.end [2/2] (short) (narrow) %v13487_v22, 32 }
 0x526   : > { %v13501_v30 = vpop.f32.mrb[20].mxu1 }
 0x527   : > { %v2168_v42 = vpop.f32.mrb[21].mxu1 }
 0x528   : > { %7109 = vxpose.xlu1.b32.start [1/2] (short) (narrow) %v2168_v42, 32 }
 0x52a   : > { %v13515_v7 = vpop.f32.mrb[22].mxu1 }
 0x52b   : > { %v2330_v32 = vpop.f32.mrb[23].mxu1 }
 0x52c   : > { %7110 = vxpose.xlu1.b32.end [2/2] (short) (narrow) %v13501_v30, 32 }
 0x535   : > { %7173 = vxpose.xlu1.b32.start [1/2] (short) (narrow) %v2330_v32, 32 }
 0x539   : > { %7174 = vxpose.xlu1.b32.end [2/2] (short) (narrow) %v13515_v7, 32 }
 0x54e   : > { %v5640_v44 = vpop.f32.mrb[24].mxu0  ;;  %v5713_v56 = vpop.f32.mrb[24].mxu1 }
 0x54f   : > { %v6740_v17 = vmul.f32 0.044194173, %v5713_v56  ;;  %v13526_v3 = vpop.f32.mrb[25].mxu0  ;;  %v13537_v43 = vpop.f32.mrb[25].mxu1  ;;  %v6739_v45 = vmul.f32 0.044194173, %v5640_v44 }
 0x551   : > { %v15952_v62 = vadd.f32 %v15949_v2, %v6740_v17  ;;  %v15962_v53 = vadd.f32 %v15949_v2, %v6739_v45 }
 0x553   : > { %v6776_v31 = vsel %vm6772_vm5, %v15952_v62, -inf  ;;  %v6773_v58 = vsel %vm6772_vm5, %v15962_v53, -inf }
 0x554   : > { %6777 = vmax.xlane.f32.xlu0 %v6776_v31 }
 0x556   : > { %v5786_v47 = vpop.f32.mrb[26].mxu0  ;;  %v5859_v59 = vpop.f32.mrb[26].mxu1 }
 0x557   : > { %v13548_v27 = vpop.f32.mrb[27].mxu0  ;;  %v13559_v33 = vpop.f32.mrb[27].mxu1  ;;  %v6742_v52 = vmul.f32 0.044194173, %v5859_v59  ;;  %v6741_v15 = vmul.f32 0.044194173, %v5786_v47 }
 0x559   : > { %v15965_v35 = vadd.f32 %v15949_v2, %v6742_v52  ;;  %v15975_v4 = vadd.f32 %v15949_v2, %v6741_v15 }
 0x55b   : > { %v6782_v9 = vsel %vm6772_vm5, %v15965_v35, -inf  ;;  %v6779_v36 = vsel %vm6772_vm5, %v15975_v4, -inf }
 0x55e   : > { %v5932_v61 = vpop.f32.mrb[28].mxu0  ;;  %v6005_v12 = vpop.f32.mrb[28].mxu1 }
 0x55f   : > { %v6744_v19 = vmul.f32 0.044194173, %v6005_v12  ;;  %v13570_v28 = vpop.f32.mrb[29].mxu0  ;;  %v13581_v24 = vpop.f32.mrb[29].mxu1  ;;  %v6743_v11 = vmul.f32 0.044194173, %v5932_v61 }
 0x561   : > { %v15957_v49 = vadd.f32 %v15949_v2, %v6744_v19  ;;  %v15982_v5 = vadd.f32 %v15949_v2, %v6743_v11 }
 0x563   : > { %v6788_v34 = vsel %vm6772_vm5, %v15957_v49, -inf  ;;  %v6785_v40 = vsel %vm6772_vm5, %v15982_v5, -inf }
 0x564   : > { %6789 = vmax.xlane.f32.xlu0 %v6788_v34 }
 0x566   : > { %v6078_v23 = vpop.f32.mrb[30].mxu0  ;;  %v6151_v55 = vpop.f32.mrb[30].mxu1 }
 0x567   : > { %v6746_v25 = vmul.f32 0.044194173, %v6151_v55  ;;  %v13592_v18 = vpop.f32.mrb[31].mxu0  ;;  %v13603_v46 = vpop.f32.mrb[31].mxu1  ;;  %v6745_v48 = vmul.f32 0.044194173, %v6078_v23 }
 0x568   : > { %6774 = vmax.xlane.f32.xlu1 %v6773_v58  ;;  %v16017_v17 = vpop.trf.xlu1 }
 0x569   : > { %v15970_v41 = vadd.f32 %v15949_v2, %v6746_v25  ;;  %v15994_v38 = vadd.f32 %v15949_v2, %v6745_v48 }
 0x56b   : > { %v6794_v54 = vsel %vm6772_vm5, %v15970_v41, -inf  ;;  %v15979_v6 = vpop.trf.xlu0  ;;  %v6791_v30 = vsel %vm6772_vm5, %v15994_v38, -inf }
 0x56c   : > { %6795 = vmax.xlane.f32.xlu0 %v6794_v54  ;;  %6783 = vmax.xlane.f32.xlu1 %v6782_v9  ;;  %v16033_v45 = vpop.trf.xlu1 }
 0x56e   : > { %v6224_v20 = vpop.f32.mrb[32].mxu0  ;;  %v6297_v0 = vpop.f32.mrb[32].mxu1 }
 0x56f   : > { %v6748_v1 = vmul.f32 0.044194173, %v6297_v0  ;;  %v13614_v13 = vpop.f32.mrb[33].mxu0  ;;  %v13625_v51 = vpop.f32.mrb[33].mxu1  ;;  %v6747_v63 = vmul.f32 0.044194173, %v6224_v20 }
 0x570   : > { %v15986_v21 = vpop.trf.xlu0  ;;  %6780 = vmax.xlane.f32.xlu1 %v6779_v36  ;;  %v6967_v20 = vpop.trf.xlu1 }
 0x571   : > { %v15989_v39 = vadd.f32 %v15949_v2, %v6748_v1  ;;  %v16001_v22 = vadd.f32 %v15949_v2, %v6747_v63 }
 0x573   : > { %v6800_v26 = vsel %vm6772_vm5, %v15989_v39, -inf  ;;  %v6797_v56 = vsel %vm6772_vm5, %v16001_v22, -inf }
 0x574   : > { %6801 = vmax.xlane.f32.xlu0 %v6800_v26  ;;  %v15998_v8 = vpop.trf.xlu0  ;;  %6786 = vmax.xlane.f32.xlu1 %v6785_v40  ;;  %v16049_v1 = vpop.trf.xlu1 }
 0x576   : > { %v6370_v16 = vpop.f32.mrb[34].mxu0  ;;  %v6443_v60 = vpop.f32.mrb[34].mxu1 }
 0x577   : > { %v6750_v57 = vmul.f32 0.044194173, %v6443_v60  ;;  %v13636_v14 = vpop.f32.mrb[35].mxu0  ;;  %v13647_v29 = vpop.f32.mrb[35].mxu1  ;;  %v6749_v10 = vmul.f32 0.044194173, %v6370_v16 }
 0x578   : > { %v16005_v42 = vpop.trf.xlu0  ;;  %6792 = vmax.xlane.f32.xlu1 %v6791_v30 }
 0x579   : > { %v16008_v7 = vadd.f32 %v15949_v2, %v6750_v57  ;;  %v16013_v44 = vadd.f32 %v15949_v2, %v6749_v10 }
 0x57b   : > { %v6806_v32 = vsel %vm6772_vm5, %v16008_v7, -inf  ;;  %v6803_v61 = vsel %vm6772_vm5, %v16013_v44, -inf }
 0x57c   : > { %6807 = vmax.xlane.f32.xlu0 %v6806_v32  ;;  %6798 = vmax.xlane.f32.xlu1 %v6797_v56  ;;  %v16019_v3 = vpop.trf.xlu0 }
 0x57e   : > { %v6516_v43 = vpop.f32.mrb[36].mxu0  ;;  %v6589_v31 = vpop.f32.mrb[36].mxu1 }
 0x57f   : > { %v6751_v47 = vmul.f32 0.044194173, %v6516_v43  ;;  %v6752_v59 = vmul.f32 0.044194173, %v6589_v31  ;;  %v13658_v27 = vpop.f32.mrb[37].mxu0  ;;  %v13669_v33 = vpop.f32.mrb[37].mxu1 }
 0x580   : > { %6804 = vmax.xlane.f32.xlu1 %v6803_v61  ;;  %v16035_v34 = vpop.trf.xlu0 }
 0x581   : > { %v16024_v12 = vadd.f32 %v15949_v2, %v6751_v47  ;;  %v16027_v19 = vadd.f32 %v15949_v2, %v6752_v59 }
 0x583   : > { %v6812_v28 = vsel %vm6772_vm5, %v16027_v19, -inf  ;;  %v6809_v24 = vsel %vm6772_vm5, %v16024_v12, -inf }
 0x584   : > { %6813 = vmax.xlane.f32.xlu0 %v6812_v28  ;;  %6810 = vmax.xlane.f32.xlu1 %v6809_v24  ;;  %v7031_v9 = vpop.trf.xlu0 }
 0x585   : > { %v7477_v36 = vcombine.low %v6967_v20, %v7031_v9  ;;  %v7478_v26 = vcombine.high %v6967_v20, %v7031_v9 }
 0x586   : > { %v6662_v52 = vpop.f32.mrb[38].mxu0  ;;  %v6735_v23 = vpop.f32.mrb[38].mxu1 }
 0x587   : > { %v6753_v55 = vmul.f32 0.044194173, %v6662_v52  ;;  %v6754_v25 = vmul.f32 0.044194173, %v6735_v23  ;;  %v13680_v18 = vpop.f32.mrb[39].mxu0  ;;  %v13691_v46 = vpop.f32.mrb[39].mxu1  ;;  %v16058_v60 = vrot.slane %v7477_v36, %v14632_v37  ;;  %v16061_v57 = vrot.slane %v7478_v26, %v14632_v37 }
 0x588   : > { %v16047_v0 = vpop.trf.xlu0  ;;  %v7205_v18 = vcombine.low %v16017_v17, %v16019_v3 }
 0x589   : > { %v16038_v15 = vadd.f32 %v15949_v2, %v6753_v55  ;;  %v16041_v58 = vadd.f32 %v15949_v2, %v6754_v25  ;;  %v7614_v30 = vcombine.high %v16049_v1, %v16047_v0 }
 0x58a   : > { %v7213_v20 = vrot.slane %v7205_v18, %v14632_v37 }
 0x58b   : > { %17575 = vst [vmem:[#allocation41_spill] sm:$0xff] %v16038_v15  ;;  %17576 = vst [vmem:[#allocation48_spill] sm:$0xff] %v16041_v58  ;;  %v6818_v54 = vsel %vm6772_vm5, %v16041_v58, -inf  ;;  %v6815_v11 = vsel %vm6772_vm5, %v16038_v15, -inf  ;;  %v16086_v59 = vrot.slane %v7614_v30, %v14632_v37 }
 0x58c   : > { %6819 = vmax.xlane.f32.xlu0 %v6818_v54  ;;  %6816 = vmax.xlane.f32.xlu1 %v6815_v11  ;;  %v7093_v13 = vpop.trf.xlu0 }
 0x590   : > { %v16053_v2 = vpop.trf.xlu0 }
 0x594   : > { %v16069_v10 = vpop.trf.xlu0 }
 0x596   : > { %v7061_v51 = vpop.trf.xlu1 }
 0x597   : > { %v7221_v55 = vcombine.low %v15979_v6, %v7061_v51  ;;  %v7222_v31 = vcombine.high %v15979_v6, %v7061_v51 }
 0x598   : > { %v16091_v61 = vpop.trf.xlu0 }
 0x599   : > { %v7229_v54 = vrot.slane %v7221_v55, %v14632_v37 }
 0x59a   : > { %v16051_v48 = vpop.trf.xlu1 }
 0x59b   : > { %v7269_v26 = vcombine.low %v7213_v20, %v7229_v54  ;;  %v7270_v15 = vcombine.high %v7213_v20, %v7229_v54 }
 0x59c   : > { %v7157_v52 = vpop.trf.xlu0 }
 0x59d   : > { %v7237_v11 = vcombine.low %v7093_v13, %v7157_v52  ;;  %v7238_v43 = vcombine.high %v7093_v13, %v7157_v52  ;;  %v7277_v18 = vrot.slane %v7269_v26, %v14673_v50 }
 0x59e   : > { %v7063_v63 = vpop.trf.xlu1 }
 0x59f   : > { %v7493_v40 = vcombine.low %v15998_v8, %v7063_v63  ;;  %v7494_v16 = vcombine.high %v15998_v8, %v7063_v63  ;;  %v7245_v63 = vrot.slane %v7237_v11, %v14632_v37  ;;  %v7206_v8 = vcombine.high %v16017_v17, %v16019_v3 }
 0x5a0   : > { %v16104_v46 = vpop.trf.xlu0 }
 0x5a1   : > { %v16064_v14 = vrot.slane %v7493_v40, %v14632_v37  ;;  %v16067_v29 = vrot.slane %v7494_v16, %v14632_v37  ;;  %v7220_v17 = vrot.slane %v7206_v8, %v14632_v37  ;;  %v7357_v8 = vcombine.low %v15986_v21, %v16051_v48 }
 0x5a2   : > { %v16073_v32 = vpop.trf.xlu1 }
 0x5a3   : > { %v7630_v47 = vcombine.high %v16005_v42, %v16073_v32 }
 0x5a4   : > { %v16109_v40 = vpop.trf.xlu0 }
 0x5a5   : > { %v16089_v27 = vrot.slane %v7630_v47, %v14632_v37 }
 0x5a8   : > { %v7125_v33 = vpop.trf.xlu1  ;;  %v16124_v6 = vpop.trf.xlu0 }
 0x5ac   : > { %v16095_v24 = vpop.trf.xlu1 }
 0x5b0   : > { %v16097_v23 = vpop.trf.xlu1 }
 0x5b4   : > { %v16100_v25 = vpop.trf.xlu1 }
 0x5b8   : > { %v7189_v9 = vpop.trf.xlu1 }
 0x5b9   : > { %v7253_v36 = vcombine.low %v7125_v33, %v7189_v9  ;;  %v7254_v16 = vcombine.high %v7125_v33, %v7189_v9  ;;  %v7236_v9 = vrot.slane %v7222_v31, %v14632_v37  ;;  %v7284_v31 = vrot.slane %v7270_v15, %v14673_v50 }
 0x5bb   : > { %v7261_v30 = vrot.slane %v7253_v36, %v14632_v37  ;;  %v7268_v28 = vrot.slane %v7254_v16, %v14632_v37  ;;  %v7252_v36 = vrot.slane %v7238_v43, %v14632_v37  ;;  %v7285_v20 = vcombine.low %v7220_v17, %v7236_v9 }
 0x5bc   : > { %v16112_v47 = vpop.trf.xlu1 }
 0x5bd   : > { %v7301_v56 = vcombine.low %v7245_v63, %v7261_v30  ;;  %v7302_v55 = vcombine.high %v7245_v63, %v7261_v30  ;;  %v7317_v3 = vcombine.low %v7252_v36, %v7268_v28  ;;  %v7389_v43 = vcombine.low %v16095_v24, %v16112_v47 }
 0x5be   : > { %v7373_v30 = vcombine.low %v16053_v2, %v16104_v46  ;;  %v7318_v15 = vcombine.high %v7252_v36, %v7268_v28 }
 0x5bf   : > { %v7309_v11 = vrot.slane %v7301_v56, %v14673_v50  ;;  %v7316_v52 = vrot.slane %v7302_v55, %v14673_v50  ;;  %v7646_v56 = vcombine.high %v16091_v61, %v16124_v6  ;;  %v7325_v55 = vrot.slane %v7317_v3, %v14673_v50 }
 0x5c0   : > { %v16120_v33 = vpop.trf.xlu1  ;;  %v7381_v28 = vrot.slane %v7373_v30, %v14632_v37 }
 0x5c1   : > { %v7334_v13 = vcombine.high %v7277_v18, %v7309_v11  ;;  %v7333_v51 = vcombine.low %v7277_v18, %v7309_v11  ;;  %v7335_v63 = vcombine.low %v7284_v31, %v7316_v52  ;;  %v7336_v16 = vcombine.high %v7284_v31, %v7316_v52 }
 0x5c2   : > { %v16143_v18 = vrot.slane %v7646_v56, %v14632_v37  ;;  %v7293_v52 = vrot.slane %v7285_v20, %v14673_v50  ;;  %v7286_v31 = vcombine.high %v7220_v17, %v7236_v9  ;;  %v7365_v56 = vrot.slane %v7357_v8, %v14632_v37 }
 0x5c3   : > { %7781 = vxpose.xlu0.b32.start.end [1/1] (short) (narrow) %v7334_v13, 16  ;;  %7749 = vxpose.xlu1.b32.start.end [1/1] (short) (narrow) %v7333_v51, 16  ;;  %v7341_v13 = vcombine.low %v16033_v45, %v16035_v34  ;;  %v7397_v51 = vrot.slane %v7389_v43, %v14632_v37  ;;  %v7390_v9 = vcombine.high %v16095_v24, %v16112_v47 }
 0x5c4   : > { %v16130_v54 = vpop.trf.xlu1  ;;  %v7337_v36 = vcombine.low %v7293_v52, %v7325_v55  ;;  %v7300_v43 = vrot.slane %v7286_v31, %v14673_v50  ;;  %v7358_v17 = vcombine.high %v15986_v21, %v16051_v48  ;;  %v7342_v24 = vcombine.high %v16033_v45, %v16035_v34 }
 0x5c5   : > { %v7662_v26 = vcombine.high %v16100_v25, %v16130_v54  ;;  %v7437_v58 = vcombine.low %v7381_v28, %v7397_v51  ;;  %v7438_v21 = vcombine.high %v7381_v28, %v7397_v51  ;;  %v7404_v48 = vrot.slane %v7390_v9, %v14632_v37 }
 0x5c6   : > { %v7356_v51 = vrot.slane %v7342_v24, %v14632_v37  ;;  %v7509_v9 = vcombine.low %v16069_v10, %v16109_v40 }
 0x5c7   : > { %v16146_v11 = vrot.slane %v7662_v26, %v14632_v37  ;;  %v7338_v26 = vcombine.high %v7293_v52, %v7325_v55  ;;  %v7374_v55 = vcombine.high %v16053_v2, %v16104_v46  ;;  %v7452_v34 = vrot.slane %v7438_v21, %v14673_v50 }
 0x5c8   : > { %7813 = vxpose.xlu0.b32.start.end [1/1] (short) (narrow) %v7335_v63, 16  ;;  %7845 = vxpose.xlu1.b32.start.end [1/1] (short) (narrow) %v7336_v16, 16  ;;  %v7332_v63 = vrot.slane %v7318_v15, %v14673_v50  ;;  %v7349_v16 = vrot.slane %v7341_v13, %v14632_v37  ;;  %v7445_v15 = vrot.slane %v7437_v58, %v14673_v50 }
 0x5c9   : > { %v7726_v3 = vcombine.high %v16143_v18, %v16146_v11  ;;  %v17577_v13 = vcombine.high %v16086_v59, %v16089_v27 }
 0x5ca   : > { %v7405_v20 = vcombine.low %v7349_v16, %v7365_v56  ;;  %v7339_v8 = vcombine.low %v7300_v43, %v7332_v63  ;;  %v7340_v30 = vcombine.high %v7300_v43, %v7332_v63  ;;  %v7406_v47 = vcombine.high %v7349_v16, %v7365_v56 }
 0x5cb   : > { %v16170_v52 = vrot.slane %v17577_v13, %v14673_v50  ;;  %v16173_v31 = vrot.slane %v7726_v3, %v14673_v50  ;;  %v7372_v3 = vrot.slane %v7358_v17, %v14632_v37  ;;  %v7517_v13 = vrot.slane %v7509_v9, %v14632_v37 }
 0x5cc   : > { %v7413_v2 = vrot.slane %v7405_v20, %v14673_v50  ;;  %v7420_v63 = vrot.slane %v7406_v47, %v14673_v50  ;;  %v7525_v20 = vcombine.low %v16097_v23, %v16120_v33  ;;  %v7661_v9 = vcombine.low %v16100_v25, %v16130_v54 }
 0x5cd   : > { %7877 = vxpose.xlu0.b32.start.end [1/1] (short) (narrow) %v7337_v36, 16  ;;  %7909 = vxpose.xlu1.b32.start.end [1/1] (short) (narrow) %v7338_v26, 16  ;;  %v7747_v58 = vcombine.low %v16170_v52, %v16173_v31  ;;  %v7748_v46 = vcombine.high %v16170_v52, %v16173_v31  ;;  %v7388_v36 = vrot.slane %v7374_v55, %v14632_v37 }
 0x5ce   : > { %v7470_v26 = vcombine.high %v7413_v2, %v7445_v15  ;;  %v7469_v45 = vcombine.low %v7413_v2, %v7445_v15  ;;  %v7421_v43 = vcombine.low %v7356_v51, %v7372_v3  ;;  %v7472_v56 = vcombine.high %v7420_v63, %v7452_v34 }
 0x5cf   : > { %v7453_v28 = vcombine.low %v7388_v36, %v7404_v48  ;;  %v7471_v16 = vcombine.low %v7420_v63, %v7452_v34  ;;  %v7422_v15 = vcombine.high %v7356_v51, %v7372_v3  ;;  %v7510_v34 = vcombine.high %v16069_v10, %v16109_v40 }
 0x5d0   : > { %v7429_v55 = vrot.slane %v7421_v43, %v14673_v50  ;;  %v17578_v63 = vcombine.low %v16058_v60, %v16064_v14  ;;  %v17579_v10 = vcombine.high %v16058_v60, %v16064_v14  ;;  %v7613_v60 = vcombine.low %v16049_v1, %v16047_v0 }
 0x5d1   : > { %v7461_v17 = vrot.slane %v7453_v28, %v14673_v50  ;;  %v7669_v14 = vrot.slane %v7661_v9, %v14632_v37  ;;  %v17580_v25 = vcombine.low %v16061_v57, %v16067_v29  ;;  %v17581_v0 = vcombine.high %v16061_v57, %v16067_v29 }
 0x5d2   : > { %7941 = vxpose.xlu0.b32.start.end [1/1] (short) (narrow) %v7339_v8, 16  ;;  %7973 = vxpose.xlu1.b32.start.end [1/1] (short) (narrow) %v7340_v30, 16  ;;  %v7454_v8 = vcombine.high %v7388_v36, %v7404_v48  ;;  %v7533_v30 = vrot.slane %v7525_v20, %v14632_v37  ;;  %v7526_v48 = vcombine.high %v16097_v23, %v16120_v33 }
 0x5d3   : > { %v7474_v24 = vcombine.high %v7429_v55, %v7461_v17  ;;  %v7473_v21 = vcombine.low %v7429_v55, %v7461_v17  ;;  %v7549_v43 = vrot.slane %v17578_v63, %v14673_v50  ;;  %v7524_v20 = vrot.slane %v7510_v34, %v14632_v37 }
 0x5d4   : > { %v7468_v2 = vrot.slane %v7454_v8, %v14673_v50  ;;  %v7573_v47 = vcombine.low %v7517_v13, %v7533_v30  ;;  %v7574_v51 = vcombine.high %v7517_v13, %v7533_v30  ;;  %v7540_v28 = vrot.slane %v7526_v48, %v14632_v37 }
 0x5d5   : > { %v7556_v40 = vrot.slane %v17579_v10, %v14673_v50  ;;  %v7629_v30 = vcombine.low %v16005_v42, %v16073_v32  ;;  %v7645_v55 = vcombine.low %v16091_v61, %v16124_v6  ;;  %v7565_v54 = vrot.slane %v17580_v25, %v14673_v50 }
 0x5d6   : > { %v7581_v3 = vrot.slane %v7573_v47, %v14673_v50  ;;  %v7590_v13 = vcombine.high %v7524_v20, %v7540_v28  ;;  %v7572_v1 = vrot.slane %v17581_v0, %v14673_v50  ;;  %v7693_v29 = vcombine.low %v16086_v59, %v16089_v27 }
 0x5d7   : > { %8037 = vxpose.xlu1.b32.start.end [1/1] (short) (narrow) %v7470_v26, 16  ;;  %8005 = vxpose.xlu0.b32.start.end [1/1] (short) (narrow) %v7469_v45, 16  ;;  %v7436_v26 = vrot.slane %v7422_v15, %v14673_v50  ;;  %v7637_v42 = vrot.slane %v7629_v30, %v14632_v37  ;;  %v7653_v32 = vrot.slane %v7645_v55, %v14632_v37 }
 0x5d8   : > { %v7606_v23 = vcombine.high %v7549_v43, %v7581_v3  ;;  %v7605_v33 = vcombine.low %v7549_v43, %v7581_v3  ;;  %v7725_v43 = vcombine.low %v16143_v18, %v16146_v11 }
 0x5d9   : > { %v7476_v36 = vcombine.high %v7436_v26, %v7468_v2  ;;  %v7475_v45 = vcombine.low %v7436_v26, %v7468_v2  ;;  %v7709_v2 = vcombine.low %v7653_v32, %v7669_v14 }
 0x5dc   : > { %8101 = vxpose.xlu1.b32.start.end [1/1] (short) (narrow) %v7472_v56, 16  ;;  %8069 = vxpose.xlu0.b32.start.end [1/1] (short) (narrow) %v7471_v16, 16  ;;  %v7588_v56 = vrot.slane %v7574_v51, %v14673_v50  ;;  %v7589_v16 = vcombine.low %v7524_v20, %v7540_v28 }
 0x5de   : > { %v7608_v17 = vcombine.high %v7556_v40, %v7588_v56  ;;  %v7607_v8 = vcombine.low %v7556_v40, %v7588_v56  ;;  %v7597_v15 = vrot.slane %v7589_v16, %v14673_v50  ;;  %v7701_v56 = vrot.slane %v7693_v29, %v14673_v50 }
 0x5e0   : > { %v7610_v61 = vcombine.high %v7565_v54, %v7597_v15  ;;  %v7609_v6 = vcombine.low %v7565_v54, %v7597_v15 }
 0x5e1   : > { %8165 = vxpose.xlu1.b32.start.end [1/1] (short) (narrow) %v7474_v24, 16  ;;  %8133 = vxpose.xlu0.b32.start.end [1/1] (short) (narrow) %v7473_v21, 16  ;;  %v7604_v24 = vrot.slane %v7590_v13, %v14673_v50  ;;  %v7621_v21 = vrot.slane %v7613_v60, %v14632_v37  ;;  %v6778_v9 = vpop.xlane.xlu0 %6777 }
 0x5e3   : > { %v7677_v47 = vcombine.low %v7621_v21, %v7637_v42  ;;  %v7612_v26 = vcombine.high %v7572_v1, %v7604_v24  ;;  %v7611_v48 = vcombine.low %v7572_v1, %v7604_v24  ;;  %v7678_v3 = vcombine.high %v7621_v21, %v7637_v42 }
 0x5e5   : > { %v7685_v34 = vrot.slane %v7677_v47, %v14673_v50  ;;  %v7692_v57 = vrot.slane %v7678_v3, %v14673_v50 }
 0x5e6   : > { %8229 = vxpose.xlu1.b32.start.end [1/1] (short) (narrow) %v7476_v36, 16  ;;  %8197 = vxpose.xlu0.b32.start.end [1/1] (short) (narrow) %v7475_v45, 16  ;;  %v7717_v36 = vrot.slane %v7709_v2, %v14673_v50  ;;  %v7710_v45 = vcombine.high %v7653_v32, %v7669_v14 }
 0x5e8   : > { %v7742_v51 = vcombine.high %v7685_v34, %v7717_v36  ;;  %v7741_v28 = vcombine.low %v7685_v34, %v7717_v36  ;;  %v7724_v63 = vrot.slane %v7710_v45, %v14673_v50 }
 0x5ea   : > { %v7743_v20 = vcombine.low %v7692_v57, %v7724_v63 }
 0x5eb   : > { %8293 = vxpose.xlu1.b32.start.end [1/1] (short) (narrow) %v7606_v23, 16  ;;  %8261 = vxpose.xlu0.b32.start.end [1/1] (short) (narrow) %v7605_v33, 16  ;;  %v7744_v23 = vcombine.high %v7692_v57, %v7724_v63  ;;  %v7733_v33 = vrot.slane %v7725_v43, %v14673_v50 }
 0x5ed   : > { %v7745_v16 = vcombine.low %v7701_v56, %v7733_v33  ;;  %v7746_v10 = vcombine.high %v7701_v56, %v7733_v33 }
 0x5f0   : > { %8357 = vxpose.xlu1.b32.start.end [1/1] (short) (narrow) %v7608_v17, 16  ;;  %8325 = vxpose.xlu0.b32.start.end [1/1] (short) (narrow) %v7607_v8, 16  ;;  %v6822_v8 = vsub.f32 %v15952_v62, %v6778_v9 }
 0x5f1   : > { %v6790_v30 = vpop.xlane.xlu0 %6789 }
 0x5f2   : > { %v6839_v59 = vmul.f32 1.442695, %v6822_v8 }
 0x5f4   : > { %14175 = vpow2.f32 %v6839_v59 }
 0x5f5   : > { %8421 = vxpose.xlu1.b32.start.end [1/1] (short) (narrow) %v7610_v61, 16  ;;  %8389 = vxpose.xlu0.b32.start.end [1/1] (short) (narrow) %v7609_v6, 16  ;;  %v6775_v18 = vpop.xlane.xlu1 %6774 }
 0x5f6   : > { %v6821_v15 = vsub.f32 %v15962_v53, %v6775_v18 }
 0x5f8   : > { %v6837_v25 = vmul.f32 1.442695, %v6821_v15 }
 0x5f9   : > { %v6784_v11 = vpop.xlane.xlu1 %6783  ;;  %v6796_v14 = vpop.xlane.xlu0 %6795 }
 0x5fa   : > { %8485 = vxpose.xlu1.b32.start.end [1/1] (short) (narrow) %v7612_v26, 16  ;;  %8453 = vxpose.xlu0.b32.start.end [1/1] (short) (narrow) %v7611_v48, 16  ;;  %v6824_v54 = vsub.f32 %v15965_v35, %v6784_v11  ;;  %v6828_v35 = vsub.f32 %v15970_v41, %v6796_v14 }
 0x5fc   : > { %v6843_v6 = vmul.f32 1.442695, %v6824_v54 }
 0x5fd   : > { %v6781_v40 = vpop.xlane.xlu1 %6780 }
 0x5fe   : > { %v6823_v27 = vsub.f32 %v15975_v4, %v6781_v40  ;;  %v6826_v4 = vsub.f32 %v15957_v49, %v6790_v30  ;;  %v16254_v2 = vpop.eup %14175 }
 0x5ff   : > { %8549 = vxpose.xlu0.b32.start.end [1/1] (short) (narrow) %v7742_v51, 16  ;;  %8517 = vxpose.xlu1.b32.start.end [1/1] (short) (narrow) %v7741_v28, 16  ;;  %v6872_v49 = vsel %vm6772_vm5, %v16254_v2, 0.0 }
 0x600   : > { %v6841_v13 = vmul.f32 1.442695, %v6823_v27  ;;  %v6847_v0 = vmul.f32 1.442695, %v6826_v4 }
 0x601   : > { %v6787_v17 = vpop.xlane.xlu1 %6786  ;;  %v6802_v61 = vpop.xlane.xlu0 %6801 }
 0x602   : > { %v6825_v60 = vsub.f32 %v15982_v5, %v6787_v17  ;;  %14177 = vpow2.f32 %v6841_v13  ;;  %v6830_v48 = vsub.f32 %v15989_v39, %v6802_v61 }
 0x603   : > { %14179 = vpow2.f32 %v6837_v25 }
 0x604   : > { %8581 = vxpose.xlu0.b32.start.end [1/1] (short) (narrow) %v7743_v20, 16  ;;  %8613 = vxpose.xlu1.b32.start.end [1/1] (short) (narrow) %v7744_v23, 16  ;;  %v6845_v32 = vmul.f32 1.442695, %v6825_v60  ;;  %v6855_v3 = vmul.f32 1.442695, %v6830_v48 }
 0x605   : > { %v6793_v55 = vpop.xlane.xlu1 %6792 }
 0x606   : > { %v6827_v62 = vsub.f32 %v15994_v38, %v6793_v55  ;;  %14181 = vpow2.f32 %v6845_v32 }
 0x607   : > { %14183 = vpow2.f32 %v6843_v6 }
 0x608   : > { %v6849_v53 = vmul.f32 1.442695, %v6827_v62 }
 0x609   : > { %8645 = vxpose.xlu0.b32.start.end [1/1] (short) (narrow) %v7745_v16, 16  ;;  %8677 = vxpose.xlu1.b32.start.end [1/1] (short) (narrow) %v7746_v10, 16  ;;  %v6799_v42 = vpop.xlane.xlu1 %6798  ;;  %v6808_v21 = vpop.xlane.xlu0 %6807 }
 0x60a   : > { %v6829_v24 = vsub.f32 %v16001_v22, %v6799_v42  ;;  %14185 = vpow2.f32 %v6849_v53  ;;  %v6851_v22 = vmul.f32 1.442695, %v6828_v35  ;;  %v6832_v51 = vsub.f32 %v16008_v7, %v6808_v21 }
 0x60b   : > { %14187 = vpow2.f32 %v6847_v0 }
 0x60c   : > { %v6853_v1 = vmul.f32 1.442695, %v6829_v24  ;;  %v16260_v26 = vpop.eup %14177  ;;  %v6859_v20 = vmul.f32 1.442695, %v6832_v51 }
 0x60d   : > { %v6805_v5 = vpop.xlane.xlu1 %6804  ;;  %v16263_v36 = vpop.eup %14179 }
 0x60e   : > { %v6831_v38 = vsub.f32 %v16013_v44, %v6805_v5  ;;  %14189 = vpow2.f32 %v6853_v1  ;;  %v6875_v44 = vsel %vm6772_vm5, %v16260_v26, 0.0  ;;  %v6869_v39 = vsel %vm6772_vm5, %v16263_v36, 0.0 }
 0x60f   : > { %14191 = vpow2.f32 %v6851_v22 }
 0x610   : > { %v6857_v41 = vmul.f32 1.442695, %v6831_v38  ;;  %v16268_v34 = vpop.eup %14181 }
 0x611   : > { %v6814_v47 = vpop.xlane.xlu0 %6813  ;;  %v6811_v28 = vpop.xlane.xlu1 %6810  ;;  %v6881_v57 = vsel %vm6772_vm5, %v16268_v34, 0.0 }
 0x612   : > { %v6834_v45 = vsub.f32 %v16027_v19, %v6814_v47  ;;  %v16273_v63 = vpop.eup %14183  ;;  %14193 = vpow2.f32 %v6857_v41  ;;  %v6833_v19 = vsub.f32 %v16024_v12, %v6811_v28 }
 0x613   : > { %14195 = vpow2.f32 %v6855_v3  ;;  %v6878_v7 = vsel %vm6772_vm5, %v16273_v63, 0.0 }
 0x614   : > { %v6863_v43 = vmul.f32 1.442695, %v6834_v45  ;;  %v16278_v29 = vpop.eup %14185  ;;  %v6861_v33 = vmul.f32 1.442695, %v6833_v19 }
 0x615   : > { %v16282_v23 = vpop.eup %14187  ;;  %v6887_v12 = vsel %vm6772_vm5, %v16278_v29, 0.0 }
 0x616   : > { %14197 = vpow2.f32 %v6863_v43  ;;  %v6884_v18 = vsel %vm6772_vm5, %v16282_v23, 0.0 }
 0x617   : > { %14199 = vpow2.f32 %v6859_v20 }
 0x618   : > { %v16290_v10 = vpop.eup %14189  ;;  %14201 = vpow2.f32 %v6861_v33 }
 0x619   : > { %v16284_v56 = vpop.xlane.xlu1 %6816  ;;  %v16286_v16 = vpop.xlane.xlu0 %6819  ;;  %v6893_v40 = vsel %vm6772_vm5, %v16290_v10, 0.0 }
 0x61a   : > { %v16294_v11 = vpop.eup %14191 }
 0x61b   : > { %v6890_v59 = vsel %vm6772_vm5, %v16294_v11, 0.0 }
 0x61c   : > { %v16298_v8 = vpop.eup %14193 }
 0x61d   : > { %v16302_v27 = vpop.eup %14195  ;;  %v6899_v30 = vsel %vm6772_vm5, %v16298_v8, 0.0 }
 0x61e   : > { %v6896_v60 = vsel %vm6772_vm5, %v16302_v27, 0.0 }
 0x620   : > { %v16306_v13 = vpop.eup %14197 }
 0x621   : > { %17582 = vst [vmem:[#allocation49_spill] sm:$0xff] %v16306_v13  ;;  %v16310_v14 = vpop.eup %14199  ;;  %v6908_v25 = vsel %vm6772_vm5, %v16306_v13, 0.0 }
 0x622   : > { %v16314_v6 = vpop.eup %14201  ;;  %v6902_v53 = vsel %vm6772_vm5, %v16310_v14, 0.0 }
 0x623   : > { %17583 = vst [vmem:[#allocation46_spill] sm:$0xff] %v16314_v6  ;;  %v6905_v38 = vsel %vm6772_vm5, %v16314_v6, 0.0 }
 0x634   : > { %6873 = vadd.xlane.f32.xlu1 %v6872_v49 }
 0x638   : > { %6876 = vadd.xlane.f32.xlu1 %v6875_v44 }
 0x63a   : > { %6870 = vadd.xlane.f32.xlu0 %v6869_v39 }
 0x63c   : > { %6882 = vadd.xlane.f32.xlu1 %v6881_v57 }
 0x63e   : > { %6879 = vadd.xlane.f32.xlu0 %v6878_v7 }
 0x640   : > { %6888 = vadd.xlane.f32.xlu1 %v6887_v12 }
 0x642   : > { %6885 = vadd.xlane.f32.xlu0 %v6884_v18 }
 0x643   : > { %v7765_v9 = vpop.trf.xlu1  ;;  %v7797_v17 = vpop.trf.xlu0 }
 0x644   : > { %6894 = vadd.xlane.f32.xlu1 %v6893_v40 }
 0x646   : > { %6891 = vadd.xlane.f32.xlu0 %v6890_v59 }
 0x647   : > { %v7766_v55 = vpop.trf.xlu1  ;;  %v7798_v15 = vpop.trf.xlu0 }
 0x648   : > { %6900 = vadd.xlane.f32.xlu1 %v6899_v30 }
 0x64a   : > { %6897 = vadd.xlane.f32.xlu0 %v6896_v60 }
 0x64b   : > { %v7861_v54 = vpop.trf.xlu1  ;;  %v7829_v42 = vpop.trf.xlu0 }
 0x64c   : > { %6909 = vadd.xlane.f32.xlu1 %v6908_v25  ;;  %v8789_v32 = vcombine.low %v7797_v17, %v7861_v54  ;;  %v8790_v62 = vcombine.high %v7797_v17, %v7861_v54  ;;  %v8773_v61 = vcombine.low %v7765_v9, %v7829_v42  ;;  %v8774_v4 = vcombine.high %v7765_v9, %v7829_v42 }
 0x64e   : > { %6903 = vadd.xlane.f32.xlu0 %v6902_v53  ;;  %v8797_v24 = vrot.slane %v8789_v32, %v14632_v37  ;;  %v8804_v21 = vrot.slane %v8790_v62, %v14632_v37  ;;  %v8781_v5 = vrot.slane %v8773_v61, %v14632_v37  ;;  %v8788_v0 = vrot.slane %v8774_v4, %v14632_v37 }
 0x64f   : > { %v7862_v35 = vpop.trf.xlu1  ;;  %v7830_v1 = vpop.trf.xlu0 }
 0x650   : > { %v9333_v47 = vcombine.low %v7798_v15, %v7862_v35  ;;  %v9334_v49 = vcombine.high %v7798_v15, %v7862_v35  ;;  %v8838_v22 = vcombine.high %v8781_v5, %v8797_v24  ;;  %v8853_v48 = vcombine.low %v8788_v0, %v8804_v21 }
 0x651   : > { %v8854_v41 = vcombine.high %v8788_v0, %v8804_v21  ;;  %v9317_v45 = vcombine.low %v7766_v55, %v7830_v1  ;;  %v9318_v44 = vcombine.high %v7766_v55, %v7830_v1  ;;  %v8837_v40 = vcombine.low %v8781_v5, %v8797_v24 }
 0x652   : > { %6906 = vadd.xlane.f32.xlu0 %v6905_v38  ;;  %v9341_v3 = vrot.slane %v9333_v47, %v14632_v37  ;;  %v9348_v51 = vrot.slane %v9334_v49, %v14632_v37  ;;  %v16330_v25 = vrot.slane %v8838_v22, %v14673_v50  ;;  %v16333_v54 = vrot.slane %v8853_v48, %v14673_v50 }
 0x653   : > { %v7925_v28 = vpop.trf.xlu1  ;;  %v9325_v39 = vrot.slane %v9317_v45, %v14632_v37  ;;  %v9332_v43 = vrot.slane %v9318_v44, %v14632_v37  ;;  %v7893_v19 = vpop.trf.xlu0  ;;  %v8845_v60 = vrot.slane %v8837_v40, %v14673_v50  ;;  %v16336_v42 = vrot.slane %v8854_v41, %v14673_v50 }
 0x655   : > { %v9381_v57 = vcombine.low %v9325_v39, %v9341_v3  ;;  %v9382_v20 = vcombine.high %v9325_v39, %v9341_v3  ;;  %v9397_v7 = vcombine.low %v9332_v43, %v9348_v51  ;;  %v9398_v33 = vcombine.high %v9332_v43, %v9348_v51 }
 0x657   : > { %v7926_v12 = vpop.trf.xlu1  ;;  %v7894_v18 = vpop.trf.xlu0  ;;  %v16343_v53 = vrot.slane %v9381_v57, %v14673_v50  ;;  %v16346_v24 = vrot.slane %v9382_v20, %v14673_v50  ;;  %v16349_v21 = vrot.slane %v9397_v7, %v14673_v50  ;;  %v16352_v5 = vrot.slane %v9398_v33, %v14673_v50 }
 0x659   : > { %17584 = vst [vmem:[#allocation47_spill] sm:$0xff] %v16343_v53  ;;  %17585 = vst [vmem:[#allocation50_spill] sm:$0xff] %v16346_v24 }
 0x65a   : > { %17586 = vst [vmem:[#allocation43_spill] sm:$0xff] %v16349_v21  ;;  %17587 = vst [vmem:[#allocation21_spill] sm:$0xff] %v16352_v5 }
 0x65b   : > { %v7989_v9 = vpop.trf.xlu1  ;;  %v7957_v17 = vpop.trf.xlu0 }
 0x65c   : > { %v8821_v59 = vcombine.low %v7925_v28, %v7989_v9  ;;  %v8822_v30 = vcombine.high %v7925_v28, %v7989_v9  ;;  %v8805_v55 = vcombine.low %v7893_v19, %v7957_v17  ;;  %v8806_v15 = vcombine.high %v7893_v19, %v7957_v17 }
 0x65e   : > { %v8829_v32 = vrot.slane %v8821_v59, %v14632_v37  ;;  %v8836_v62 = vrot.slane %v8822_v30, %v14632_v37  ;;  %v8813_v61 = vrot.slane %v8805_v55, %v14632_v37  ;;  %v8820_v4 = vrot.slane %v8806_v15, %v14632_v37 }
 0x65f   : > { %v7990_v0 = vpop.trf.xlu1  ;;  %v7958_v35 = vpop.trf.xlu0 }
 0x660   : > { %v9365_v1 = vcombine.low %v7926_v12, %v7990_v0  ;;  %v9366_v38 = vcombine.high %v7926_v12, %v7990_v0  ;;  %v8869_v47 = vcombine.low %v8813_v61, %v8829_v32  ;;  %v8870_v49 = vcombine.high %v8813_v61, %v8829_v32 }
 0x661   : > { %v8885_v22 = vcombine.low %v8820_v4, %v8836_v62  ;;  %v8886_v48 = vcombine.high %v8820_v4, %v8836_v62  ;;  %v9349_v41 = vcombine.low %v7894_v18, %v7958_v35  ;;  %v9350_v45 = vcombine.high %v7894_v18, %v7958_v35 }
 0x662   : > { %v9373_v44 = vrot.slane %v9365_v1, %v14632_v37  ;;  %v9380_v3 = vrot.slane %v9366_v38, %v14632_v37  ;;  %v8877_v51 = vrot.slane %v8869_v47, %v14673_v50  ;;  %v16358_v28 = vrot.slane %v8870_v49, %v14673_v50 }
 0x663   : > { %v16361_v39 = vrot.slane %v8885_v22, %v14673_v50  ;;  %v16364_v43 = vrot.slane %v8886_v48, %v14673_v50  ;;  %v8053_v19 = vpop.trf.xlu1  ;;  %v9357_v57 = vrot.slane %v9349_v41, %v14632_v37  ;;  %v9364_v20 = vrot.slane %v9350_v45, %v14632_v37  ;;  %v8021_v7 = vpop.trf.xlu0 }
 0x664   : > { %v8901_v33 = vcombine.low %v8845_v60, %v8877_v51  ;;  %v8902_v12 = vcombine.high %v8845_v60, %v8877_v51 }
 0x665   : > { %v9413_v9 = vcombine.low %v9357_v57, %v9373_v44  ;;  %v9414_v17 = vcombine.high %v9357_v57, %v9373_v44  ;;  %v9429_v59 = vcombine.low %v9364_v20, %v9380_v3  ;;  %v9430_v30 = vcombine.high %v9364_v20, %v9380_v3 }
 0x666   : > { %13694 = vmatprep.mubr.msk.f32.mxu0 %vm6772_vm5, %v8901_v33  ;;  %13702 = vmatprep.mubr.msk.f32.mxu1 %vm6772_vm5, %v8902_v12 }
 0x667   : > { %v16381_v32 = vrot.slane %v9413_v9, %v14673_v50  ;;  %v16384_v62 = vrot.slane %v9414_v17, %v14673_v50  ;;  %v16387_v61 = vrot.slane %v9429_v59, %v14673_v50  ;;  %v16390_v4 = vrot.slane %v9430_v30, %v14673_v50  ;;  %v8054_v0 = vpop.trf.xlu1  ;;  %v8022_v35 = vpop.trf.xlu0 }
 0x669   : > { %17588 = vst [vmem:[#allocation23_spill] sm:$0xff] %v16381_v32  ;;  %17589 = vst [vmem:[#allocation19_spill] sm:$0xff] %v16384_v62 }
 0x66a   : > { %17590 = vst [vmem:[#allocation20_spill] sm:$0xff] %v16387_v61  ;;  %17591 = vst [vmem:[#allocation22_spill] sm:$0xff] %v16390_v4 }
 0x66b   : > { %v8117_v3 = vpop.trf.xlu1  ;;  %v8085_v51 = vpop.trf.xlu0 }
 0x66c   : > { %v8925_v57 = vcombine.low %v8053_v19, %v8117_v3  ;;  %v8926_v20 = vcombine.high %v8053_v19, %v8117_v3  ;;  %v8909_v33 = vcombine.low %v8021_v7, %v8085_v51  ;;  %v8910_v12 = vcombine.high %v8021_v7, %v8085_v51 }
 0x66e   : > { %v8933_v9 = vrot.slane %v8925_v57, %v14632_v37  ;;  %v8940_v17 = vrot.slane %v8926_v20, %v14632_v37  ;;  %v8917_v59 = vrot.slane %v8909_v33, %v14632_v37  ;;  %v8924_v30 = vrot.slane %v8910_v12, %v14632_v37 }
 0x66f   : > { %v8118_v41 = vpop.trf.xlu1  ;;  %v8086_v48 = vpop.trf.xlu0 }
 0x670   : > { %v9469_v45 = vcombine.low %v8054_v0, %v8118_v41  ;;  %v9470_v22 = vcombine.high %v8054_v0, %v8118_v41  ;;  %v8973_v49 = vcombine.low %v8917_v59, %v8933_v9  ;;  %v8974_v44 = vcombine.high %v8917_v59, %v8933_v9 }
 0x671   : > { %v8989_v47 = vcombine.low %v8924_v30, %v8940_v17  ;;  %v8990_v38 = vcombine.high %v8924_v30, %v8940_v17  ;;  %v9453_v1 = vcombine.low %v8022_v35, %v8086_v48  ;;  %v9454_v19 = vcombine.high %v8022_v35, %v8086_v48 }
 0x672   : > { %v9477_v7 = vrot.slane %v9469_v45, %v14632_v37  ;;  %v16416_v3 = vrot.slane %v9470_v22, %v14632_v37  ;;  %v16423_v15 = vrot.slane %v8973_v49, %v14673_v50 }
 0x673   : > { %v8181_v51 = vpop.trf.xlu1  ;;  %v9461_v57 = vrot.slane %v9453_v1, %v14632_v37  ;;  %v9468_v20 = vrot.slane %v9454_v19, %v14632_v37  ;;  %v8149_v33 = vpop.trf.xlu0  ;;  %v16426_v1 = vrot.slane %v8974_v44, %v14673_v50  ;;  %v16429_v19 = vrot.slane %v8989_v47, %v14673_v50 }
 0x675   : > { %v9517_v12 = vcombine.low %v9461_v57, %v9477_v7  ;;  %v9518_v60 = vcombine.high %v9461_v57, %v9477_v7  ;;  %v9533_v0 = vcombine.low %v9468_v20, %v16416_v3  ;;  %v9534_v41 = vcombine.high %v9468_v20, %v16416_v3 }
 0x677   : > { %v8182_v9 = vpop.trf.xlu1  ;;  %v8150_v17 = vpop.trf.xlu0  ;;  %v16439_v49 = vrot.slane %v9517_v12, %v14673_v50  ;;  %v16442_v44 = vrot.slane %v9518_v60, %v14673_v50 }
 0x679   : > { %17592 = vst [vmem:[#allocation24_spill] sm:$0xff] %v16439_v49  ;;  %17593 = vst [vmem:[#allocation33_spill] sm:$0xff] %v16442_v44 }
 0x67b   : > { %v8245_v35 = vpop.trf.xlu1  ;;  %v8213_v48 = vpop.trf.xlu0 }
 0x67c   : > { %v8957_v45 = vcombine.low %v8181_v51, %v8245_v35  ;;  %v8958_v59 = vcombine.high %v8181_v51, %v8245_v35  ;;  %v8941_v22 = vcombine.low %v8149_v33, %v8213_v48  ;;  %v8942_v30 = vcombine.high %v8149_v33, %v8213_v48 }
 0x67d   : > { %v16436_v51 = vrot.slane %v8990_v38, %v14673_v50 }
 0x67e   : > { %v8965_v7 = vrot.slane %v8957_v45, %v14632_v37  ;;  %v8972_v3 = vrot.slane %v8958_v59, %v14632_v37  ;;  %v8949_v57 = vrot.slane %v8941_v22, %v14632_v37  ;;  %v8956_v20 = vrot.slane %v8942_v30, %v14632_v37 }
 0x67f   : > { %8709 = vxpose.xlu0.b32.start.end [1/1] (short) (narrow) %v7747_v58, 16  ;;  %8741 = vxpose.xlu1.b32.start.end [1/1] (short) (narrow) %v7748_v46, 16  ;;  %v8246_v47 = vpop.trf.xlu1  ;;  %v8214_v33 = vpop.trf.xlu0 }
 0x680   : > { %v9501_v35 = vcombine.low %v8182_v9, %v8246_v47  ;;  %v9502_v48 = vcombine.high %v8182_v9, %v8246_v47  ;;  %v9005_v38 = vcombine.low %v8949_v57, %v8965_v7  ;;  %v9006_v45 = vcombine.high %v8949_v57, %v8965_v7 }
 0x681   : > { %v9021_v59 = vcombine.low %v8956_v20, %v8972_v3  ;;  %v9022_v12 = vcombine.high %v8956_v20, %v8972_v3  ;;  %v9485_v22 = vcombine.low %v8150_v17, %v8214_v33  ;;  %v9486_v30 = vcombine.high %v8150_v17, %v8214_v33 }
 0x682   : > { %v9509_v60 = vrot.slane %v9501_v35, %v14632_v37  ;;  %v9516_v55 = vrot.slane %v9502_v48, %v14632_v37  ;;  %v16453_v58 = vrot.slane %v9005_v38, %v14673_v50  ;;  %v16456_v52 = vrot.slane %v9006_v45, %v14673_v50 }
 0x683   : > { %v16459_v31 = vrot.slane %v9021_v59, %v14673_v50  ;;  %v16462_v46 = vrot.slane %v9022_v12, %v14673_v50  ;;  %v16464_v9 = vpop.trf.xlu1  ;;  %v9493_v17 = vrot.slane %v9485_v22, %v14632_v37  ;;  %v9500_v7 = vrot.slane %v9486_v30, %v14632_v37  ;;  %v16468_v3 = vpop.trf.xlu0 }
 0x684   : > { %v16487_v47 = vrot.slane %v9533_v0, %v14673_v50  ;;  %v16490_v33 = vrot.slane %v9534_v41, %v14673_v50 }
 0x685   : > { %v9549_v59 = vcombine.low %v9493_v17, %v9509_v60  ;;  %v9550_v12 = vcombine.high %v9493_v17, %v9509_v60  ;;  %v9565_v22 = vcombine.low %v9500_v7, %v9516_v55  ;;  %v9566_v30 = vcombine.high %v9500_v7, %v9516_v55 }
 0x686   : > { %17594 = vst [vmem:[#allocation35_spill] sm:$0xff] %v16487_v47  ;;  %17595 = vst [vmem:[#allocation34_spill] sm:$0xff] %v16490_v33 }
 0x687   : > { %v8310_v35 = vpop.trf.xlu1  ;;  %v8278_v40 = vpop.trf.xlu0  ;;  %v16493_v48 = vrot.slane %v9549_v59, %v14673_v50  ;;  %v16496_v38 = vrot.slane %v9550_v12, %v14673_v50  ;;  %v16499_v45 = vrot.slane %v9565_v22, %v14673_v50  ;;  %v16502_v60 = vrot.slane %v9566_v30, %v14673_v50 }
 0x689   : > { %17596 = vst [vmem:[#allocation36_spill] sm:$0xff] %v16493_v48  ;;  %17597 = vst [vmem:[#allocation32_spill] sm:$0xff] %v16496_v38 }
 0x68a   : > { %17598 = vst [vmem:[#allocation30_spill] sm:$0xff] %v16499_v45  ;;  %17599 = vst [vmem:[#allocation31_spill] sm:$0xff] %v16502_v60  ;;  %v17600_v45 = vld [vmem:[#allocation48_spill] sm:$0xff] }
 0x68b   : > { %v16520_v30 = vpop.trf.xlu1  ;;  %v16522_v0 = vpop.trf.xlu0  ;;  %v6836_v47 = vsub.f32 %v17600_v45, %v16286_v16 }
 0x68c   : > { %v9062_v41 = vcombine.high %v16464_v9, %v16520_v30  ;;  %v9046_v17 = vcombine.high %v16468_v3, %v16522_v0 }
 0x68e   : > { %v9076_v7 = vrot.slane %v9062_v41, %v14632_v37  ;;  %v9060_v59 = vrot.slane %v9046_v17, %v14632_v37 }
 0x68f   : > { %v8374_v55 = vpop.trf.xlu1  ;;  %v8342_v18 = vpop.trf.xlu0 }
 0x690   : > { %v9605_v12 = vcombine.low %v8310_v35, %v8374_v55  ;;  %v9606_v57 = vcombine.high %v8310_v35, %v8374_v55  ;;  %v9125_v20 = vcombine.low %v9060_v59, %v9076_v7  ;;  %v9126_v22 = vcombine.high %v9060_v59, %v9076_v7 }
 0x691   : > { %v9589_v60 = vcombine.low %v8278_v40, %v8342_v18  ;;  %v9590_v33 = vcombine.high %v8278_v40, %v8342_v18  ;;  %v6867_v18 = vmul.f32 1.442695, %v6836_v47 }
 0x692   : > { %v9613_v4 = vrot.slane %v9605_v12, %v14632_v37  ;;  %v9620_v5 = vrot.slane %v9606_v57, %v14632_v37  ;;  %v17601_v57 = vld [vmem:[#allocation41_spill] sm:$0xff]  ;;  %v16556_v13 = vrot.slane %v9126_v22, %v14673_v50 }
 0x693   : > { %v16534_v61 = vpop.trf.xlu1  ;;  %v9597_v41 = vrot.slane %v9589_v60, %v14632_v37  ;;  %v9604_v17 = vrot.slane %v9590_v33, %v14632_v37  ;;  %v16538_v21 = vpop.trf.xlu0  ;;  %v6835_v38 = vsub.f32 %v17601_v57, %v16284_v56  ;;  %14203 = vpow2.f32 %v6867_v18 }
 0x694   : > { %17602 = vst [vmem:[#allocation25_spill] sm:$0xff] %v16556_v13 }
 0x695   : > { %v9653_v35 = vcombine.low %v9597_v41, %v9613_v4  ;;  %v9654_v55 = vcombine.high %v9597_v41, %v9613_v4  ;;  %v9669_v7 = vcombine.low %v9604_v17, %v9620_v5  ;;  %v9670_v59 = vcombine.high %v9604_v17, %v9620_v5 }
 0x696   : > { %v6865_v60 = vmul.f32 1.442695, %v6835_v38  ;;  %v16553_v38 = vrot.slane %v9125_v20, %v14673_v50 }
 0x697   : > { %v8438_v40 = vpop.trf.xlu1  ;;  %v8406_v12 = vpop.trf.xlu0  ;;  %v16572_v22 = vrot.slane %v9654_v55, %v14673_v50 }
 0x698   : > { %14205 = vpow2.f32 %v6865_v60 }
 0x699   : > { %17605 = vst [vmem:[#allocation44_spill] sm:$0xff] %v16572_v22 }
 0x69b   : > { %v16542_v16 = vpop.trf.xlu1  ;;  %v16544_v45 = vpop.trf.xlu0 }
 0x69c   : > { %v9094_v33 = vcombine.high %v16534_v61, %v16542_v16  ;;  %v9078_v4 = vcombine.high %v16538_v21, %v16544_v45 }
 0x69e   : > { %v9108_v5 = vrot.slane %v9094_v33, %v14632_v37  ;;  %v9092_v47 = vrot.slane %v9078_v4, %v14632_v37 }
 0x69f   : > { %v8502_v41 = vpop.trf.xlu1  ;;  %v8470_v17 = vpop.trf.xlu0 }
 0x6a0   : > { %v9637_v56 = vcombine.low %v8438_v40, %v8502_v41  ;;  %v9638_v18 = vcombine.high %v8438_v40, %v8502_v41  ;;  %v9157_v57 = vcombine.low %v9092_v47, %v9108_v5  ;;  %v9158_v44 = vcombine.high %v9092_v47, %v9108_v5 }
 0x6a1   : > { %v9621_v62 = vcombine.low %v8406_v12, %v8470_v17  ;;  %v9622_v24 = vcombine.high %v8406_v12, %v8470_v17  ;;  %v16569_v47 = vrot.slane %v9653_v35, %v14673_v50  ;;  %v16575_v41 = vrot.slane %v9669_v7, %v14673_v50 }
 0x6a2   : > { %v9645_v6 = vrot.slane %v9637_v56, %v14632_v37  ;;  %v9652_v33 = vrot.slane %v9638_v18, %v14632_v37  ;;  %v16561_v4 = vrot.slane %v9157_v57, %v14673_v50  ;;  %v16564_v60 = vrot.slane %v9158_v44, %v14673_v50  ;;  %v16580_v44 = vpop.eup %14203 }
 0x6a3   : > { %v8533_v40 = vpop.trf.xlu1  ;;  %v9629_v5 = vrot.slane %v9621_v62, %v14632_v37  ;;  %v9636_v12 = vrot.slane %v9622_v24, %v14632_v37  ;;  %v8565_v20 = vpop.trf.xlu0  ;;  %17604 = vst [vmem:[#allocation37_spill] sm:$0xff] %v16569_v47  ;;  %17606 = vst [vmem:[#allocation51_spill] sm:$0xff] %v16575_v41  ;;  %v16578_v17 = vrot.slane %v9670_v59, %v14673_v50  ;;  %v6914_v55 = vsel %vm6772_vm5, %v16580_v44, 0.0 }
 0x6a4   : > { %17603 = vst [vmem:[#allocation39_spill] sm:$0xff] %v16564_v60  ;;  %17608 = vst [vmem:[#allocation38_spill] sm:$0xff] %v16580_v44  ;;  %v16612_v35 = vpop.eup %14205 }
 0x6a5   : > { %17607 = vst [vmem:[#allocation40_spill] sm:$0xff] %v16578_v17  ;;  %v9685_v56 = vcombine.low %v9629_v5, %v9645_v6  ;;  %v9686_v18 = vcombine.high %v9629_v5, %v9645_v6  ;;  %v9701_v62 = vcombine.low %v9636_v12, %v9652_v33  ;;  %v9702_v57 = vcombine.high %v9636_v12, %v9652_v33 }
 0x6a6   : > { %17613 = vst [vmem:[#allocation54_spill] sm:$0xff] %v16612_v35 }
 0x6a7   : > { %v16591_v59 = vrot.slane %v9685_v56, %v14673_v50  ;;  %v16594_v48 = vrot.slane %v9686_v18, %v14673_v50  ;;  %v16597_v6 = vrot.slane %v9701_v62, %v14673_v50  ;;  %v16600_v33 = vrot.slane %v9702_v57, %v14673_v50  ;;  %v8534_v5 = vpop.trf.xlu1  ;;  %v8566_v12 = vpop.trf.xlu0 }
 0x6a8   : > { %v6911_v56 = vsel %vm6772_vm5, %v16612_v35, 0.0 }
 0x6a9   : > { %17609 = vst [vmem:[#allocation52_spill] sm:$0xff] %v16591_v59  ;;  %17610 = vst [vmem:[#allocation53_spill] sm:$0xff] %v16594_v48 }
 0x6aa   : > { %17611 = vst [vmem:[#allocation26_spill] sm:$0xff] %v16597_v6  ;;  %17612 = vst [vmem:[#allocation28_spill] sm:$0xff] %v16600_v33  ;;  %6915 = vadd.xlane.f32.xlu1 %v6914_v55 }
 0x6ab   : > { %v8629_v44 = vpop.trf.xlu1  ;;  %v8597_v18 = vpop.trf.xlu0 }
 0x6ac   : > { %v9197_v59 = vcombine.low %v8565_v20, %v8629_v44  ;;  %v9198_v47 = vcombine.high %v8565_v20, %v8629_v44  ;;  %v9181_v62 = vcombine.low %v8533_v40, %v8597_v18  ;;  %v9182_v48 = vcombine.high %v8533_v40, %v8597_v18 }
 0x6ad   : > { %v9045_v18 = vcombine.low %v16468_v3, %v16522_v0 }
 0x6ae   : > { %v16623_v55 = vrot.slane %v9197_v59, %v14632_v37  ;;  %v16626_v57 = vrot.slane %v9198_v47, %v14632_v37  ;;  %v16629_v24 = vrot.slane %v9181_v62, %v14632_v37  ;;  %v16632_v7 = vrot.slane %v9182_v48, %v14632_v37 }
 0x6af   : > { %v8630_v33 = vpop.trf.xlu1  ;;  %v8598_v59 = vpop.trf.xlu0  ;;  %v9053_v41 = vrot.slane %v9045_v18, %v14632_v37 }
 0x6b0   : > { %6912 = vadd.xlane.f32.xlu0 %v6911_v56  ;;  %v9741_v20 = vcombine.low %v8566_v12, %v8630_v33  ;;  %v9742_v44 = vcombine.high %v8566_v12, %v8630_v33  ;;  %v9725_v62 = vcombine.low %v8534_v5, %v8598_v59  ;;  %v9726_v17 = vcombine.high %v8534_v5, %v8598_v59 }
 0x6b1   : > { %v9093_v5 = vcombine.low %v16534_v61, %v16542_v16 }
 0x6b2   : > { %v16645_v35 = vrot.slane %v9741_v20, %v14632_v37  ;;  %v16648_v33 = vrot.slane %v9742_v44, %v14632_v37  ;;  %v16651_v12 = vrot.slane %v9725_v62, %v14632_v37  ;;  %v16654_v56 = vrot.slane %v9726_v17, %v14632_v37 }
 0x6b3   : > { %v16656_v47 = vpop.trf.xlu1  ;;  %v16668_v62 = vpop.trf.xlu0  ;;  %v9061_v17 = vcombine.low %v16464_v9, %v16520_v30  ;;  %v9077_v20 = vcombine.low %v16538_v21, %v16544_v45  ;;  %v9101_v9 = vrot.slane %v9093_v5, %v14632_v37 }
 0x6b5   : > { %v9069_v6 = vrot.slane %v9061_v17, %v14632_v37  ;;  %v9085_v30 = vrot.slane %v9077_v20, %v14632_v37 }
 0x6b7   : > { %v16666_v59 = vpop.trf.xlu1  ;;  %v16672_v40 = vpop.trf.xlu0  ;;  %v9109_v0 = vcombine.low %v9053_v41, %v9069_v6  ;;  %v9141_v49 = vcombine.low %v9085_v30, %v9101_v9 }
 0x6b9   : > { %v9117_v45 = vrot.slane %v9109_v0, %v14673_v50  ;;  %v9149_v18 = vrot.slane %v9141_v49, %v14673_v50 }
 0x6bb   : > { %v9174_v20 = vcombine.high %v9117_v45, %v9149_v18 }
 0x6c1   : > { %v6874_v48 = vpop.xlane.xlu1 %6873 }
 0x6c2   : > { %14207 = vrcp.f32 %v6874_v48 }
 0x6c5   : > { %v6877_v44 = vpop.xlane.xlu1 %6876 }
 0x6c6   : > { %14209 = vrcp.f32 %v6877_v44  ;;  %v17614_v44 = vcombine.high %v16423_v15, %v16453_v58 }
 0x6c7   : > { %v6871_v22 = vpop.xlane.xlu0 %6870 }
 0x6c8   : > { %14211 = vrcp.f32 %v6871_v22 }
 0x6c9   : > { %v6883_v3 = vpop.xlane.xlu1 %6882 }
 0x6ca   : > { %14213 = vrcp.f32 %v6883_v3 }
 0x6cb   : > { %v6880_v61 = vpop.xlane.xlu0 %6879 }
 0x6cc   : > { %v14208_v16 = vpop.eup %14207  ;;  %14215 = vrcp.f32 %v6880_v61  ;;  %v9173_v61 = vcombine.low %v9117_v45, %v9149_v18 }
 0x6cd   : > { %v6934_v21 = vmul.f32 %v14208_v16, %v16254_v2  ;;  %v17615_v16 = vcombine.low %v16423_v15, %v16453_v58 }
 0x6cf   : > { %13700 = vmatprep.subr.msk.mxu1 %vm6772_vm5, %v6934_v21  ;;  %v6886_v48 = vpop.xlane.xlu0 %6885 }
 0x6d0   : > { %14217 = vrcp.f32 %v6886_v48  ;;  %13701 = vmatpush3.xpose.msk.msra.mxu1 %vm6772_vm5, %v6934_v21  ;;  %v14210_v22 = vpop.eup %14209 }
 0x6d1   : > { %v6935_v49 = vmul.f32 %v14210_v22, %v16260_v26 }
 0x6d2   : > { %v14212_v5 = vpop.eup %14211 }
 0x6d3   : > { %13703 = vmatmul.mubr.msk.f32.vlgmr.msra.gmra.mrb[40].mxu1 %vm6772_vm5, %v17614_v44  ;;  %v6933_v2 = vmul.f32 %v14212_v5, %v16263_v36  ;;  %v6892_v15 = vpop.xlane.xlu0 %6891  ;;  %v9110_v5 = vcombine.high %v9053_v41, %v9069_v6 }
 0x6d4   : > { %13705 = vmatprep.mubr.msk.f32.mxu1 %vm6772_vm5, %v9174_v20  ;;  %v14214_v17 = vpop.eup %14213  ;;  %v9142_v20 = vcombine.high %v9085_v30, %v9101_v9  ;;  %v17616_v9 = vcombine.low %v16629_v24, %v16623_v55 }
 0x6d5   : > { %13692 = vmatprep.subr.msk.mxu0 %vm6772_vm5, %v6933_v2  ;;  %v16706_v36 = vmul.f32 %v14214_v17, %v16268_v34 }
 0x6d6   : > { %v14216_v3 = vpop.eup %14215  ;;  %13693 = vmatpush3.xpose.msk.msra.mxu0 %vm6772_vm5, %v6933_v2  ;;  %v16727_v2 = vrot.slane %v9110_v5, %v14673_v50  ;;  %v16730_v17 = vrot.slane %v9142_v20, %v14673_v50  ;;  %v9253_v30 = vrot.slane %v17616_v9, %v14673_v50 }
 0x6d7   : > { %13708 = vmatprep.subr.msk.mxu0 %vm6772_vm5, %v6935_v49  ;;  %v6936_v0 = vmul.f32 %v14216_v3, %v16273_v63  ;;  %v6889_v63 = vpop.xlane.xlu1 %6888  ;;  %v6898_v58 = vpop.xlane.xlu0 %6897 }
 0x6d8   : > { %14219 = vrcp.f32 %v6889_v63  ;;  %v9176_v5 = vcombine.high %v16727_v2, %v16730_v17 }
 0x6d9   : > { %13695 = vmatmul.mubr.msk.f32.vlgmr.msra.gmra.mrb[40].mxu0 %vm6772_vm5, %v17615_v16  ;;  %13716 = vmatprep.subr.msk.mxu1 %vm6772_vm5, %v6936_v0  ;;  %14221 = vrcp.f32 %v6892_v15 }
 0x6da   : > { %v14218_v21 = vpop.eup %14217  ;;  %13697 = vmatprep.mubr.msk.f32.mxu0 %vm6772_vm5, %v9173_v61  ;;  %13709 = vmatpush3.xpose.msk.msra.mxu0 %vm6772_vm5, %v6935_v49 }
 0x6db   : > { %13717 = vmatpush3.xpose.msk.msra.mxu1 %vm6772_vm5, %v6936_v0  ;;  %13724 = vmatprep.subr.msk.mxu0 %vm6772_vm5, %v16706_v36  ;;  %v16714_v26 = vmul.f32 %v14218_v21, %v16282_v23  ;;  %v6895_v34 = vpop.xlane.xlu1 %6894  ;;  %v16720_v18 = vpop.xlane.xlu0 %6903  ;;  %v9175_v21 = vcombine.low %v16727_v2, %v16730_v17 }
 0x6dc   : > { %14223 = vrcp.f32 %v6895_v34 }
 0x6dd   : > { %13732 = vmatprep.subr.msk.mxu1 %vm6772_vm5, %v16714_v26  ;;  %14225 = vrcp.f32 %v6898_v58  ;;  %v17621_v58 = vcombine.low %v16330_v25, %v16358_v28 }
 0x6df   : > { %v16718_v45 = vpop.xlane.xlu1 %6900  ;;  %v16724_v22 = vpop.xlane.xlu0 %6906 }
 0x6e0   : > { %14227 = vrcp.f32 %v16718_v45  ;;  %v17628_v45 = vcombine.low %v16632_v7, %v16626_v57 }
 0x6e1   : > { %14229 = vrcp.f32 %v16720_v18 }
 0x6e2   : > { %v9269_v18 = vrot.slane %v17628_v45, %v14673_v50  ;;  %v17656_v45 = vld [vmem:[#allocation50_spill] sm:$0xff] }
 0x6e3   : > { %v16722_v48 = vpop.xlane.xlu1 %6909 }
 0x6e4   : > { %14231 = vrcp.f32 %v16722_v48 }
 0x6e5   : > { %14233 = vrcp.f32 %v16724_v22  ;;  %v17635_v22 = vcombine.high %v16632_v7, %v16626_v57  ;;  %v17638_v7 = vld [vmem:[#allocation25_spill] sm:$0xff]  ;;  %v17639_v57 = vld [vmem:[#allocation39_spill] sm:$0xff] }
 0x6ff   : > { %v8757_v44 = vpop.trf.xlu1  ;;  %v8725_v23 = vpop.trf.xlu0 }
 0x700   : > { %v9229_v49 = vcombine.low %v16656_v47, %v8757_v44  ;;  %v9213_v3 = vcombine.low %v16668_v62, %v8725_v23  ;;  %v9230_v32 = vcombine.high %v16656_v47, %v8757_v44  ;;  %v17618_v47 = vcombine.low %v16651_v12, %v16645_v35 }
 0x702   : > { %v9237_v0 = vrot.slane %v9229_v49, %v14632_v37  ;;  %v9221_v61 = vrot.slane %v9213_v3, %v14632_v37  ;;  %v17617_v3 = vcombine.high %v16629_v24, %v16623_v55  ;;  %v16763_v44 = vrot.slane %v17618_v47, %v14673_v50 }
 0x703   : > { %v8758_v41 = vpop.trf.xlu1  ;;  %v8726_v6 = vpop.trf.xlu0  ;;  %v17631_v47 = vcombine.low %v16553_v38, %v16561_v4 }
 0x704   : > { %v9277_v16 = vcombine.low %v9221_v61, %v9237_v0  ;;  %v9773_v63 = vcombine.low %v16666_v59, %v8758_v41  ;;  %v9774_v15 = vcombine.high %v16666_v59, %v8758_v41  ;;  %v9757_v20 = vcombine.low %v16672_v40, %v8726_v6 }
 0x705   : > { %v9758_v49 = vcombine.high %v16672_v40, %v8726_v6  ;;  %v9260_v9 = vrot.slane %v17617_v3, %v14673_v50  ;;  %v9214_v40 = vcombine.high %v16668_v62, %v8725_v23  ;;  %v9278_v6 = vcombine.high %v9221_v61, %v9237_v0  ;;  %v14220_v23 = vpop.eup %14219 }
 0x706   : > { %v9285_v53 = vrot.slane %v9277_v16, %v14673_v50  ;;  %v9781_v2 = vrot.slane %v9773_v63, %v14632_v37  ;;  %v9788_v17 = vrot.slane %v9774_v15, %v14632_v37  ;;  %v9765_v59 = vrot.slane %v9757_v20, %v14632_v37 }
 0x707   : > { %v9772_v41 = vrot.slane %v9758_v49, %v14632_v37  ;;  %v17619_v16 = vcombine.high %v16651_v12, %v16645_v35  ;;  %v9244_v15 = vrot.slane %v9230_v32, %v14632_v37  ;;  %v9228_v20 = vrot.slane %v9214_v40, %v14632_v37 }
 0x708   : > { %v9309_v60 = vcombine.low %v9253_v30, %v9285_v53  ;;  %v9310_v13 = vcombine.high %v9253_v30, %v9285_v53  ;;  %v9821_v24 = vcombine.low %v9765_v59, %v9781_v2  ;;  %v9822_v55 = vcombine.high %v9765_v59, %v9781_v2 }
 0x709   : > { %v9837_v34 = vcombine.low %v9772_v41, %v9788_v17  ;;  %v9838_v3 = vcombine.high %v9772_v41, %v9788_v17  ;;  %v16769_v63 = vrot.slane %v17619_v16, %v14673_v50  ;;  %v17620_v53 = vcombine.low %v16654_v56, %v16648_v33 }
 0x70a   : > { %13698 = vmatmul.mubr.msk.f32.gmra.mrb[42].mxu0 %vm6772_vm5, %v9309_v60  ;;  %13706 = vmatmul.mubr.msk.f32.gmra.mrb[42].mxu1 %vm6772_vm5, %v9310_v13  ;;  %v16780_v0 = vrot.slane %v9821_v24, %v14673_v50  ;;  %v16783_v61 = vrot.slane %v9822_v55, %v14673_v50  ;;  %v14222_v60 = vpop.eup %14221  ;;  %v17622_v13 = vcombine.high %v16654_v56, %v16648_v33 }
 0x70b   : > { %v16775_v62 = vrot.slane %v17620_v53, %v14673_v50  ;;  %v16786_v35 = vrot.slane %v9837_v34, %v14673_v50  ;;  %v16789_v12 = vrot.slane %v9838_v3, %v14673_v50  ;;  %13710 = vmatprep.mubr.msk.f32.mxu0 %vm6772_vm5, %v17621_v58  ;;  %v9292_v49 = vrot.slane %v9278_v6, %v14673_v50  ;;  %v14224_v24 = vpop.eup %14223 }
 0x70c   : > { %v16799_v30 = vrot.slane %v17622_v13, %v14673_v50  ;;  %v17623_v2 = vcombine.high %v16330_v25, %v16358_v28  ;;  %v9853_v17 = vcombine.low %v16763_v44, %v16780_v0  ;;  %v9854_v59 = vcombine.high %v16763_v44, %v16780_v0  ;;  %v17664_v0 = vld [vmem:[#allocation44_spill] sm:$0xff] }
 0x70d   : > { %v9855_v33 = vcombine.low %v16769_v63, %v16783_v61  ;;  %v9856_v32 = vcombine.high %v16769_v63, %v16783_v61  ;;  %v17624_v56 = vcombine.low %v16426_v1, %v16456_v52  ;;  %v17625_v25 = vcombine.high %v16426_v1, %v16456_v52 }
 0x70e   : > { %13718 = vmatprep.mubr.msk.f32.mxu1 %vm6772_vm5, %v17623_v2  ;;  %v9857_v28 = vcombine.low %v16775_v62, %v16786_v35  ;;  %v9858_v41 = vcombine.high %v16775_v62, %v16786_v35  ;;  %v9860_v40 = vcombine.high %v16799_v30, %v16789_v12  ;;  %v6939_v6 = vmul.f32 %v14220_v23, %v16278_v29  ;;  %v17685_v35 = vld [vmem:[#allocation34_spill] sm:$0xff] }
 0x70f   : > { %13711 = vmatmul.mubr.msk.f32.vlgmr.msra.gmra.mrb[44].mxu0 %vm6772_vm5, %v17624_v56  ;;  %13719 = vmatmul.mubr.msk.f32.vlgmr.msra.gmra.mrb[44].mxu1 %vm6772_vm5, %v17625_v25  ;;  %v6940_v1 = vmul.f32 %v14222_v60, %v16294_v11  ;;  %v9859_v52 = vcombine.low %v16799_v30, %v16789_v12  ;;  %v9293_v55 = vcombine.low %v9228_v20, %v9244_v15  ;;  %v17646_v56 = vld [vmem:[#allocation24_spill] sm:$0xff] }
 0x710   : > { %13725 = vmatpush3.xpose.msk.msra.mxu0 %vm6772_vm5, %v16706_v36  ;;  %13733 = vmatpush3.xpose.msk.msra.mxu1 %vm6772_vm5, %v16714_v26  ;;  %v9311_v34 = vcombine.low %v9260_v9, %v9292_v49  ;;  %v9312_v3 = vcombine.high %v9260_v9, %v9292_v49  ;;  %v17626_v29 = vcombine.low %v16333_v54, %v16361_v39  ;;  %v14226_v36 = vpop.eup %14225  ;;  %v17647_v25 = vld [vmem:[#allocation36_spill] sm:$0xff] }
 0x711   : > { %13713 = vmatprep.mubr.msk.f32.mxu0 %vm6772_vm5, %v9175_v21  ;;  %13721 = vmatprep.mubr.msk.f32.mxu1 %vm6772_vm5, %v9176_v5  ;;  %v17627_v11 = vcombine.high %v16333_v54, %v16361_v39  ;;  %v9301_v26 = vrot.slane %v9293_v55, %v14673_v50  ;;  %v17629_v21 = vcombine.low %v16429_v19, %v16459_v31 }
 0x712   : > { %13740 = vmatprep.subr.msk.mxu0 %vm6772_vm5, %v6939_v6  ;;  %13748 = vmatprep.subr.msk.mxu1 %vm6772_vm5, %v6940_v1  ;;  %v17630_v5 = vcombine.high %v16429_v19, %v16459_v31  ;;  %v6941_v54 = vmul.f32 %v14224_v24, %v16290_v10  ;;  %v6942_v39 = vmul.f32 %v14226_v36, %v16302_v27  ;;  %v14228_v10 = vpop.eup %14227  ;;  %v17650_v24 = vld [vmem:[#allocation46_spill] sm:$0xff] }
 0x713   : > { %13714 = vmatmul.mubr.msk.f32.gmra.mrb[46].mxu0 %vm6772_vm5, %v9311_v34  ;;  %13722 = vmatmul.mubr.msk.f32.gmra.mrb[46].mxu1 %vm6772_vm5, %v9312_v3  ;;  %v9294_v9 = vcombine.high %v9228_v20, %v9244_v15  ;;  %v17632_v16 = vcombine.high %v16553_v38, %v16561_v4  ;;  %v9313_v19 = vcombine.low %v9269_v18, %v9301_v26  ;;  %v14230_v4 = vpop.eup %14229  ;;  %v17643_v15 = vld [vmem:[#allocation23_spill] sm:$0xff]  ;;  %v17651_v34 = vld [vmem:[#allocation49_spill] sm:$0xff] }
 0x714   : > { %13726 = vmatprep.mubr.msk.f32.mxu0 %vm6772_vm5, %v17626_v29  ;;  %13734 = vmatprep.mubr.msk.f32.mxu1 %vm6772_vm5, %v17627_v11  ;;  %v9314_v31 = vcombine.high %v9269_v18, %v9301_v26  ;;  %v17633_v27 = vcombine.low %v16336_v42, %v16364_v43  ;;  %v17634_v38 = vcombine.high %v16336_v42, %v16364_v43  ;;  %v17652_v29 = vld [vmem:[#allocation37_spill] sm:$0xff]  ;;  %v17653_v11 = vld [vmem:[#allocation52_spill] sm:$0xff]  ;;  %v17657_v18 = vld [vmem:[#allocation19_spill] sm:$0xff] }
 0x715   : > { %v9308_v48 = vrot.slane %v9294_v9, %v14673_v50  ;;  %v9276_v53 = vrot.slane %v17635_v22, %v14673_v50  ;;  %v17636_v23 = vcombine.low %v16436_v51, %v16462_v46  ;;  %v17637_v58 = vcombine.high %v16436_v51, %v16462_v46 }
 0x716   : > { %v6943_v42 = vmul.f32 %v14228_v10, %v16298_v8  ;;  %v6944_v43 = vmul.f32 %v14230_v4, %v16310_v14  ;;  %v17640_v60 = vcombine.low %v17638_v7, %v17639_v57  ;;  %v17641_v13 = vcombine.high %v17638_v7, %v17639_v57  ;;  %v14232_v8 = vpop.eup %14231  ;;  %v17642_v14 = vld [vmem:[#allocation47_spill] sm:$0xff]  ;;  %v17684_v57 = vld [vmem:[#allocation38_spill] sm:$0xff] }
 0x717   : > { %13727 = vmatmul.mubr.msk.f32.vlgmr.msra.gmra.mrb[48].mxu0 %vm6772_vm5, %v17629_v21  ;;  %13735 = vmatmul.mubr.msk.f32.vlgmr.msra.gmra.mrb[48].mxu1 %vm6772_vm5, %v17630_v5  ;;  %v9315_v51 = vcombine.low %v9276_v53, %v9308_v48  ;;  %v9316_v46 = vcombine.high %v9276_v53, %v9308_v48  ;;  %v17644_v20 = vcombine.low %v17642_v14, %v17643_v15  ;;  %v14234_v2 = vpop.eup %14233  ;;  %v17680_v53 = vld [vmem:[#allocation21_spill] sm:$0xff] }
 0x718   : > { %13741 = vmatpush3.xpose.msk.msra.mxu0 %vm6772_vm5, %v6939_v6  ;;  %13749 = vmatpush3.xpose.msk.msra.mxu1 %vm6772_vm5, %v6940_v1  ;;  %v17645_v49 = vcombine.high %v17642_v14, %v17643_v15  ;;  %v17648_v6 = vcombine.low %v17646_v56, %v17647_v25  ;;  %v17649_v1 = vcombine.high %v17646_v56, %v17647_v25 }
 0x719   : > { %13729 = vmatprep.mubr.msk.f32.mxu0 %vm6772_vm5, %v17631_v47  ;;  %13737 = vmatprep.mubr.msk.f32.mxu1 %vm6772_vm5, %v17632_v16  ;;  %v6945_v55 = vmul.f32 %v14234_v2, %v17650_v24  ;;  %v6946_v3 = vmul.f32 %v14232_v8, %v17651_v34  ;;  %v17654_v36 = vcombine.low %v17652_v29, %v17653_v11  ;;  %v17668_v16 = vld [vmem:[#allocation43_spill] sm:$0xff]  ;;  %v17690_v8 = vld [vmem:[#allocation28_spill] sm:$0xff] }
 0x71a   : > { %13756 = vmatprep.subr.msk.mxu0 %vm6772_vm5, %v6941_v54  ;;  %13764 = vmatprep.subr.msk.mxu1 %vm6772_vm5, %v6942_v39  ;;  %v17655_v26 = vcombine.high %v17652_v29, %v17653_v11  ;;  %v17658_v21 = vcombine.low %v17656_v45, %v17657_v18  ;;  %v17659_v5 = vcombine.high %v17656_v45, %v17657_v18 }
 0x71b   : > { %13730 = vmatmul.mubr.msk.f32.gmra.mrb[50].mxu0 %vm6772_vm5, %v9313_v19  ;;  %13738 = vmatmul.mubr.msk.f32.gmra.mrb[50].mxu1 %vm6772_vm5, %v9314_v31  ;;  %v17669_v19 = vld [vmem:[#allocation20_spill] sm:$0xff] }
 0x71c   : > { %13742 = vmatprep.mubr.msk.f32.mxu0 %vm6772_vm5, %v17633_v27  ;;  %13750 = vmatprep.mubr.msk.f32.mxu1 %vm6772_vm5, %v17634_v38  ;;  %v17670_v31 = vcombine.low %v17668_v16, %v17669_v19  ;;  %v17671_v10 = vcombine.high %v17668_v16, %v17669_v19  ;;  %v17672_v27 = vld [vmem:[#allocation35_spill] sm:$0xff]  ;;  %v17673_v38 = vld [vmem:[#allocation30_spill] sm:$0xff] }
 0x71d   : > { %v17674_v4 = vcombine.low %v17672_v27, %v17673_v38  ;;  %v17675_v63 = vcombine.high %v17672_v27, %v17673_v38 }
 0x71f   : > { %13743 = vmatmul.mubr.msk.f32.vlgmr.msra.gmra.mrb[52].mxu0 %vm6772_vm5, %v17636_v23  ;;  %13751 = vmatmul.mubr.msk.f32.vlgmr.msra.gmra.mrb[52].mxu1 %vm6772_vm5, %v17637_v58  ;;  %v17681_v23 = vld [vmem:[#allocation22_spill] sm:$0xff] }
 0x720   : > { %13757 = vmatpush3.xpose.msk.msra.mxu0 %vm6772_vm5, %v6941_v54  ;;  %13765 = vmatpush3.xpose.msk.msra.mxu1 %vm6772_vm5, %v6942_v39  ;;  %v17660_v54 = vld [vmem:[#allocation33_spill] sm:$0xff]  ;;  %v17661_v39 = vld [vmem:[#allocation32_spill] sm:$0xff]  ;;  %v17682_v58 = vcombine.low %v17680_v53, %v17681_v23 }
 0x721   : > { %13745 = vmatprep.mubr.msk.f32.mxu0 %vm6772_vm5, %v17640_v60  ;;  %13753 = vmatprep.mubr.msk.f32.mxu1 %vm6772_vm5, %v17641_v13  ;;  %v17662_v9 = vcombine.low %v17660_v54, %v17661_v39  ;;  %v17663_v44 = vcombine.high %v17660_v54, %v17661_v39  ;;  %v17688_v13 = vld [vmem:[#allocation54_spill] sm:$0xff] }
 0x722   : > { %13772 = vmatprep.subr.msk.mxu0 %vm6772_vm5, %v6943_v42  ;;  %13780 = vmatprep.subr.msk.mxu1 %vm6772_vm5, %v6944_v43 }
 0x723   : > { %13746 = vmatmul.mubr.msk.f32.gmra.mrb[54].mxu0 %vm6772_vm5, %v9315_v51  ;;  %13754 = vmatmul.mubr.msk.f32.gmra.mrb[54].mxu1 %vm6772_vm5, %v9316_v46  ;;  %v17689_v46 = vld [vmem:[#allocation40_spill] sm:$0xff] }
 0x724   : > { %13758 = vmatprep.mubr.msk.f32.mxu0 %vm6772_vm5, %v17644_v20  ;;  %13766 = vmatprep.mubr.msk.f32.mxu1 %vm6772_vm5, %v17645_v49  ;;  %v17691_v14 = vcombine.high %v17689_v46, %v17690_v8  ;;  %v17693_v20 = vcombine.low %v17689_v46, %v17690_v8 }
 0x727   : > { %13759 = vmatmul.mubr.msk.f32.vlgmr.msra.gmra.mrb[56].mxu0 %vm6772_vm5, %v17648_v6  ;;  %13767 = vmatmul.mubr.msk.f32.vlgmr.msra.gmra.mrb[56].mxu1 %vm6772_vm5, %v17649_v1 }
 0x728   : > { %13773 = vmatpush3.xpose.msk.msra.mxu0 %vm6772_vm5, %v6943_v42  ;;  %13781 = vmatpush3.xpose.msk.msra.mxu1 %vm6772_vm5, %v6944_v43  ;;  %v17683_v42 = vcombine.high %v17680_v53, %v17681_v23 }
 0x729   : > { %13761 = vmatprep.mubr.msk.f32.mxu0 %vm6772_vm5, %v17654_v36  ;;  %13769 = vmatprep.mubr.msk.f32.mxu1 %vm6772_vm5, %v17655_v26 }
 0x72a   : > { %13788 = vmatprep.subr.msk.mxu0 %vm6772_vm5, %v6945_v55  ;;  %13796 = vmatprep.subr.msk.mxu1 %vm6772_vm5, %v6946_v3 }
 0x72b   : > { %13762 = vmatmul.mubr.msk.f32.gmra.mrb[58].mxu0 %vm6772_vm5, %v9853_v17  ;;  %13770 = vmatmul.mubr.msk.f32.gmra.mrb[58].mxu1 %vm6772_vm5, %v9854_v59  ;;  %v17665_v17 = vld [vmem:[#allocation53_spill] sm:$0xff] }
 0x72c   : > { %13774 = vmatprep.mubr.msk.f32.mxu0 %vm6772_vm5, %v17658_v21  ;;  %13782 = vmatprep.mubr.msk.f32.mxu1 %vm6772_vm5, %v17659_v5  ;;  %v17666_v59 = vcombine.low %v17664_v0, %v17665_v17  ;;  %v17667_v47 = vcombine.high %v17664_v0, %v17665_v17 }
 0x72f   : > { %13775 = vmatmul.mubr.msk.f32.vlgmr.msra.gmra.mrb[60].mxu0 %vm6772_vm5, %v17662_v9  ;;  %13783 = vmatmul.mubr.msk.f32.vlgmr.msra.gmra.mrb[60].mxu1 %vm6772_vm5, %v17663_v44 }
 0x730   : > { %13789 = vmatpush3.xpose.msk.msra.mxu0 %vm6772_vm5, %v6945_v55  ;;  %13797 = vmatpush3.xpose.msk.msra.mxu1 %vm6772_vm5, %v6946_v3 }
 0x731   : > { %13777 = vmatprep.mubr.msk.f32.mxu0 %vm6772_vm5, %v17666_v59  ;;  %13785 = vmatprep.mubr.msk.f32.mxu1 %vm6772_vm5, %v17667_v47 }
 0x733   : > { %13778 = vmatmul.mubr.msk.f32.gmra.mrb[62].mxu0 %vm6772_vm5, %v9855_v33  ;;  %13786 = vmatmul.mubr.msk.f32.gmra.mrb[62].mxu1 %vm6772_vm5, %v9856_v32  ;;  %v17676_v33 = vld [vmem:[#allocation51_spill] sm:$0xff]  ;;  %v17677_v32 = vld [vmem:[#allocation26_spill] sm:$0xff] }
 0x734   : > { %13790 = vmatprep.mubr.msk.f32.mxu0 %vm6772_vm5, %v17670_v31  ;;  %13798 = vmatprep.mubr.msk.f32.mxu1 %vm6772_vm5, %v17671_v10  ;;  %v17678_v48 = vcombine.low %v17676_v33, %v17677_v32  ;;  %v17679_v22 = vcombine.high %v17676_v33, %v17677_v32 }
 0x737   : > { %13791 = vmatmul.mubr.msk.f32.vlgmr.msra.gmra.mrb[64].mxu0 %vm6772_vm5, %v17674_v4  ;;  %13799 = vmatmul.mubr.msk.f32.vlgmr.msra.gmra.mrb[64].mxu1 %vm6772_vm5, %v17675_v63  ;;  %v6916_v61 = vpop.xlane.xlu1 %6915 }
 0x738   : > { %13793 = vmatprep.mubr.msk.f32.mxu0 %vm6772_vm5, %v17678_v48  ;;  %13801 = vmatprep.mubr.msk.f32.mxu1 %vm6772_vm5, %v17679_v22  ;;  %14235 = vrcp.f32 %v6916_v61 }
 0x73b   : > { %13794 = vmatmul.mubr.msk.f32.gmra.mrb[66].mxu0 %vm6772_vm5, %v9857_v28  ;;  %13802 = vmatmul.mubr.msk.f32.gmra.mrb[66].mxu1 %vm6772_vm5, %v9858_v41  ;;  %v17686_v41 = vld [vmem:[#allocation31_spill] sm:$0xff] }
 0x73c   : > { %13806 = vmatprep.mubr.msk.f32.mxu0 %vm6772_vm5, %v17682_v58  ;;  %13814 = vmatprep.mubr.msk.f32.mxu1 %vm6772_vm5, %v17683_v42  ;;  %v17687_v60 = vcombine.high %v17685_v35, %v17686_v41  ;;  %v17692_v15 = vcombine.low %v17685_v35, %v17686_v41 }
 0x73d   : > { %v6913_v43 = vpop.xlane.xlu0 %6912 }
 0x73e   : > { %14237 = vrcp.f32 %v6913_v43 }
 0x742   : > { %v14236_v7 = vpop.eup %14235 }
 0x743   : > { %v6948_v28 = vmul.f32 %v14236_v7, %v17684_v57 }
 0x745   : > { %13812 = vmatprep.subr.msk.mxu1 %vm6772_vm5, %v6948_v28 }
 0x746   : > { %13813 = vmatpush3.xpose.msk.msra.mxu1 %vm6772_vm5, %v6948_v28 }
 0x748   : > { %v14238_v62 = vpop.eup %14237 }
 0x749   : > { %13815 = vmatmul.mubr.msk.f32.vlgmr.msra.gmra.mrb[68].mxu1 %vm6772_vm5, %v17687_v60  ;;  %v6947_v51 = vmul.f32 %v14238_v62, %v17688_v13 }
 0x74a   : > { %13817 = vmatprep.mubr.msk.f32.mxu1 %vm6772_vm5, %v17691_v14 }
 0x74b   : > { %13804 = vmatprep.subr.msk.mxu0 %vm6772_vm5, %v6947_v51 }
 0x74c   : > { %13805 = vmatpush3.xpose.msk.msra.mxu0 %vm6772_vm5, %v6947_v51 }
 0x74d   : > { %13818 = vmatmul.mubr.msk.f32.gmra.mrb[70].mxu1 %vm6772_vm5, %v9860_v40 }
 0x74f   : > { %13807 = vmatmul.mubr.msk.f32.vlgmr.msra.gmra.mrb[68].mxu0 %vm6772_vm5, %v17692_v15 }
 0x750   : > { %13809 = vmatprep.mubr.msk.f32.mxu0 %vm6772_vm5, %v17693_v20 }
 0x753   : > { %13810 = vmatmul.mubr.msk.f32.gmra.mrb[70].mxu0 %vm6772_vm5, %v9859_v52 }
 0x7a6   : > { %v13704_v49 = vpop.f32.mrb[40].mxu1 }
 0x7a7   : > { %v10042_v2 = vpop.f32.mrb[41].mxu1 }
 0x7a8   : > { %11493 = vxpose.xlu0.b32.start [1/4] (short) (narrow) %v10042_v2, 8 }
 0x7ac   : > { %11494 = vxpose.xlu0.b32.cont [2/4] (short) (narrow) %v13704_v49, 8  ;;  %v13696_v40 = vpop.f32.mrb[40].mxu0 }
 0x7ad   : > { %v9942_v56 = vpop.f32.mrb[41].mxu0 }
 0x7ae   : > { %11461 = vxpose.xlu1.b32.start [1/4] (short) (narrow) %v9942_v56, 8  ;;  %v12246_v56 = vld [vmem:[%s17295_s5 + $0x8] sm:$0xff] }
 0x7b2   : > { %11462 = vxpose.xlu1.b32.cont [2/4] (short) (narrow) %v13696_v40, 8  ;;  %v12245_v40 = vld [vmem:[%s17295_s5] sm:$0xff] }
 0x7dd   : > { %v13699_v25 = vpop.f32.mrb[42].mxu0  ;;  %v13707_v6 = vpop.f32.mrb[42].mxu1 }
 0x7de   : > { %v9952_v1 = vpop.f32.mrb[43].mxu0  ;;  %v10052_v24 = vpop.f32.mrb[43].mxu1 }
 0x7df   : > { %11495 = vxpose.xlu0.b32.cont [3/4] (short) (narrow) %v10052_v24, 8  ;;  %11463 = vxpose.xlu1.b32.cont [3/4] (short) (narrow) %v9952_v1, 8  ;;  %v12248_v1 = vld [vmem:[%s17295_s5 + $0x18] sm:$0xff] }
 0x7e2   : > { %v13712_v55 = vpop.f32.mrb[44].mxu0  ;;  %v13720_v34 = vpop.f32.mrb[44].mxu1 }
 0x7e3   : > { %v10142_v3 = vpop.f32.mrb[45].mxu0  ;;  %v10242_v12 = vpop.f32.mrb[45].mxu1  ;;  %11496 = vxpose.xlu0.b32.end [4/4] (short) (narrow) %v13707_v6, 8  ;;  %11464 = vxpose.xlu1.b32.end [4/4] (short) (narrow) %v13699_v25, 8  ;;  %v12247_v25 = vld [vmem:[%s17295_s5 + $0x10] sm:$0xff]  ;;  %v14060_v6 = vpack.c.bf16 %v12246_v56, %v12245_v40 }
 0x7e4   : > { %v14064_v24 = vpack.c.bf16 %v12248_v1, %v12247_v25 }
 0x7e5   : > { %14061 = vmatprep.subr.bf16.mxu0 %v14060_v6  ;;  %14068 = vmatprep.subr.bf16.mxu1 %v14060_v6 }
 0x7e6   : > { %v13715_v30 = vpop.f32.mrb[46].mxu0  ;;  %v13723_v52 = vpop.f32.mrb[46].mxu1  ;;  %14063 = vmatpush3.bf16.msra.mxu0 %v14060_v6  ;;  %14070 = vmatpush3.bf16.msra.mxu1 %v14060_v6 }
 0x7e7   : > { %v10152_v29 = vpop.f32.mrb[47].mxu0  ;;  %v10252_v11 = vpop.f32.mrb[47].mxu1  ;;  %11557 = vxpose.xlu1.b32.start [1/4] (short) (narrow) %v10242_v12, 8  ;;  %11525 = vxpose.xlu0.b32.start [1/4] (short) (narrow) %v10142_v3, 8 }
 0x7e8   : > { %14065 = vmatprep.subr.bf16.mxu0 %v14064_v24  ;;  %14069 = vmatprep.subr.bf16.mxu1 %v14064_v24 }
 0x7ea   : > { %v13728_v36 = vpop.f32.mrb[48].mxu0  ;;  %v13736_v26 = vpop.f32.mrb[48].mxu1  ;;  %14067 = vmatpush3.bf16.msra.mxu0 %v14064_v24  ;;  %14071 = vmatpush3.bf16.msra.mxu1 %v14064_v24 }
 0x7eb   : > { %v10342_v45 = vpop.f32.mrb[49].mxu0  ;;  %v10442_v18 = vpop.f32.mrb[49].mxu1  ;;  %11558 = vxpose.xlu1.b32.cont [2/4] (short) (narrow) %v13720_v34, 8  ;;  %11526 = vxpose.xlu0.b32.cont [2/4] (short) (narrow) %v13712_v55, 8 }
 0x7ee   : > { %v13731_v21 = vpop.f32.mrb[50].mxu0  ;;  %v13739_v5 = vpop.f32.mrb[50].mxu1 }
 0x7ef   : > { %v10352_v54 = vpop.f32.mrb[51].mxu0  ;;  %v10452_v39 = vpop.f32.mrb[51].mxu1  ;;  %11559 = vxpose.xlu1.b32.cont [3/4] (short) (narrow) %v10252_v11, 8  ;;  %11527 = vxpose.xlu0.b32.cont [3/4] (short) (narrow) %v10152_v29, 8 }
 0x7f2   : > { %v13744_v9 = vpop.f32.mrb[52].mxu0  ;;  %v13752_v44 = vpop.f32.mrb[52].mxu1 }
 0x7f3   : > { %v10542_v0 = vpop.f32.mrb[53].mxu0  ;;  %v10642_v17 = vpop.f32.mrb[53].mxu1  ;;  %11560 = vxpose.xlu1.b32.end [4/4] (short) (narrow) %v13723_v52, 8  ;;  %11528 = vxpose.xlu0.b32.end [4/4] (short) (narrow) %v13715_v30, 8 }
 0x7f6   : > { %v13747_v59 = vpop.f32.mrb[54].mxu0  ;;  %v13755_v47 = vpop.f32.mrb[54].mxu1 }
 0x7f7   : > { %v10552_v16 = vpop.f32.mrb[55].mxu0  ;;  %v10652_v19 = vpop.f32.mrb[55].mxu1  ;;  %11621 = vxpose.xlu1.b32.start [1/4] (short) (narrow) %v10442_v18, 8  ;;  %11589 = vxpose.xlu0.b32.start [1/4] (short) (narrow) %v10342_v45, 8 }
 0x7fa   : > { %v13760_v31 = vpop.f32.mrb[56].mxu0  ;;  %v13768_v10 = vpop.f32.mrb[56].mxu1 }
 0x7fb   : > { %v10742_v27 = vpop.f32.mrb[57].mxu0  ;;  %v10842_v38 = vpop.f32.mrb[57].mxu1  ;;  %11622 = vxpose.xlu1.b32.cont [2/4] (short) (narrow) %v13736_v26, 8  ;;  %11590 = vxpose.xlu0.b32.cont [2/4] (short) (narrow) %v13728_v36, 8 }
 0x7fe   : > { %v13763_v4 = vpop.f32.mrb[58].mxu0  ;;  %v13771_v63 = vpop.f32.mrb[58].mxu1 }
 0x7ff   : > { %v10752_v61 = vpop.f32.mrb[59].mxu0  ;;  %v10852_v33 = vpop.f32.mrb[59].mxu1  ;;  %11623 = vxpose.xlu1.b32.cont [3/4] (short) (narrow) %v10452_v39, 8  ;;  %11591 = vxpose.xlu0.b32.cont [3/4] (short) (narrow) %v10352_v54, 8 }
 0x802   : > { %v13776_v32 = vpop.f32.mrb[60].mxu0  ;;  %v13784_v48 = vpop.f32.mrb[60].mxu1 }
 0x803   : > { %v10942_v22 = vpop.f32.mrb[61].mxu0  ;;  %v11042_v53 = vpop.f32.mrb[61].mxu1  ;;  %11624 = vxpose.xlu1.b32.end [4/4] (short) (narrow) %v13739_v5, 8  ;;  %11592 = vxpose.xlu0.b32.end [4/4] (short) (narrow) %v13731_v21, 8 }
 0x806   : > { %v13779_v23 = vpop.f32.mrb[62].mxu0  ;;  %v13787_v58 = vpop.f32.mrb[62].mxu1 }
 0x807   : > { %v10952_v42 = vpop.f32.mrb[63].mxu0  ;;  %v11052_v43 = vpop.f32.mrb[63].mxu1  ;;  %11685 = vxpose.xlu1.b32.start [1/4] (short) (narrow) %v10642_v17, 8  ;;  %11653 = vxpose.xlu0.b32.start [1/4] (short) (narrow) %v10542_v0, 8 }
 0x80a   : > { %v13792_v7 = vpop.f32.mrb[64].mxu0  ;;  %v13800_v57 = vpop.f32.mrb[64].mxu1 }
 0x80b   : > { %v11142_v28 = vpop.f32.mrb[65].mxu0  ;;  %v11242_v62 = vpop.f32.mrb[65].mxu1  ;;  %11686 = vxpose.xlu1.b32.cont [2/4] (short) (narrow) %v13752_v44, 8  ;;  %11654 = vxpose.xlu0.b32.cont [2/4] (short) (narrow) %v13744_v9, 8 }
 0x80e   : > { %v13795_v35 = vpop.f32.mrb[66].mxu0  ;;  %v13803_v41 = vpop.f32.mrb[66].mxu1 }
 0x80f   : > { %v11152_v60 = vpop.f32.mrb[67].mxu0  ;;  %v11252_v13 = vpop.f32.mrb[67].mxu1  ;;  %11687 = vxpose.xlu1.b32.cont [3/4] (short) (narrow) %v10652_v19, 8  ;;  %11655 = vxpose.xlu0.b32.cont [3/4] (short) (narrow) %v10552_v16, 8 }
 0x813   : > { %11688 = vxpose.xlu1.b32.end [4/4] (short) (narrow) %v13755_v47, 8  ;;  %11656 = vxpose.xlu0.b32.end [4/4] (short) (narrow) %v13747_v59, 8 }
 0x817   : > { %11749 = vxpose.xlu1.b32.start [1/4] (short) (narrow) %v10842_v38, 8  ;;  %11717 = vxpose.xlu0.b32.start [1/4] (short) (narrow) %v10742_v27, 8 }
 0x81b   : > { %11750 = vxpose.xlu1.b32.cont [2/4] (short) (narrow) %v13768_v10, 8  ;;  %11718 = vxpose.xlu0.b32.cont [2/4] (short) (narrow) %v13760_v31, 8 }
 0x81c   : > { %v13816_v51 = vpop.f32.mrb[68].mxu1 }
 0x81d   : > { %v11442_v46 = vpop.f32.mrb[69].mxu1 }
 0x81f   : > { %11751 = vxpose.xlu1.b32.cont [3/4] (short) (narrow) %v10852_v33, 8  ;;  %11719 = vxpose.xlu0.b32.cont [3/4] (short) (narrow) %v10752_v61, 8 }
 0x820   : > { %v13819_v8 = vpop.f32.mrb[70].mxu1 }
 0x821   : > { %v11452_v14 = vpop.f32.mrb[71].mxu1 }
 0x822   : > { %v13808_v15 = vpop.f32.mrb[68].mxu0 }
 0x823   : > { %11752 = vxpose.xlu1.b32.end [4/4] (short) (narrow) %v13771_v63, 8  ;;  %11720 = vxpose.xlu0.b32.end [4/4] (short) (narrow) %v13763_v4, 8  ;;  %v11342_v20 = vpop.f32.mrb[69].mxu0 }
 0x826   : > { %v13811_v49 = vpop.f32.mrb[70].mxu0 }
 0x827   : > { %11813 = vxpose.xlu1.b32.start [1/4] (short) (narrow) %v11042_v53, 8  ;;  %11781 = vxpose.xlu0.b32.start [1/4] (short) (narrow) %v10942_v22, 8  ;;  %v11352_v2 = vpop.f32.mrb[71].mxu0 }
 0x82b   : > { %11814 = vxpose.xlu1.b32.cont [2/4] (short) (narrow) %v13784_v48, 8  ;;  %11782 = vxpose.xlu0.b32.cont [2/4] (short) (narrow) %v13776_v32, 8 }
 0x82f   : > { %11815 = vxpose.xlu1.b32.cont [3/4] (short) (narrow) %v11052_v43, 8  ;;  %11783 = vxpose.xlu0.b32.cont [3/4] (short) (narrow) %v10952_v42, 8 }
 0x833   : > { %11816 = vxpose.xlu1.b32.end [4/4] (short) (narrow) %v13787_v58, 8  ;;  %11784 = vxpose.xlu0.b32.end [4/4] (short) (narrow) %v13779_v23, 8 }
 0x837   : > { %11877 = vxpose.xlu1.b32.start [1/4] (short) (narrow) %v11242_v62, 8  ;;  %11845 = vxpose.xlu0.b32.start [1/4] (short) (narrow) %v11142_v28, 8 }
 0x83b   : > { %11878 = vxpose.xlu1.b32.cont [2/4] (short) (narrow) %v13800_v57, 8  ;;  %11846 = vxpose.xlu0.b32.cont [2/4] (short) (narrow) %v13792_v7, 8 }
 0x83f   : > { %11879 = vxpose.xlu1.b32.cont [3/4] (short) (narrow) %v11252_v13, 8  ;;  %11847 = vxpose.xlu0.b32.cont [3/4] (short) (narrow) %v11152_v60, 8 }
 0x843   : > { %11880 = vxpose.xlu1.b32.end [4/4] (short) (narrow) %v13803_v41, 8  ;;  %11848 = vxpose.xlu0.b32.end [4/4] (short) (narrow) %v13795_v35, 8 }
 0x847   : > { %11941 = vxpose.xlu1.b32.start [1/4] (short) (narrow) %v11442_v46, 8  ;;  %11909 = vxpose.xlu0.b32.start [1/4] (short) (narrow) %v11342_v20, 8 }
 0x84b   : > { %11942 = vxpose.xlu1.b32.cont [2/4] (short) (narrow) %v13816_v51, 8  ;;  %11910 = vxpose.xlu0.b32.cont [2/4] (short) (narrow) %v13808_v15, 8 }
 0x84f   : > { %11943 = vxpose.xlu1.b32.cont [3/4] (short) (narrow) %v11452_v14, 8  ;;  %11911 = vxpose.xlu0.b32.cont [3/4] (short) (narrow) %v11352_v2, 8 }
 0x853   : > { %11944 = vxpose.xlu1.b32.end [4/4] (short) (narrow) %v13819_v8, 8  ;;  %11912 = vxpose.xlu0.b32.end [4/4] (short) (narrow) %v13811_v49, 8 }
 0x857   : > { %v11477_v55 = vpop.trf.xlu1  ;;  %v11509_v34 = vpop.trf.xlu0 }
 0x867   : > { %v11573_v3 = vpop.trf.xlu1  ;;  %v11541_v12 = vpop.trf.xlu0 }
 0x868   : > { %v11989_v30 = vcombine.low %v11509_v34, %v11573_v3  ;;  %v11990_v52 = vcombine.high %v11509_v34, %v11573_v3  ;;  %v11973_v29 = vcombine.low %v11477_v55, %v11541_v12  ;;  %v11974_v11 = vcombine.high %v11477_v55, %v11541_v12 }
 0x86a   : > { %v11997_v36 = vrot.slane %v11989_v30, %v14632_v37  ;;  %v12004_v26 = vrot.slane %v11990_v52, %v14632_v37  ;;  %v11981_v45 = vrot.slane %v11973_v29, %v14632_v37  ;;  %v11988_v18 = vrot.slane %v11974_v11, %v14632_v37 }
 0x86c   : > { %v12038_v21 = vcombine.high %v11981_v45, %v11997_v36  ;;  %v12054_v5 = vcombine.high %v11988_v18, %v12004_v26  ;;  %v12037_v9 = vcombine.low %v11981_v45, %v11997_v36  ;;  %v12053_v44 = vcombine.low %v11988_v18, %v12004_v26 }
 0x86e   : > { %v17085_v4 = vrot.slane %v12037_v9, %v14673_v50  ;;  %v17088_v63 = vrot.slane %v12053_v44, %v14673_v50  ;;  %v17091_v22 = vrot.slane %v12038_v21, %v14673_v50  ;;  %v17094_v53 = vrot.slane %v12054_v5, %v14673_v50 }
 0x877   : > { %v11637_v54 = vpop.trf.xlu1  ;;  %v11605_v39 = vpop.trf.xlu0 }
 0x887   : > { %v11701_v0 = vpop.trf.xlu1  ;;  %v11669_v17 = vpop.trf.xlu0 }
 0x888   : > { %v12021_v59 = vcombine.low %v11637_v54, %v11701_v0  ;;  %v12022_v47 = vcombine.high %v11637_v54, %v11701_v0  ;;  %v12005_v16 = vcombine.low %v11605_v39, %v11669_v17  ;;  %v12006_v19 = vcombine.high %v11605_v39, %v11669_v17 }
 0x88a   : > { %v12029_v31 = vrot.slane %v12021_v59, %v14632_v37  ;;  %v12036_v10 = vrot.slane %v12022_v47, %v14632_v37  ;;  %v12013_v27 = vrot.slane %v12005_v16, %v14632_v37  ;;  %v12020_v38 = vrot.slane %v12006_v19, %v14632_v37 }
 0x88c   : > { %v12069_v61 = vcombine.low %v12013_v27, %v12029_v31  ;;  %v12070_v33 = vcombine.high %v12013_v27, %v12029_v31  ;;  %v12085_v32 = vcombine.low %v12020_v38, %v12036_v10  ;;  %v12086_v48 = vcombine.high %v12020_v38, %v12036_v10 }
 0x88e   : > { %v12077_v23 = vrot.slane %v12069_v61, %v14673_v50  ;;  %v17098_v58 = vrot.slane %v12070_v33, %v14673_v50  ;;  %v12093_v42 = vrot.slane %v12085_v32, %v14673_v50  ;;  %v17102_v43 = vrot.slane %v12086_v48, %v14673_v50  ;;  %v17151_v32 = vld [vmem:[%s17296_s6] ss:$0 sm:$0xff] }
 0x890   : > { %v12101_v7 = vcombine.low %v17085_v4, %v12077_v23  ;;  %v12105_v57 = vcombine.low %v17088_v63, %v12093_v42  ;;  %v12102_v28 = vcombine.high %v17085_v4, %v12077_v23  ;;  %v12106_v62 = vcombine.high %v17088_v63, %v12093_v42 }
 0x891   : > { %v12103_v35 = vcombine.low %v17091_v22, %v17098_v58  ;;  %v12107_v41 = vcombine.low %v17094_v53, %v17102_v43  ;;  %v12104_v60 = vcombine.high %v17091_v22, %v17098_v58  ;;  %v12108_v13 = vcombine.high %v17094_v53, %v17102_v43  ;;  %v17156_v22 = vld [vmem:[%s17297_s7] ss:$0 sm:$0xff] }
 0x892   : > { %13828 = vmatprep.mubr.msk.f32.mxu0 %vm849_vm1, %v12101_v7  ;;  %13840 = vmatprep.mubr.msk.f32.mxu1 %vm849_vm1, %v12105_v57 }
 0x897   : > { %v11765_v51 = vpop.trf.xlu1  ;;  %v11733_v46 = vpop.trf.xlu0 }
 0x8a7   : > { %v11829_v8 = vpop.trf.xlu1  ;;  %v11797_v14 = vpop.trf.xlu0 }
 0x8a8   : > { %v12125_v15 = vcombine.low %v11765_v51, %v11829_v8  ;;  %v12126_v20 = vcombine.high %v11765_v51, %v11829_v8  ;;  %v12109_v49 = vcombine.low %v11733_v46, %v11797_v14  ;;  %v12110_v2 = vcombine.high %v11733_v46, %v11797_v14 }
 0x8aa   : > { %v12133_v25 = vrot.slane %v12125_v15, %v14632_v37  ;;  %v12140_v6 = vrot.slane %v12126_v20, %v14632_v37  ;;  %v12117_v1 = vrot.slane %v12109_v49, %v14632_v37  ;;  %v12124_v24 = vrot.slane %v12110_v2, %v14632_v37  ;;  %v17694_v2 = vld [vmem:[#allocation4_spill] sm:$0xff] }
 0x8ac   : > { %v12173_v29 = vcombine.low %v12117_v1, %v12133_v25  ;;  %v12189_v11 = vcombine.low %v12124_v24, %v12140_v6  ;;  %v12174_v16 = vcombine.high %v12117_v1, %v12133_v25  ;;  %v12190_v19 = vcombine.high %v12124_v24, %v12140_v6 }
 0x8ae   : > { %v12181_v54 = vrot.slane %v12173_v29, %v14673_v50  ;;  %v12197_v39 = vrot.slane %v12189_v11, %v14673_v50  ;;  %v12188_v38 = vrot.slane %v12174_v16, %v14673_v50  ;;  %v12204_v4 = vrot.slane %v12190_v19, %v14673_v50 }
 0x8b7   : > { %v11893_v40 = vpop.trf.xlu1  ;;  %v11861_v56 = vpop.trf.xlu0 }
 0x8c7   : > { %v11957_v55 = vpop.trf.xlu1  ;;  %v11925_v34 = vpop.trf.xlu0 }
 0x8c8   : > { %v12157_v3 = vcombine.low %v11893_v40, %v11957_v55  ;;  %v12158_v12 = vcombine.high %v11893_v40, %v11957_v55  ;;  %v12141_v30 = vcombine.low %v11861_v56, %v11925_v34  ;;  %v12142_v52 = vcombine.high %v11861_v56, %v11925_v34  ;;  %v17695_v34 = vld [vmem:[#allocation12_spill] sm:$0xff] }
 0x8ca   : > { %v12165_v36 = vrot.slane %v12157_v3, %v14632_v37  ;;  %v12172_v26 = vrot.slane %v12158_v12, %v14632_v37  ;;  %v12149_v45 = vrot.slane %v12141_v30, %v14632_v37  ;;  %v12156_v18 = vrot.slane %v12142_v52, %v14632_v37  ;;  %v17696_v12 = vld [vmem:[#allocation3_spill] sm:$0xff] }
 0x8cc   : > { %v12205_v21 = vcombine.low %v12149_v45, %v12165_v36  ;;  %v12221_v5 = vcombine.low %v12156_v18, %v12172_v26  ;;  %v12206_v0 = vcombine.high %v12149_v45, %v12165_v36  ;;  %v12222_v17 = vcombine.high %v12156_v18, %v12172_v26  ;;  %v17697_v26 = vld [vmem:[#allocation6_spill] sm:$0xff] }
 0x8ce   : > { %v12213_v9 = vrot.slane %v12205_v21, %v14673_v50  ;;  %v12229_v44 = vrot.slane %v12221_v5, %v14673_v50  ;;  %v12220_v37 = vrot.slane %v12206_v0, %v14673_v50  ;;  %v12236_v31 = vrot.slane %v12222_v17, %v14673_v50  ;;  %v17698_v5 = vld [vmem:[#allocation14_spill] sm:$0xff] }
 0x8d0   : > { %v12237_v59 = vcombine.low %v12181_v54, %v12213_v9  ;;  %v12241_v47 = vcombine.low %v12197_v39, %v12229_v44  ;;  %v12238_v10 = vcombine.high %v12181_v54, %v12213_v9  ;;  %v12242_v27 = vcombine.high %v12197_v39, %v12229_v44 }
 0x8d1   : > { %v12239_v63 = vcombine.low %v12188_v38, %v12220_v37  ;;  %v12243_v61 = vcombine.low %v12204_v4, %v12236_v31  ;;  %v12240_v33 = vcombine.high %v12188_v38, %v12220_v37  ;;  %v12244_v50 = vcombine.high %v12204_v4, %v12236_v31  ;;  %v17699_v31 = vld [vmem:[#allocation5_spill] sm:$0xff] }
 0x8d2   : > { %13829 = vmatmul.mubr.msk.f32.vlgmr.msra.gmra.mrb[72].mxu0 %vm849_vm1, %v12237_v59  ;;  %13841 = vmatmul.mubr.msk.f32.vlgmr.msra.gmra.mrb[72].mxu1 %vm849_vm1, %v12241_v47 }
 0x8d3   : > { %13831 = vmatprep.mubr.msk.f32.mxu0 %vm849_vm1, %v12102_v28  ;;  %13843 = vmatprep.mubr.msk.f32.mxu1 %vm849_vm1, %v12106_v62 }
 0x8d6   : > { %13832 = vmatmul.mubr.msk.f32.gmra.mrb[74].mxu0 %vm849_vm1, %v12238_v10  ;;  %13844 = vmatmul.mubr.msk.f32.gmra.mrb[74].mxu1 %vm849_vm1, %v12242_v27 }
 0x8d7   : > { %13834 = vmatprep.mubr.msk.f32.mxu0 %vm849_vm1, %v12103_v35  ;;  %13846 = vmatprep.mubr.msk.f32.mxu1 %vm849_vm1, %v12107_v41 }
 0x8da   : > { %13835 = vmatmul.mubr.msk.f32.gmra.mrb[76].mxu0 %vm849_vm1, %v12239_v63  ;;  %13847 = vmatmul.mubr.msk.f32.gmra.mrb[76].mxu1 %vm849_vm1, %v12243_v61  ;;  %v17700_v63 = vld [vmem:[#allocation11_spill] sm:$0xff] }
 0x8db   : > { %13837 = vmatprep.mubr.msk.f32.mxu0 %vm849_vm1, %v12104_v60  ;;  %13849 = vmatprep.mubr.msk.f32.mxu1 %vm849_vm1, %v12108_v13 }
 0x8de   : > { %13838 = vmatmul.mubr.msk.f32.gmra.mrb[78].mxu0 %vm849_vm1, %v12240_v33  ;;  %13850 = vmatmul.mubr.msk.f32.gmra.mrb[78].mxu1 %vm849_vm1, %v12244_v50  ;;  %v17701_v33 = vld [vmem:[#allocation13_spill] sm:$0xff] }
 0x9a5   : > { %v13830_v48 = vpop.f32.mrb[72].mxu0  ;;  %v13842_v53 = vpop.f32.mrb[72].mxu1 }
 0x9a6   : > { %v12376_v23 = vadd.f32 %v13830_v48, %v17151_v32  ;;  %v12416_v58 = vadd.f32 %v13842_v53, %v17151_v32  ;;  %v12370_v42 = vpop.f32.mrb[73].mxu0  ;;  %v12410_v43 = vpop.f32.mrb[73].mxu1 }
 0x9a7   : > { %v12371_v7 = vadd.f32 %v17151_v32, %v12370_v42  ;;  %v12411_v57 = vadd.f32 %v17151_v32, %v12410_v43 }
 0x9a8   : > { %vm12450_vm1 = vcmp.ge.f32.partialorder %v12376_v23, 0.0  ;;  %v12473_v28 = vmul.f32 %v17156_v22, %v12376_v23  ;;  %vm12458_vm6 = vcmp.ge.f32.partialorder %v12416_v58, 0.0  ;;  %v12481_v62 = vmul.f32 %v17156_v22, %v12416_v58 }
 0x9a9   : > { %vm12449_vm7 = vcmp.ge.f32.partialorder %v12371_v7, 0.0  ;;  %v12472_v35 = vmul.f32 %v17156_v22, %v12371_v7  ;;  %v13833_v41 = vpop.f32.mrb[74].mxu0  ;;  %v13845_v60 = vpop.f32.mrb[74].mxu1  ;;  %v12480_v51 = vmul.f32 %v17156_v22, %v12411_v57  ;;  %vm12457_vm8 = vcmp.ge.f32.partialorder %v12411_v57, 0.0 }
 0x9aa   : > { %v12489_v13 = vsel %vm12450_vm1, %v12376_v23, %v12473_v28  ;;  %v12386_v46 = vadd.f32 %v13833_v41, %v17151_v32  ;;  %v12426_v8 = vadd.f32 %v13845_v60, %v17151_v32  ;;  %v12380_v14 = vpop.f32.mrb[75].mxu0  ;;  %v12420_v15 = vpop.f32.mrb[75].mxu1  ;;  %v12497_v20 = vsel %vm12458_vm6, %v12416_v58, %v12481_v62 }
 0x9ab   : > { %v12488_v49 = vsel %vm12449_vm7, %v12371_v7, %v12472_v35  ;;  %v12505_v40 = vadd.f32 %v12489_v13, %v17694_v2  ;;  %v12381_v6 = vadd.f32 %v17151_v32, %v12380_v14  ;;  %v12421_v1 = vadd.f32 %v17151_v32, %v12420_v15 }
 0x9ac   : > { %vm12452_vm9 = vcmp.ge.f32.partialorder %v12386_v46, 0.0  ;;  %v12475_v56 = vmul.f32 %v17156_v22, %v12386_v46  ;;  %vm12460_vm10 = vcmp.ge.f32.partialorder %v12426_v8, 0.0  ;;  %v12483_v25 = vmul.f32 %v17156_v22, %v12426_v8 }
 0x9ad   : > { %v13836_v24 = vpop.f32.mrb[76].mxu0  ;;  %v13848_v55 = vpop.f32.mrb[76].mxu1  ;;  %v12513_v3 = vadd.f32 %v12497_v20, %v17695_v34  ;;  %v17175_v30 = vadd.f32 %v12488_v49, %v17696_v12  ;;  %v12496_v52 = vsel %vm12457_vm8, %v12411_v57, %v12480_v51  ;;  %vm12451_vm11 = vcmp.ge.f32.partialorder %v12381_v6, 0.0  ;;  %v17702_v57 = vld [vmem:[#allocation2_spill] sm:$0xff] }
 0x9ae   : > { %v12491_v29 = vsel %vm12452_vm9, %v12386_v46, %v12475_v56  ;;  %v12390_v11 = vpop.f32.mrb[77].mxu0  ;;  %v12430_v36 = vpop.f32.mrb[77].mxu1  ;;  %v12499_v18 = vsel %vm12460_vm10, %v12426_v8, %v12483_v25  ;;  %v12474_v21 = vmul.f32 %v17156_v22, %v12381_v6  ;;  %vm12459_vm12 = vcmp.ge.f32.partialorder %v12421_v1, 0.0  ;;  %v17703_v56 = vld [vmem:[#allocation8_spill] sm:$0xff]  ;;  %v17705_v34 = vld [vmem:[#allocation10_spill] sm:$0xff] }
 0x9af   : > { %v12507_v45 = vadd.f32 %v12491_v29, %v17697_v26  ;;  %v12515_v54 = vadd.f32 %v12499_v18, %v17698_v5  ;;  %v12482_v39 = vmul.f32 %v17156_v22, %v12421_v1  ;;  %v12396_v9 = vadd.f32 %v13836_v24, %v17151_v32  ;;  %v17706_v12 = vld [vmem:[#allocation18_spill] sm:$0xff] }
 0x9b0   : > { %v12490_v17 = vsel %vm12451_vm11, %v12381_v6, %v12474_v21  ;;  %v12436_v59 = vadd.f32 %v13848_v55, %v17151_v32  ;;  %v17185_v61 = vadd.f32 %v12496_v52, %v17700_v63  ;;  %v12391_v7 = vadd.f32 %v17151_v32, %v12390_v11  ;;  %v17704_v6 = vld [vmem:[#allocation16_spill] sm:$0xff] }
 0x9b1   : > { %v12672_v44 = vcombine.low %v12505_v40, %v12507_v45  ;;  %v12673_v0 = vcombine.high %v12505_v40, %v12507_v45  ;;  %v13839_v47 = vpop.f32.mrb[78].mxu0  ;;  %v13851_v16 = vpop.f32.mrb[78].mxu1  ;;  %v12676_v19 = vcombine.low %v12513_v3, %v12515_v54  ;;  %v12677_v37 = vcombine.high %v12513_v3, %v12515_v54 }
 0x9b2   : > { %v12506_v10 = vadd.f32 %v12490_v17, %v17699_v31  ;;  %v12498_v27 = vsel %vm12459_vm12, %v12421_v1, %v12482_v39  ;;  %v12400_v38 = vpop.f32.mrb[79].mxu0  ;;  %v12440_v4 = vpop.f32.mrb[79].mxu1  ;;  %v12477_v23 = vmul.f32 %v17156_v22, %v12396_v9  ;;  %vm12454_vm13 = vcmp.ge.f32.partialorder %v12396_v9, 0.0  ;;  %v17707_v17 = vld [vmem:[#allocation7_spill] sm:$0xff]  ;;  %v17710_v31 = vld [vmem:[#allocation17_spill] sm:$0xff] }
 0x9b3   : > { %v17188_v50 = vadd.f32 %v12498_v27, %v17701_v33  ;;  %vm12462_vm14 = vcmp.ge.f32.partialorder %v12436_v59, 0.0  ;;  %v12485_v43 = vmul.f32 %v17156_v22, %v12436_v59  ;;  %v12686_v28 = vrot.slane %v12672_v44, %v17702_v57 }
 0x9b4   : > { %v12536_v48 = vcombine.low %v17175_v30, %v12506_v10  ;;  %v12537_v53 = vcombine.high %v17175_v30, %v12506_v10  ;;  %v12431_v62 = vadd.f32 %v17151_v32, %v12430_v36  ;;  %v12406_v35 = vadd.f32 %v13839_v47, %v17151_v32  ;;  %v17708_v47 = vld [vmem:[#allocation15_spill] sm:$0xff] }
 0x9b5   : > { %v12540_v58 = vcombine.low %v17185_v61, %v17188_v50  ;;  %v12541_v42 = vcombine.high %v17185_v61, %v17188_v50  ;;  %v12693_v41 = vrot.slane %v12673_v0, %v17702_v57  ;;  %v12714_v60 = vrot.slane %v12676_v19, %v17702_v57  ;;  %v17709_v19 = vld [vmem:[#allocation9_spill] sm:$0xff] }
 0x9b6   : > { %v12493_v13 = vsel %vm12454_vm13, %v12396_v9, %v12477_v23  ;;  %v12446_v51 = vadd.f32 %v13851_v16, %v17151_v32  ;;  %v12721_v46 = vrot.slane %v12677_v37, %v17702_v57  ;;  %v12501_v8 = vsel %vm12462_vm14, %v12436_v59, %v12485_v43 }
 0x9b7   : > { %v12476_v14 = vmul.f32 %v17156_v22, %v12391_v7  ;;  %vm12456_vm15 = vcmp.ge.f32.partialorder %v12406_v35, 0.0  ;;  %v12484_v15 = vmul.f32 %v17156_v22, %v12431_v62  ;;  %v12479_v20 = vmul.f32 %v17156_v22, %v12406_v35 }
 0x9b8   : > { %vm12464_vm0 = vcmp.ge.f32.partialorder %v12446_v51, 0.0  ;;  %v12487_v49 = vmul.f32 %v17156_v22, %v12446_v51  ;;  %vm12453_vm2 = vcmp.ge.f32.partialorder %v12391_v7, 0.0  ;;  %vm12461_vm3 = vcmp.ge.f32.partialorder %v12431_v62, 0.0 }
 0x9b9   : > { %v12401_v2 = vadd.f32 %v17151_v32, %v12400_v38  ;;  %v12441_v40 = vadd.f32 %v17151_v32, %v12440_v4  ;;  %v12509_v25 = vadd.f32 %v12493_v13, %v17703_v56  ;;  %v12517_v1 = vadd.f32 %v12501_v8, %v17704_v6 }
 0x9ba   : > { %v12495_v24 = vsel %vm12456_vm15, %v12406_v35, %v12479_v20  ;;  %v12503_v55 = vsel %vm12464_vm0, %v12446_v51, %v12487_v49  ;;  %v12492_v29 = vsel %vm12453_vm2, %v12391_v7, %v12476_v14  ;;  %v12500_v11 = vsel %vm12461_vm3, %v12431_v62, %v12484_v15 }
 0x9bb   : > { %v12511_v3 = vadd.f32 %v12495_v24, %v17705_v34  ;;  %v12519_v30 = vadd.f32 %v12503_v55, %v17706_v12  ;;  %vm12455_vm4 = vcmp.ge.f32.partialorder %v12401_v2, 0.0  ;;  %v12478_v52 = vmul.f32 %v17156_v22, %v12401_v2 }
 0x9bc   : > { %vm12463_vm5 = vcmp.ge.f32.partialorder %v12441_v40, 0.0  ;;  %v12486_v36 = vmul.f32 %v17156_v22, %v12441_v40  ;;  %v17219_v21 = vrot.slane %v12536_v48, %v17702_v57  ;;  %v17222_v5 = vrot.slane %v12537_v53, %v17702_v57 }
 0x9bd   : > { %v12674_v26 = vcombine.low %v12509_v25, %v12511_v3  ;;  %v12675_v32 = vcombine.high %v12509_v25, %v12511_v3  ;;  %v12678_v45 = vcombine.low %v12517_v1, %v12519_v30  ;;  %v12679_v18 = vcombine.high %v12517_v1, %v12519_v30 }
 0x9be   : > { %v12494_v54 = vsel %vm12455_vm4, %v12401_v2, %v12478_v52  ;;  %v12502_v39 = vsel %vm12463_vm5, %v12441_v40, %v12486_v36  ;;  %v12508_v59 = vadd.f32 %v12492_v29, %v17707_v17  ;;  %v12516_v16 = vadd.f32 %v12500_v11, %v17708_v47 }
 0x9bf   : > { %v12700_v9 = vrot.slane %v12674_v26, %v17702_v57  ;;  %v12707_v44 = vrot.slane %v12675_v32, %v17702_v57  ;;  %v12728_v0 = vrot.slane %v12678_v45, %v17702_v57  ;;  %v12735_v22 = vrot.slane %v12679_v18, %v17702_v57 }
 0x9c0   : > { %v12510_v37 = vadd.f32 %v12494_v54, %v17709_v19  ;;  %v12518_v10 = vadd.f32 %v12502_v39, %v17710_v31  ;;  %v12578_v3 = vrot.slane %v12540_v58, %v17702_v57  ;;  %v12585_v12 = vrot.slane %v12541_v42, %v17702_v57 }
 0x9c1   : > { %v12736_v27 = vcombine.low %v12686_v28, %v12700_v9  ;;  %v12737_v38 = vcombine.high %v12686_v28, %v12700_v9  ;;  %v12738_v4 = vcombine.low %v12693_v41, %v12707_v44  ;;  %v12739_v63 = vcombine.high %v12693_v41, %v12707_v44 }
 0x9c2   : > { %v12740_v33 = vcombine.low %v12714_v60, %v12728_v0  ;;  %v12741_v48 = vcombine.high %v12714_v60, %v12728_v0  ;;  %v12742_v53 = vcombine.low %v12721_v46, %v12735_v22  ;;  %v12743_v23 = vcombine.high %v12721_v46, %v12735_v22 }
 0x9c3   : > { %v12750_v43 = vrot.slane %v12736_v27, %v17702_v57  ;;  %v12757_v7 = vrot.slane %v12738_v4, %v17702_v57  ;;  %v12764_v62 = vrot.slane %v12737_v38, %v17702_v57  ;;  %v12771_v35 = vrot.slane %v12739_v63, %v17702_v57 }
 0x9c4   : > { %v12778_v13 = vrot.slane %v12740_v33, %v17702_v57  ;;  %v12785_v51 = vrot.slane %v12742_v53, %v17702_v57  ;;  %v12792_v28 = vrot.slane %v12741_v48, %v17702_v57  ;;  %v12799_v41 = vrot.slane %v12743_v23, %v17702_v57 }
 0x9c5   : > { %v12538_v60 = vcombine.low %v12508_v59, %v12510_v37  ;;  %v12539_v46 = vcombine.high %v12508_v59, %v12510_v37  ;;  %v12542_v8 = vcombine.low %v12516_v16, %v12518_v10  ;;  %v12543_v14 = vcombine.high %v12516_v16, %v12518_v10 }
 0x9c6   : > { %v12800_v15 = vcombine.low %v12750_v43, %v12778_v13  ;;  %v12801_v20 = vcombine.high %v12750_v43, %v12778_v13  ;;  %v12802_v49 = vcombine.low %v12757_v7, %v12785_v51  ;;  %v12803_v2 = vcombine.high %v12757_v7, %v12785_v51 }
 0x9c7   : > { %v12804_v40 = vcombine.low %v12764_v62, %v12792_v28  ;;  %v12805_v56 = vcombine.high %v12764_v62, %v12792_v28  ;;  %v12806_v25 = vcombine.low %v12771_v35, %v12799_v41  ;;  %v12807_v6 = vcombine.high %v12771_v35, %v12799_v41 }
 0x9c8   : > { %12832 = vst [vmem:[%s17245_s26 + $0x40] sm:$0xff] %v12800_v15  ;;  %12834 = vst [vmem:[%s17245_s26 + $0x50] sm:$0xff] %v12801_v20  ;;  %v12564_v1 = vrot.slane %v12538_v60, %v17702_v57  ;;  %v12571_v24 = vrot.slane %v12539_v46, %v17702_v57  ;;  %v12592_v55 = vrot.slane %v12542_v8, %v17702_v57 }
 0x9c9   : > { %12836 = vst [vmem:[%s17245_s26 + $0x60] sm:$0xff] %v12802_v49  ;;  %12838 = vst [vmem:[%s17245_s26 + $0x70] sm:$0xff] %v12803_v2  ;;  %v12599_v34 = vrot.slane %v12543_v14, %v17702_v57 }
 0x9ca   : > { %12833 = vst [vmem:[%s17245_s26 + $0x48] sm:$0xff] %v12804_v40  ;;  %12835 = vst [vmem:[%s17245_s26 + $0x58] sm:$0xff] %v12805_v56  ;;  %v12600_v30 = vcombine.low %v17219_v21, %v12564_v1  ;;  %v12601_v52 = vcombine.high %v17219_v21, %v12564_v1  ;;  %v12602_v29 = vcombine.low %v17222_v5, %v12571_v24 }
 0x9cb   : > { %12837 = vst [vmem:[%s17245_s26 + $0x68] sm:$0xff] %v12806_v25  ;;  %12839 = vst [vmem:[%s17245_s26 + $0x78] sm:$0xff] %v12807_v6  ;;  %v12603_v11 = vcombine.high %v17222_v5, %v12571_v24  ;;  %v12604_v36 = vcombine.low %v12578_v3, %v12592_v55  ;;  %v12605_v26 = vcombine.high %v12578_v3, %v12592_v55 }
 0x9cc   : > { %v12606_v58 = vcombine.low %v12585_v12, %v12599_v34  ;;  %v12607_v32 = vcombine.high %v12585_v12, %v12599_v34  ;;  %v12614_v45 = vrot.slane %v12600_v30, %v17702_v57  ;;  %v12621_v61 = vrot.slane %v12602_v29, %v17702_v57 }
 0x9cd   : > { %v12628_v50 = vrot.slane %v12601_v52, %v17702_v57  ;;  %v12635_v42 = vrot.slane %v12603_v11, %v17702_v57  ;;  %v12642_v18 = vrot.slane %v12604_v36, %v17702_v57  ;;  %v12656_v5 = vrot.slane %v12605_v26, %v17702_v57 }
 0x9ce   : > { %v12649_v21 = vrot.slane %v12606_v58, %v17702_v57  ;;  %v12663_v54 = vrot.slane %v12607_v32, %v17702_v57 }
 0x9cf   : > { %v12664_v39 = vcombine.low %v12614_v45, %v12642_v18  ;;  %v12665_v9 = vcombine.high %v12614_v45, %v12642_v18  ;;  %v12668_v22 = vcombine.low %v12628_v50, %v12656_v5  ;;  %v12669_v17 = vcombine.high %v12628_v50, %v12656_v5 }
 0x9d0   : > { %v12666_v44 = vcombine.low %v12621_v61, %v12649_v21  ;;  %v12667_v0 = vcombine.high %v12621_v61, %v12649_v21  ;;  %v12670_v59 = vcombine.low %v12635_v42, %v12663_v54  ;;  %v12671_v47 = vcombine.high %v12635_v42, %v12663_v54 }
 0x9d1   : > { %12824 = vst [vmem:[%s17245_s26] sm:$0xff] %v12664_v39  ;;  %12826 = vst [vmem:[%s17245_s26 + $0x10] sm:$0xff] %v12665_v9 }
 0x9d2   : > { %12828 = vst [vmem:[%s17245_s26 + $0x20] sm:$0xff] %v12666_v44  ;;  %12830 = vst [vmem:[%s17245_s26 + $0x30] sm:$0xff] %v12667_v0 }
 0x9d3   : > { %12825 = vst [vmem:[%s17245_s26 + $0x8] sm:$0xff] %v12668_v22  ;;  %12827 = vst [vmem:[%s17245_s26 + $0x18] sm:$0xff] %v12669_v17 }
 0x9d4   : > { %12829 = vst [vmem:[%s17245_s26 + $0x28] sm:$0xff] %v12670_v59  ;;  %12831 = vst [vmem:[%s17245_s26 + $0x38] sm:$0xff] %v12671_v47 }
 0x9d5 PF: > { %s18_s27 = sadd.s32 1, %s14245_s27  }
 0x9d6   : > { %p15_p4 = scmp.ge.s32.totalorder %s18_s27, 4  }
 0x9d8   :  { %17 = sbr.rel (!%p15_p4) target bundleno = 1 (0x1), region = 82 }

</bundles_post_ra>
